<compile_context>
chip_gen: v6e
topology: v6e:2x2x1
jax: 0.10.0
libtpu: 0.0.40
codegen_flags: <defaults>
</compile_context>

<pallas_src>
import math

import jax
import jax.numpy as jnp
from jax import lax
from jax.experimental import pallas as pl
from jax.experimental.pallas import tpu as pltpu


# ----------------------------------------------------------------------------
# Kernel 1: one fused bidirectional GRU layer.
# ----------------------------------------------------------------------------
def bigru_layer_kernel(x_ref, wih_ref, bih_ref, whh_ref, bhh_ref, out_ref,
                       gi_ref, h_ref):
    # x_ref:   [T*B, Din]  time-major rows (row = t*B + b)
    # wih_ref: [Din, 6H]   columns = [fwd r|z|n , bwd r|z|n]  (W_ih^T, both dirs)
    # bih_ref: [1, 6H]
    # whh_ref: [2H, 6H]    block-diagonal: [:H,:3H]=W_hh_f^T, [H:,3H:]=W_hh_b^T
    # bhh_ref: [1, 6H]
    # out_ref: [T, B, 2H]  lanes = [fwd H | bwd H]
    # gi_ref:  [T*B, 6H]   scratch: hoisted input projection
    # h_ref:   [B, 2H]     scratch: hidden state [h_fwd | h_bwd]
    T, B, H2 = out_ref.shape
    H = H2 // 2
    G = 3 * H

    # Hoisted input projection for BOTH directions: one big MXU GEMM, bias folded in.
    gi_ref[...] = (
        jnp.dot(x_ref[...], wih_ref[...], preferred_element_type=jnp.float32)
        + bih_ref[...]
    )

    h_ref[...] = jnp.zeros_like(h_ref)

    # Hoist weight load and bias broadcast out of the sequential loop.
    whh = whh_ref[...]                                      # [2H, 6H]
    bhh = jnp.broadcast_to(bhh_ref[...], (B, 2 * G))        # [B, 6H]

    def cell(gi_d, gh_d, h_prev_d):
        # PyTorch GRU gate order: r, z, n.
        r = jax.nn.sigmoid(gi_d[:, 0:H] + gh_d[:, 0:H])
        z = jax.nn.sigmoid(gi_d[:, H:2 * H] + gh_d[:, H:2 * H])
        n = jnp.tanh(gi_d[:, 2 * H:G] + r * gh_d[:, 2 * H:G])
        return (1.0 - z) * n + z * h_prev_d

    def step(t, carry):
        rt = T - 1 - t                                      # backward-direction time index
        h_prev = h_ref[...]                                 # [B, 2H] = [h_f | h_b]

        # Single recurrent matmul for both directions (block-diagonal W_hh^T).
        gh = jnp.dot(h_prev, whh, preferred_element_type=jnp.float32) + bhh   # [B, 6H]

        gi_f = gi_ref[pl.ds(t * B, B), 0:G]                 # fwd gates at time t
        gi_b = gi_ref[pl.ds(rt * B, B), G:2 * G]            # bwd gates at time T-1-t

        h_f = cell(gi_f, gh[:, 0:G], h_prev[:, 0:H])
        h_b = cell(gi_b, gh[:, G:2 * G], h_prev[:, H:H2])

        h_ref[...] = jnp.concatenate([h_f, h_b], axis=1)
        out_ref[t, :, 0:H] = h_f.astype(out_ref.dtype)      # fwd half, time t
        out_ref[rt, :, H:H2] = h_b.astype(out_ref.dtype)    # bwd half, time T-1-t
        return carry

    # T is small here; full unroll gives the scheduler cross-iteration visibility.
    lax.fori_loop(0, T, step, 0, unroll=True)


def bigru_layer_pallas(x_tm, wih6, bih6, whh_blk, bhh6):
    """x_tm: [T, B, Din] time-major -> [T, B, 2H] time-major (fwd | bwd)."""
    T, B, Din = x_tm.shape
    H2 = whh_blk.shape[0]          # 2H
    G2 = whh_blk.shape[1]          # 6H
    x2d = x_tm.reshape(T * B, Din)  # contiguous row-major: a free HBM view

    out = pl.pallas_call(
        bigru_layer_kernel,
        out_shape=jax.ShapeDtypeStruct((T, B, H2), jnp.float32),
        in_specs=[pl.BlockSpec(memory_space=pltpu.MemorySpace.VMEM)] * 5,
        out_specs=pl.BlockSpec(memory_space=pltpu.MemorySpace.VMEM),
        scratch_shapes=[
            pltpu.VMEM((T * B, G2), jnp.float32),   # hoisted input projection
            pltpu.VMEM((B, H2), jnp.float32),       # hidden state [h_fwd | h_bwd]
        ],
        compiler_params=pltpu.CompilerParams(vmem_limit_bytes=32 * 1024 * 1024),
    )(x2d, wih6, bih6, whh_blk, bhh6)
    return out


# ----------------------------------------------------------------------------
# Kernel 2: attention pooling (masked softmax over time) + classifier head.
# ----------------------------------------------------------------------------
def attn_classifier_kernel(rnn_ref, mask_ref, watt_ref, batt_ref,
                           wcls_ref, bcls_ref, logits_ref, attn_ref):
    # rnn_ref:  [B, T, 2H]   mask_ref: [B, T] float (1.0 valid / 0.0 pad)
    # watt_ref: [1, 2H]      batt_ref: [1, 1]
    # wcls_ref: [2H, C]      bcls_ref: [1, C]
    rnn = rnn_ref[...]
    B, T, H2 = rnn.shape

    # attention scores: Linear(2H -> 1), squeeze(-1)   (tiny lane reduction)
    scores = jnp.sum(rnn * watt_ref[...].reshape(1, 1, H2), axis=-1) + batt_ref[0, 0]

    # masked softmax over the sequence axis (all-pad rows degrade to uniform, not NaN)
    scores = jnp.where(mask_ref[...] > 0.0, scores, jnp.float32(-1e30))
    scores = scores - jnp.max(scores, axis=1, keepdims=True)
    e = jnp.exp(scores)
    attn = e / jnp.sum(e, axis=1, keepdims=True)            # [B, T]
    attn_ref[...] = attn

    # weighted sum over time as a batched MXU matmul: [B,1,T] @ [B,T,2H] -> [B,1,2H]
    weighted = jnp.einsum(
        'bqt,bth->bqh', attn[:, None, :], rnn,
        preferred_element_type=jnp.float32,
    ).reshape(B, H2)

    # classifier Linear(2H -> C)
    logits_ref[...] = (
        jnp.dot(weighted, wcls_ref[...], preferred_element_type=jnp.float32)
        + bcls_ref[...]
    )


def attn_classifier_pallas(rnn_bm, mask_f, w_att, b_att, w_cls, b_cls):
    B, T, H2 = rnn_bm.shape
    C = w_cls.shape[0]
    logits, attn = pl.pallas_call(
        attn_classifier_kernel,
        out_shape=(
            jax.ShapeDtypeStruct((B, C), jnp.float32),
            jax.ShapeDtypeStruct((B, T), jnp.float32),
        ),
        in_specs=[pl.BlockSpec(memory_space=pltpu.MemorySpace.VMEM)] * 6,
        out_specs=(
            pl.BlockSpec(memory_space=pltpu.MemorySpace.VMEM),
            pl.BlockSpec(memory_space=pltpu.MemorySpace.VMEM),
        ),
        compiler_params=pltpu.CompilerParams(vmem_limit_bytes=32 * 1024 * 1024),
    )(
        rnn_bm,
        mask_f,
        w_att.reshape(1, -1),               # attention_layer.weight [1, 2H]
        b_att.reshape(1, 1),
        jnp.transpose(w_cls),               # classifier.weight^T [2H, C]
        b_cls.reshape(1, -1),
    )
    return logits, attn


# ----------------------------------------------------------------------------
# Parameter init (xavier-uniform, like the PyTorch module) + kernel-side packing.
# ----------------------------------------------------------------------------
def xavier_uniform(key, shape):
    fan_out, fan_in = shape[0], shape[1]
    bound = math.sqrt(6.0 / (fan_in + fan_out))
    return jax.random.uniform(key, shape, jnp.float32, -bound, bound)


def pack_bigru_params(w_ih_f, w_hh_f, b_ih_f, b_hh_f,
                      w_ih_b, w_hh_b, b_ih_b, b_hh_b):
    """Pack PyTorch-layout GRU weights into the fused-kernel layout (done once)."""
    H = w_hh_f.shape[1]
    wih6 = jnp.concatenate([w_ih_f.T, w_ih_b.T], axis=1)          # [Din, 6H]
    bih6 = jnp.concatenate([b_ih_f, b_ih_b]).reshape(1, -1)       # [1, 6H]
    whh_blk = jnp.zeros((2 * H, 6 * H), jnp.float32)
    whh_blk = whh_blk.at[:H, :3 * H].set(w_hh_f.T)
    whh_blk = whh_blk.at[H:, 3 * H:].set(w_hh_b.T)                # block-diagonal
    bhh6 = jnp.concatenate([b_hh_f, b_hh_b]).reshape(1, -1)       # [1, 6H]
    return dict(wih6=wih6, bih6=bih6, whh_blk=whh_blk, bhh6=bhh6)


def init_params(key, vocab_size, embed_dim, hidden_dim, num_classes, num_layers=2):
    keys = jax.random.split(key, 16)
    ki = iter(keys)

    emb = xavier_uniform(next(ki), (vocab_size, embed_dim))
    emb = emb.at[0].set(0.0)  # padding_idx=0 row zeroed

    gru = []
    for layer in range(num_layers):
        d_in = embed_dim if layer == 0 else 2 * hidden_dim
        dirs = []
        for _ in range(2):  # forward, backward
            w_ih = xavier_uniform(next(ki), (3 * hidden_dim, d_in))
            w_hh = xavier_uniform(next(ki), (3 * hidden_dim, hidden_dim))
            b_ih = jnp.zeros((3 * hidden_dim,), jnp.float32)
            b_hh = jnp.zeros((3 * hidden_dim,), jnp.float32)
            dirs.append((w_ih, w_hh, b_ih, b_hh))
        gru.append(pack_bigru_params(*dirs[0], *dirs[1]))

    w_att = xavier_uniform(next(ki), (1, 2 * hidden_dim))
    b_att = jnp.zeros((1,), jnp.float32)
    w_cls = xavier_uniform(next(ki), (num_classes, 2 * hidden_dim))
    b_cls = jnp.zeros((num_classes,), jnp.float32)

    return dict(emb=emb, gru=gru, w_att=w_att, b_att=b_att, w_cls=w_cls, b_cls=b_cls)


# ----------------------------------------------------------------------------
# Forward pass (eval mode): embedding -> 2-layer bi-GRU -> attention -> classifier.
# ----------------------------------------------------------------------------
def nlp_classifier_forward(params, input_ids, attention_mask):
    # Embedding gather directly into time-major [T, B, E] (gather stays in plain JAX).
    x = params["emb"][input_ids.T]                                  # [T, B, E]

    # Stacked bidirectional GRU, activations stay time-major end to end.
    # (Inter-layer dropout is identity at eval.)
    for lp in params["gru"]:
        x = bigru_layer_pallas(x, lp["wih6"], lp["bih6"], lp["whh_blk"], lp["bhh6"])

    # Single layout hop to batch-major for the softmax-over-time pooling.
    rnn_bm = jnp.transpose(x, (1, 0, 2))                            # [B, T, 2H]
    mask_f = attention_mask.astype(jnp.float32)
    logits, attn = attn_classifier_pallas(
        rnn_bm, mask_f, params["w_att"], params["b_att"], params["w_cls"], params["b_cls"]
    )
    return logits, attn


if __name__ == "__main__":
    VOCAB, EMBED, HIDDEN, CLASSES, LAYERS = 50, 32, 32, 4, 2
    B, T = 2, 8

    key = jax.random.PRNGKey(0)
    k_param, k_ids = jax.random.split(key)

    params = init_params(k_param, VOCAB, EMBED, HIDDEN, CLASSES, LAYERS)

    # Deterministic inputs: token ids in [1, VOCAB), second sequence padded.
    input_ids = jax.random.randint(k_ids, (B, T), 1, VOCAB, dtype=jnp.int32)
    lengths = jnp.array([T, 5], dtype=jnp.int32)
    pos = jnp.arange(T, dtype=jnp.int32)[None, :]
    attention_mask = (pos < lengths[:, None]).astype(jnp.int32)   # [B, T]
    input_ids = input_ids * attention_mask                        # pad positions -> id 0

    fwd = jax.jit(nlp_classifier_forward)
    logits, attn = fwd(params, input_ids, attention_mask)
    jax.block_until_ready(logits)
    jax.block_until_ready(attn)

    assert logits.shape == (B, CLASSES)
    assert attn.shape == (B, T)
    assert bool(jnp.all(jnp.isfinite(logits)))
    # masked positions must get zero attention weight
    assert bool(jnp.all(jnp.where(attention_mask == 0, attn, 0.0) < 1e-6))

    print("KERNEL_OK")
</pallas_src>

<mosaic_0001>
module attributes {stable_mosaic.version = 11 : i64} {
  func.func @bigru_layer_kernel(%arg0: memref<16x64xf32, #tpu.memory_space<vmem>>, %arg1: memref<64x192xf32, #tpu.memory_space<vmem>>, %arg2: memref<1x192xf32, #tpu.memory_space<vmem>>, %arg3: memref<64x192xf32, #tpu.memory_space<vmem>>, %arg4: memref<1x192xf32, #tpu.memory_space<vmem>>, %arg5: memref<8x2x64xf32, #tpu.memory_space<vmem>>, %arg6: memref<16x192xf32, #tpu.memory_space<vmem>>, %arg7: memref<2x64xf32, #tpu.memory_space<vmem>>) attributes {dimension_semantics = [], scalar_prefetch = 0 : i64, scratch_operands = 2 : i64, tpu.core_type = #tpu.core_type<tc>} {
    %c0 = arith.constant 0 : index
    %c0_0 = arith.constant 0 : index
    %0 = vector.load %arg0[%c0, %c0_0] : memref<16x64xf32, #tpu.memory_space<vmem>>, vector<16x64xf32>
    %c0_1 = arith.constant 0 : index
    %c0_2 = arith.constant 0 : index
    %1 = vector.load %arg1[%c0_1, %c0_2] : memref<64x192xf32, #tpu.memory_space<vmem>>, vector<64x192xf32>
    %cst = arith.constant dense<0.000000e+00> : vector<16x192xf32>
    %2 = tpu.matmul %0, %1, %cst {dimension_numbers = #tpu.dot_dimension_numbers<[1], [0], [0], [1], [0, 0, 1, 1], [], []>} : vector<16x64xf32>, vector<64x192xf32>, vector<16x192xf32> -> vector<16x192xf32>
    %c0_3 = arith.constant 0 : index
    %c0_4 = arith.constant 0 : index
    %3 = vector.load %arg2[%c0_3, %c0_4] : memref<1x192xf32, #tpu.memory_space<vmem>>, vector<1x192xf32>
    %4 = vector.broadcast %3 : vector<1x192xf32> to vector<16x192xf32>
    %5 = arith.addf %2, %4 : vector<16x192xf32>
    %c0_5 = arith.constant 0 : index
    %c0_6 = arith.constant 0 : index
    %6 = vector.load %arg6[%c0_5, %c0_6] : memref<16x192xf32, #tpu.memory_space<vmem>>, vector<16x192xf32>
    tpu.vector_store %arg6[%c0_5, %c0_6], %5 {strides = array<i32>} : memref<16x192xf32, #tpu.memory_space<vmem>>, vector<16x192xf32>,
    %cst_7 = arith.constant 0.000000e+00 : f32
    %7 = vector.broadcast %cst_7 : f32 to vector<2x64xf32>
    %c0_8 = arith.constant 0 : index
    %c0_9 = arith.constant 0 : index
    %8 = vector.load %arg7[%c0_8, %c0_9] : memref<2x64xf32, #tpu.memory_space<vmem>>, vector<2x64xf32>
    tpu.vector_store %arg7[%c0_8, %c0_9], %7 {strides = array<i32>} : memref<2x64xf32, #tpu.memory_space<vmem>>, vector<2x64xf32>,
    %c0_10 = arith.constant 0 : index
    %c0_11 = arith.constant 0 : index
    %9 = vector.load %arg3[%c0_10, %c0_11] : memref<64x192xf32, #tpu.memory_space<vmem>>, vector<64x192xf32>
    %c0_12 = arith.constant 0 : index
    %c0_13 = arith.constant 0 : index
    %10 = vector.load %arg4[%c0_12, %c0_13] : memref<1x192xf32, #tpu.memory_space<vmem>>, vector<1x192xf32>
    %11 = vector.shape_cast %10 : vector<1x192xf32> to vector<1x192xf32>
    %12 = vector.broadcast %11 : vector<1x192xf32> to vector<2x192xf32>
    %c0_i32 = arith.constant 0 : i32
    %c7_i32 = arith.constant 7 : i32
    %13 = arith.subi %c7_i32, %c0_i32 : i32
    %c0_14 = arith.constant 0 : index
    %c0_15 = arith.constant 0 : index
    %14 = vector.load %arg7[%c0_14, %c0_15] : memref<2x64xf32, #tpu.memory_space<vmem>>, vector<2x64xf32>
    %cst_16 = arith.constant dense<0.000000e+00> : vector<2x192xf32>
    %15 = tpu.matmul %14, %9, %cst_16 {dimension_numbers = #tpu.dot_dimension_numbers<[1], [0], [0], [1], [0, 0, 1, 1], [], []>} : vector<2x64xf32>, vector<64x192xf32>, vector<2x192xf32> -> vector<2x192xf32>
    %16 = arith.addf %15, %12 : vector<2x192xf32>
    %c2_i32 = arith.constant 2 : i32
    %17 = arith.muli %c0_i32, %c2_i32 : i32
    %18 = arith.index_cast %17 : i32 to index
    %c0_17 = arith.constant 0 : index
    %19 = vector.load %arg6[%18, %c0_17] : memref<16x192xf32, #tpu.memory_space<vmem>>, vector<2x96xf32>
    %c2_i32_18 = arith.constant 2 : i32
    %20 = arith.muli %13, %c2_i32_18 : i32
    %21 = arith.index_cast %20 : i32 to index
    %c96 = arith.constant 96 : index
    %22 = vector.load %arg6[%21, %c96] : memref<16x192xf32, #tpu.memory_space<vmem>>, vector<2x96xf32>
    %23 = vector.extract_strided_slice %16 {offsets = [0, 0], sizes = [2, 96], strides = [1, 1]} : vector<2x192xf32> to vector<2x96xf32>
    %24 = vector.extract_strided_slice %14 {offsets = [0, 0], sizes = [2, 32], strides = [1, 1]} : vector<2x64xf32> to vector<2x32xf32>
    %25 = vector.extract_strided_slice %19 {offsets = [0, 0], sizes = [2, 32], strides = [1, 1]} : vector<2x96xf32> to vector<2x32xf32>
    %26 = vector.extract_strided_slice %23 {offsets = [0, 0], sizes = [2, 32], strides = [1, 1]} : vector<2x96xf32> to vector<2x32xf32>
    %27 = arith.addf %25, %26 : vector<2x32xf32>
    %28 = arith.negf %27 : vector<2x32xf32>
    %29 = math.exp %28 : vector<2x32xf32>
    %cst_19 = arith.constant 1.000000e+00 : f32
    %30 = vector.broadcast %cst_19 : f32 to vector<2x32xf32>
    %31 = arith.addf %30, %29 : vector<2x32xf32>
    %32 = arith.divf %30, %31 : vector<2x32xf32>
    %33 = vector.extract_strided_slice %19 {offsets = [0, 32], sizes = [2, 32], strides = [1, 1]} : vector<2x96xf32> to vector<2x32xf32>
    %34 = vector.extract_strided_slice %23 {offsets = [0, 32], sizes = [2, 32], strides = [1, 1]} : vector<2x96xf32> to vector<2x32xf32>
    %35 = arith.addf %33, %34 : vector<2x32xf32>
    %36 = arith.negf %35 : vector<2x32xf32>
    %37 = math.exp %36 : vector<2x32xf32>
    %cst_20 = arith.constant 1.000000e+00 : f32
    %38 = vector.broadcast %cst_20 : f32 to vector<2x32xf32>
    %39 = arith.addf %38, %37 : vector<2x32xf32>
    %40 = arith.divf %38, %39 : vector<2x32xf32>
    %41 = vector.extract_strided_slice %19 {offsets = [0, 64], sizes = [2, 32], strides = [1, 1]} : vector<2x96xf32> to vector<2x32xf32>
    %42 = vector.extract_strided_slice %23 {offsets = [0, 64], sizes = [2, 32], strides = [1, 1]} : vector<2x96xf32> to vector<2x32xf32>
    %43 = arith.mulf %32, %42 : vector<2x32xf32>
    %44 = arith.addf %41, %43 : vector<2x32xf32>
    %45 = math.tanh %44 : vector<2x32xf32>
    %cst_21 = arith.constant 1.000000e+00 : f32
    %46 = vector.broadcast %cst_21 : f32 to vector<2x32xf32>
    %47 = arith.subf %46, %40 : vector<2x32xf32>
    %48 = arith.mulf %47, %45 : vector<2x32xf32>
    %49 = arith.mulf %40, %24 : vector<2x32xf32>
    %50 = arith.addf %48, %49 : vector<2x32xf32>
    %51 = vector.extract_strided_slice %16 {offsets = [0, 96], sizes = [2, 96], strides = [1, 1]} : vector<2x192xf32> to vector<2x96xf32>
    %52 = vector.extract_strided_slice %14 {offsets = [0, 32], sizes = [2, 32], strides = [1, 1]} : vector<2x64xf32> to vector<2x32xf32>
    %53 = vector.extract_strided_slice %22 {offsets = [0, 0], sizes = [2, 32], strides = [1, 1]} : vector<2x96xf32> to vector<2x32xf32>
    %54 = vector.extract_strided_slice %51 {offsets = [0, 0], sizes = [2, 32], strides = [1, 1]} : vector<2x96xf32> to vector<2x32xf32>
    %55 = arith.addf %53, %54 : vector<2x32xf32>
    %56 = arith.negf %55 : vector<2x32xf32>
    %57 = math.exp %56 : vector<2x32xf32>
    %cst_22 = arith.constant 1.000000e+00 : f32
    %58 = vector.broadcast %cst_22 : f32 to vector<2x32xf32>
    %59 = arith.addf %58, %57 : vector<2x32xf32>
    %60 = arith.divf %58, %59 : vector<2x32xf32>
    %61 = vector.extract_strided_slice %22 {offsets = [0, 32], sizes = [2, 32], strides = [1, 1]} : vector<2x96xf32> to vector<2x32xf32>
    %62 = vector.extract_strided_slice %51 {offsets = [0, 32], sizes = [2, 32], strides = [1, 1]} : vector<2x96xf32> to vector<2x32xf32>
    %63 = arith.addf %61, %62 : vector<2x32xf32>
    %64 = arith.negf %63 : vector<2x32xf32>
    %65 = math.exp %64 : vector<2x32xf32>
    %cst_23 = arith.constant 1.000000e+00 : f32
    %66 = vector.broadcast %cst_23 : f32 to vector<2x32xf32>
    %67 = arith.addf %66, %65 : vector<2x32xf32>
    %68 = arith.divf %66, %67 : vector<2x32xf32>
    %69 = vector.extract_strided_slice %22 {offsets = [0, 64], sizes = [2, 32], strides = [1, 1]} : vector<2x96xf32> to vector<2x32xf32>
    %70 = vector.extract_strided_slice %51 {offsets = [0, 64], sizes = [2, 32], strides = [1, 1]} : vector<2x96xf32> to vector<2x32xf32>
    %71 = arith.mulf %60, %70 : vector<2x32xf32>
    %72 = arith.addf %69, %71 : vector<2x32xf32>
    %73 = math.tanh %72 : vector<2x32xf32>
    %cst_24 = arith.constant 1.000000e+00 : f32
    %74 = vector.broadcast %cst_24 : f32 to vector<2x32xf32>
    %75 = arith.subf %74, %68 : vector<2x32xf32>
    %76 = arith.mulf %75, %73 : vector<2x32xf32>
    %77 = arith.mulf %68, %52 : vector<2x32xf32>
    %78 = arith.addf %76, %77 : vector<2x32xf32>
    %79 = tpu.concatenate %50, %78 in 1 : vector<2x32xf32>, vector<2x32xf32> -> vector<2x64xf32>
    %c0_25 = arith.constant 0 : index
    %c0_26 = arith.constant 0 : index
    %80 = vector.load %arg7[%c0_25, %c0_26] : memref<2x64xf32, #tpu.memory_space<vmem>>, vector<2x64xf32>
    tpu.vector_store %arg7[%c0_25, %c0_26], %79 {strides = array<i32>} : memref<2x64xf32, #tpu.memory_space<vmem>>, vector<2x64xf32>,
    %81 = arith.index_cast %c0_i32 : i32 to index
    %c0_27 = arith.constant 0 : index
    %c0_28 = arith.constant 0 : index
    %82 = vector.load %arg5[%81, %c0_27, %c0_28] : memref<8x2x64xf32, #tpu.memory_space<vmem>>, vector<1x2x32xf32>
    %83 = vector.shape_cast %82 : vector<1x2x32xf32> to vector<2x32xf32>
    %84 = vector.shape_cast %50 : vector<2x32xf32> to vector<1x2x32xf32>
    tpu.vector_store %arg5[%81, %c0_27, %c0_28], %84 {strides = array<i32>} : memref<8x2x64xf32, #tpu.memory_space<vmem>>, vector<1x2x32xf32>,
    %85 = arith.index_cast %13 : i32 to index
    %c0_29 = arith.constant 0 : index
    %c32 = arith.constant 32 : index
    %86 = vector.load %arg5[%85, %c0_29, %c32] : memref<8x2x64xf32, #tpu.memory_space<vmem>>, vector<1x2x32xf32>
    %87 = vector.shape_cast %86 : vector<1x2x32xf32> to vector<2x32xf32>
    %88 = vector.shape_cast %78 : vector<2x32xf32> to vector<1x2x32xf32>
    tpu.vector_store %arg5[%85, %c0_29, %c32], %88 {strides = array<i32>} : memref<8x2x64xf32, #tpu.memory_space<vmem>>, vector<1x2x32xf32>,
    %c1_i32 = arith.constant 1 : i32
    %c7_i32_30 = arith.constant 7 : i32
    %89 = arith.subi %c7_i32_30, %c1_i32 : i32
    %c0_31 = arith.constant 0 : index
    %c0_32 = arith.constant 0 : index
    %90 = vector.load %arg7[%c0_31, %c0_32] : memref<2x64xf32, #tpu.memory_space<vmem>>, vector<2x64xf32>
    %cst_33 = arith.constant dense<0.000000e+00> : vector<2x192xf32>
    %91 = tpu.matmul %90, %9, %cst_33 {dimension_numbers = #tpu.dot_dimension_numbers<[1], [0], [0], [1], [0, 0, 1, 1], [], []>} : vector<2x64xf32>, vector<64x192xf32>, vector<2x192xf32> -> vector<2x192xf32>
    %92 = arith.addf %91, %12 : vector<2x192xf32>
    %c2_i32_34 = arith.constant 2 : i32
    %93 = arith.muli %c1_i32, %c2_i32_34 : i32
    %94 = arith.index_cast %93 : i32 to index
    %c0_35 = arith.constant 0 : index
    %95 = vector.load %arg6[%94, %c0_35] : memref<16x192xf32, #tpu.memory_space<vmem>>, vector<2x96xf32>
    %c2_i32_36 = arith.constant 2 : i32
    %96 = arith.muli %89, %c2_i32_36 : i32
    %97 = arith.index_cast %96 : i32 to index
    %c96_37 = arith.constant 96 : index
    %98 = vector.load %arg6[%97, %c96_37] : memref<16x192xf32, #tpu.memory_space<vmem>>, vector<2x96xf32>
    %99 = vector.extract_strided_slice %92 {offsets = [0, 0], sizes = [2, 96], strides = [1, 1]} : vector<2x192xf32> to vector<2x96xf32>
    %100 = vector.extract_strided_slice %90 {offsets = [0, 0], sizes = [2, 32], strides = [1, 1]} : vector<2x64xf32> to vector<2x32xf32>
    %101 = vector.extract_strided_slice %95 {offsets = [0, 0], sizes = [2, 32], strides = [1, 1]} : vector<2x96xf32> to vector<2x32xf32>
    %102 = vector.extract_strided_slice %99 {offsets = [0, 0], sizes = [2, 32], strides = [1, 1]} : vector<2x96xf32> to vector<2x32xf32>
    %103 = arith.addf %101, %102 : vector<2x32xf32>
    %104 = arith.negf %103 : vector<2x32xf32>
    %105 = math.exp %104 : vector<2x32xf32>
    %cst_38 = arith.constant 1.000000e+00 : f32
    %106 = vector.broadcast %cst_38 : f32 to vector<2x32xf32>
    %107 = arith.addf %106, %105 : vector<2x32xf32>
    %108 = arith.divf %106, %107 : vector<2x32xf32>
    %109 = vector.extract_strided_slice %95 {offsets = [0, 32], sizes = [2, 32], strides = [1, 1]} : vector<2x96xf32> to vector<2x32xf32>
    %110 = vector.extract_strided_slice %99 {offsets = [0, 32], sizes = [2, 32], strides = [1, 1]} : vector<2x96xf32> to vector<2x32xf32>
    %111 = arith.addf %109, %110 : vector<2x32xf32>
    %112 = arith.negf %111 : vector<2x32xf32>
    %113 = math.exp %112 : vector<2x32xf32>
    %cst_39 = arith.constant 1.000000e+00 : f32
    %114 = vector.broadcast %cst_39 : f32 to vector<2x32xf32>
    %115 = arith.addf %114, %113 : vector<2x32xf32>
    %116 = arith.divf %114, %115 : vector<2x32xf32>
    %117 = vector.extract_strided_slice %95 {offsets = [0, 64], sizes = [2, 32], strides = [1, 1]} : vector<2x96xf32> to vector<2x32xf32>
    %118 = vector.extract_strided_slice %99 {offsets = [0, 64], sizes = [2, 32], strides = [1, 1]} : vector<2x96xf32> to vector<2x32xf32>
    %119 = arith.mulf %108, %118 : vector<2x32xf32>
    %120 = arith.addf %117, %119 : vector<2x32xf32>
    %121 = math.tanh %120 : vector<2x32xf32>
    %cst_40 = arith.constant 1.000000e+00 : f32
    %122 = vector.broadcast %cst_40 : f32 to vector<2x32xf32>
    %123 = arith.subf %122, %116 : vector<2x32xf32>
    %124 = arith.mulf %123, %121 : vector<2x32xf32>
    %125 = arith.mulf %116, %100 : vector<2x32xf32>
    %126 = arith.addf %124, %125 : vector<2x32xf32>
    %127 = vector.extract_strided_slice %92 {offsets = [0, 96], sizes = [2, 96], strides = [1, 1]} : vector<2x192xf32> to vector<2x96xf32>
    %128 = vector.extract_strided_slice %90 {offsets = [0, 32], sizes = [2, 32], strides = [1, 1]} : vector<2x64xf32> to vector<2x32xf32>
    %129 = vector.extract_strided_slice %98 {offsets = [0, 0], sizes = [2, 32], strides = [1, 1]} : vector<2x96xf32> to vector<2x32xf32>
    %130 = vector.extract_strided_slice %127 {offsets = [0, 0], sizes = [2, 32], strides = [1, 1]} : vector<2x96xf32> to vector<2x32xf32>
    %131 = arith.addf %129, %130 : vector<2x32xf32>
    %132 = arith.negf %131 : vector<2x32xf32>
    %133 = math.exp %132 : vector<2x32xf32>
    %cst_41 = arith.constant 1.000000e+00 : f32
    %134 = vector.broadcast %cst_41 : f32 to vector<2x32xf32>
    %135 = arith.addf %134, %133 : vector<2x32xf32>
    %136 = arith.divf %134, %135 : vector<2x32xf32>
    %137 = vector.extract_strided_slice %98 {offsets = [0, 32], sizes = [2, 32], strides = [1, 1]} : vector<2x96xf32> to vector<2x32xf32>
    %138 = vector.extract_strided_slice %127 {offsets = [0, 32], sizes = [2, 32], strides = [1, 1]} : vector<2x96xf32> to vector<2x32xf32>
    %139 = arith.addf %137, %138 : vector<2x32xf32>
    %140 = arith.negf %139 : vector<2x32xf32>
    %141 = math.exp %140 : vector<2x32xf32>
    %cst_42 = arith.constant 1.000000e+00 : f32
    %142 = vector.broadcast %cst_42 : f32 to vector<2x32xf32>
    %143 = arith.addf %142, %141 : vector<2x32xf32>
    %144 = arith.divf %142, %143 : vector<2x32xf32>
    %145 = vector.extract_strided_slice %98 {offsets = [0, 64], sizes = [2, 32], strides = [1, 1]} : vector<2x96xf32> to vector<2x32xf32>
    %146 = vector.extract_strided_slice %127 {offsets = [0, 64], sizes = [2, 32], strides = [1, 1]} : vector<2x96xf32> to vector<2x32xf32>
    %147 = arith.mulf %136, %146 : vector<2x32xf32>
    %148 = arith.addf %145, %147 : vector<2x32xf32>
    %149 = math.tanh %148 : vector<2x32xf32>
    %cst_43 = arith.constant 1.000000e+00 : f32
    %150 = vector.broadcast %cst_43 : f32 to vector<2x32xf32>
    %151 = arith.subf %150, %144 : vector<2x32xf32>
    %152 = arith.mulf %151, %149 : vector<2x32xf32>
    %153 = arith.mulf %144, %128 : vector<2x32xf32>
    %154 = arith.addf %152, %153 : vector<2x32xf32>
    %155 = tpu.concatenate %126, %154 in 1 : vector<2x32xf32>, vector<2x32xf32> -> vector<2x64xf32>
    %c0_44 = arith.constant 0 : index
    %c0_45 = arith.constant 0 : index
    %156 = vector.load %arg7[%c0_44, %c0_45] : memref<2x64xf32, #tpu.memory_space<vmem>>, vector<2x64xf32>
    tpu.vector_store %arg7[%c0_44, %c0_45], %155 {strides = array<i32>} : memref<2x64xf32, #tpu.memory_space<vmem>>, vector<2x64xf32>,
    %157 = arith.index_cast %c1_i32 : i32 to index
    %c0_46 = arith.constant 0 : index
    %c0_47 = arith.constant 0 : index
    %158 = vector.load %arg5[%157, %c0_46, %c0_47] : memref<8x2x64xf32, #tpu.memory_space<vmem>>, vector<1x2x32xf32>
    %159 = vector.shape_cast %158 : vector<1x2x32xf32> to vector<2x32xf32>
    %160 = vector.shape_cast %126 : vector<2x32xf32> to vector<1x2x32xf32>
    tpu.vector_store %arg5[%157, %c0_46, %c0_47], %160 {strides = array<i32>} : memref<8x2x64xf32, #tpu.memory_space<vmem>>, vector<1x2x32xf32>,
    %161 = arith.index_cast %89 : i32 to index
    %c0_48 = arith.constant 0 : index
    %c32_49 = arith.constant 32 : index
    %162 = vector.load %arg5[%161, %c0_48, %c32_49] : memref<8x2x64xf32, #tpu.memory_space<vmem>>, vector<1x2x32xf32>
    %163 = vector.shape_cast %162 : vector<1x2x32xf32> to vector<2x32xf32>
    %164 = vector.shape_cast %154 : vector<2x32xf32> to vector<1x2x32xf32>
    tpu.vector_store %arg5[%161, %c0_48, %c32_49], %164 {strides = array<i32>} : memref<8x2x64xf32, #tpu.memory_space<vmem>>, vector<1x2x32xf32>,
    %c2_i32_50 = arith.constant 2 : i32
    %c7_i32_51 = arith.constant 7 : i32
    %165 = arith.subi %c7_i32_51, %c2_i32_50 : i32
    %c0_52 = arith.constant 0 : index
    %c0_53 = arith.constant 0 : index
    %166 = vector.load %arg7[%c0_52, %c0_53] : memref<2x64xf32, #tpu.memory_space<vmem>>, vector<2x64xf32>
    %cst_54 = arith.constant dense<0.000000e+00> : vector<2x192xf32>
    %167 = tpu.matmul %166, %9, %cst_54 {dimension_numbers = #tpu.dot_dimension_numbers<[1], [0], [0], [1], [0, 0, 1, 1], [], []>} : vector<2x64xf32>, vector<64x192xf32>, vector<2x192xf32> -> vector<2x192xf32>
    %168 = arith.addf %167, %12 : vector<2x192xf32>
    %c2_i32_55 = arith.constant 2 : i32
    %169 = arith.muli %c2_i32_50, %c2_i32_55 : i32
    %170 = arith.index_cast %169 : i32 to index
    %c0_56 = arith.constant 0 : index
    %171 = vector.load %arg6[%170, %c0_56] : memref<16x192xf32, #tpu.memory_space<vmem>>, vector<2x96xf32>
    %c2_i32_57 = arith.constant 2 : i32
    %172 = arith.muli %165, %c2_i32_57 : i32
    %173 = arith.index_cast %172 : i32 to index
    %c96_58 = arith.constant 96 : index
    %174 = vector.load %arg6[%173, %c96_58] : memref<16x192xf32, #tpu.memory_space<vmem>>, vector<2x96xf32>
    %175 = vector.extract_strided_slice %168 {offsets = [0, 0], sizes = [2, 96], strides = [1, 1]} : vector<2x192xf32> to vector<2x96xf32>
    %176 = vector.extract_strided_slice %166 {offsets = [0, 0], sizes = [2, 32], strides = [1, 1]} : vector<2x64xf32> to vector<2x32xf32>
    %177 = vector.extract_strided_slice %171 {offsets = [0, 0], sizes = [2, 32], strides = [1, 1]} : vector<2x96xf32> to vector<2x32xf32>
    %178 = vector.extract_strided_slice %175 {offsets = [0, 0], sizes = [2, 32], strides = [1, 1]} : vector<2x96xf32> to vector<2x32xf32>
    %179 = arith.addf %177, %178 : vector<2x32xf32>
    %180 = arith.negf %179 : vector<2x32xf32>
    %181 = math.exp %180 : vector<2x32xf32>
    %cst_59 = arith.constant 1.000000e+00 : f32
    %182 = vector.broadcast %cst_59 : f32 to vector<2x32xf32>
    %183 = arith.addf %182, %181 : vector<2x32xf32>
    %184 = arith.divf %182, %183 : vector<2x32xf32>
    %185 = vector.extract_strided_slice %171 {offsets = [0, 32], sizes = [2, 32], strides = [1, 1]} : vector<2x96xf32> to vector<2x32xf32>
    %186 = vector.extract_strided_slice %175 {offsets = [0, 32], sizes = [2, 32], strides = [1, 1]} : vector<2x96xf32> to vector<2x32xf32>
    %187 = arith.addf %185, %186 : vector<2x32xf32>
    %188 = arith.negf %187 : vector<2x32xf32>
    %189 = math.exp %188 : vector<2x32xf32>
    %cst_60 = arith.constant 1.000000e+00 : f32
    %190 = vector.broadcast %cst_60 : f32 to vector<2x32xf32>
    %191 = arith.addf %190, %189 : vector<2x32xf32>
    %192 = arith.divf %190, %191 : vector<2x32xf32>
    %193 = vector.extract_strided_slice %171 {offsets = [0, 64], sizes = [2, 32], strides = [1, 1]} : vector<2x96xf32> to vector<2x32xf32>
    %194 = vector.extract_strided_slice %175 {offsets = [0, 64], sizes = [2, 32], strides = [1, 1]} : vector<2x96xf32> to vector<2x32xf32>
    %195 = arith.mulf %184, %194 : vector<2x32xf32>
    %196 = arith.addf %193, %195 : vector<2x32xf32>
    %197 = math.tanh %196 : vector<2x32xf32>
    %cst_61 = arith.constant 1.000000e+00 : f32
    %198 = vector.broadcast %cst_61 : f32 to vector<2x32xf32>
    %199 = arith.subf %198, %192 : vector<2x32xf32>
    %200 = arith.mulf %199, %197 : vector<2x32xf32>
    %201 = arith.mulf %192, %176 : vector<2x32xf32>
    %202 = arith.addf %200, %201 : vector<2x32xf32>
    %203 = vector.extract_strided_slice %168 {offsets = [0, 96], sizes = [2, 96], strides = [1, 1]} : vector<2x192xf32> to vector<2x96xf32>
    %204 = vector.extract_strided_slice %166 {offsets = [0, 32], sizes = [2, 32], strides = [1, 1]} : vector<2x64xf32> to vector<2x32xf32>
    %205 = vector.extract_strided_slice %174 {offsets = [0, 0], sizes = [2, 32], strides = [1, 1]} : vector<2x96xf32> to vector<2x32xf32>
    %206 = vector.extract_strided_slice %203 {offsets = [0, 0], sizes = [2, 32], strides = [1, 1]} : vector<2x96xf32> to vector<2x32xf32>
    %207 = arith.addf %205, %206 : vector<2x32xf32>
    %208 = arith.negf %207 : vector<2x32xf32>
    %209 = math.exp %208 : vector<2x32xf32>
    %cst_62 = arith.constant 1.000000e+00 : f32
    %210 = vector.broadcast %cst_62 : f32 to vector<2x32xf32>
    %211 = arith.addf %210, %209 : vector<2x32xf32>
    %212 = arith.divf %210, %211 : vector<2x32xf32>
    %213 = vector.extract_strided_slice %174 {offsets = [0, 32], sizes = [2, 32], strides = [1, 1]} : vector<2x96xf32> to vector<2x32xf32>
    %214 = vector.extract_strided_slice %203 {offsets = [0, 32], sizes = [2, 32], strides = [1, 1]} : vector<2x96xf32> to vector<2x32xf32>
    %215 = arith.addf %213, %214 : vector<2x32xf32>
    %216 = arith.negf %215 : vector<2x32xf32>
    %217 = math.exp %216 : vector<2x32xf32>
    %cst_63 = arith.constant 1.000000e+00 : f32
    %218 = vector.broadcast %cst_63 : f32 to vector<2x32xf32>
    %219 = arith.addf %218, %217 : vector<2x32xf32>
    %220 = arith.divf %218, %219 : vector<2x32xf32>
    %221 = vector.extract_strided_slice %174 {offsets = [0, 64], sizes = [2, 32], strides = [1, 1]} : vector<2x96xf32> to vector<2x32xf32>
    %222 = vector.extract_strided_slice %203 {offsets = [0, 64], sizes = [2, 32], strides = [1, 1]} : vector<2x96xf32> to vector<2x32xf32>
    %223 = arith.mulf %212, %222 : vector<2x32xf32>
    %224 = arith.addf %221, %223 : vector<2x32xf32>
    %225 = math.tanh %224 : vector<2x32xf32>
    %cst_64 = arith.constant 1.000000e+00 : f32
    %226 = vector.broadcast %cst_64 : f32 to vector<2x32xf32>
    %227 = arith.subf %226, %220 : vector<2x32xf32>
    %228 = arith.mulf %227, %225 : vector<2x32xf32>
    %229 = arith.mulf %220, %204 : vector<2x32xf32>
    %230 = arith.addf %228, %229 : vector<2x32xf32>
    %231 = tpu.concatenate %202, %230 in 1 : vector<2x32xf32>, vector<2x32xf32> -> vector<2x64xf32>
    %c0_65 = arith.constant 0 : index
    %c0_66 = arith.constant 0 : index
    %232 = vector.load %arg7[%c0_65, %c0_66] : memref<2x64xf32, #tpu.memory_space<vmem>>, vector<2x64xf32>
    tpu.vector_store %arg7[%c0_65, %c0_66], %231 {strides = array<i32>} : memref<2x64xf32, #tpu.memory_space<vmem>>, vector<2x64xf32>,
    %233 = arith.index_cast %c2_i32_50 : i32 to index
    %c0_67 = arith.constant 0 : index
    %c0_68 = arith.constant 0 : index
    %234 = vector.load %arg5[%233, %c0_67, %c0_68] : memref<8x2x64xf32, #tpu.memory_space<vmem>>, vector<1x2x32xf32>
    %235 = vector.shape_cast %234 : vector<1x2x32xf32> to vector<2x32xf32>
    %236 = vector.shape_cast %202 : vector<2x32xf32> to vector<1x2x32xf32>
    tpu.vector_store %arg5[%233, %c0_67, %c0_68], %236 {strides = array<i32>} : memref<8x2x64xf32, #tpu.memory_space<vmem>>, vector<1x2x32xf32>,
    %237 = arith.index_cast %165 : i32 to index
    %c0_69 = arith.constant 0 : index
    %c32_70 = arith.constant 32 : index
    %238 = vector.load %arg5[%237, %c0_69, %c32_70] : memref<8x2x64xf32, #tpu.memory_space<vmem>>, vector<1x2x32xf32>
    %239 = vector.shape_cast %238 : vector<1x2x32xf32> to vector<2x32xf32>
    %240 = vector.shape_cast %230 : vector<2x32xf32> to vector<1x2x32xf32>
    tpu.vector_store %arg5[%237, %c0_69, %c32_70], %240 {strides = array<i32>} : memref<8x2x64xf32, #tpu.memory_space<vmem>>, vector<1x2x32xf32>,
    %c3_i32 = arith.constant 3 : i32
    %c7_i32_71 = arith.constant 7 : i32
    %241 = arith.subi %c7_i32_71, %c3_i32 : i32
    %c0_72 = arith.constant 0 : index
    %c0_73 = arith.constant 0 : index
    %242 = vector.load %arg7[%c0_72, %c0_73] : memref<2x64xf32, #tpu.memory_space<vmem>>, vector<2x64xf32>
    %cst_74 = arith.constant dense<0.000000e+00> : vector<2x192xf32>
    %243 = tpu.matmul %242, %9, %cst_74 {dimension_numbers = #tpu.dot_dimension_numbers<[1], [0], [0], [1], [0, 0, 1, 1], [], []>} : vector<2x64xf32>, vector<64x192xf32>, vector<2x192xf32> -> vector<2x192xf32>
    %244 = arith.addf %243, %12 : vector<2x192xf32>
    %c2_i32_75 = arith.constant 2 : i32
    %245 = arith.muli %c3_i32, %c2_i32_75 : i32
    %246 = arith.index_cast %245 : i32 to index
    %c0_76 = arith.constant 0 : index
    %247 = vector.load %arg6[%246, %c0_76] : memref<16x192xf32, #tpu.memory_space<vmem>>, vector<2x96xf32>
    %c2_i32_77 = arith.constant 2 : i32
    %248 = arith.muli %241, %c2_i32_77 : i32
    %249 = arith.index_cast %248 : i32 to index
    %c96_78 = arith.constant 96 : index
    %250 = vector.load %arg6[%249, %c96_78] : memref<16x192xf32, #tpu.memory_space<vmem>>, vector<2x96xf32>
    %251 = vector.extract_strided_slice %244 {offsets = [0, 0], sizes = [2, 96], strides = [1, 1]} : vector<2x192xf32> to vector<2x96xf32>
    %252 = vector.extract_strided_slice %242 {offsets = [0, 0], sizes = [2, 32], strides = [1, 1]} : vector<2x64xf32> to vector<2x32xf32>
    %253 = vector.extract_strided_slice %247 {offsets = [0, 0], sizes = [2, 32], strides = [1, 1]} : vector<2x96xf32> to vector<2x32xf32>
    %254 = vector.extract_strided_slice %251 {offsets = [0, 0], sizes = [2, 32], strides = [1, 1]} : vector<2x96xf32> to vector<2x32xf32>
    %255 = arith.addf %253, %254 : vector<2x32xf32>
    %256 = arith.negf %255 : vector<2x32xf32>
    %257 = math.exp %256 : vector<2x32xf32>
    %cst_79 = arith.constant 1.000000e+00 : f32
    %258 = vector.broadcast %cst_79 : f32 to vector<2x32xf32>
    %259 = arith.addf %258, %257 : vector<2x32xf32>
    %260 = arith.divf %258, %259 : vector<2x32xf32>
    %261 = vector.extract_strided_slice %247 {offsets = [0, 32], sizes = [2, 32], strides = [1, 1]} : vector<2x96xf32> to vector<2x32xf32>
    %262 = vector.extract_strided_slice %251 {offsets = [0, 32], sizes = [2, 32], strides = [1, 1]} : vector<2x96xf32> to vector<2x32xf32>
    %263 = arith.addf %261, %262 : vector<2x32xf32>
    %264 = arith.negf %263 : vector<2x32xf32>
    %265 = math.exp %264 : vector<2x32xf32>
    %cst_80 = arith.constant 1.000000e+00 : f32
    %266 = vector.broadcast %cst_80 : f32 to vector<2x32xf32>
    %267 = arith.addf %266, %265 : vector<2x32xf32>
    %268 = arith.divf %266, %267 : vector<2x32xf32>
    %269 = vector.extract_strided_slice %247 {offsets = [0, 64], sizes = [2, 32], strides = [1, 1]} : vector<2x96xf32> to vector<2x32xf32>
    %270 = vector.extract_strided_slice %251 {offsets = [0, 64], sizes = [2, 32], strides = [1, 1]} : vector<2x96xf32> to vector<2x32xf32>
    %271 = arith.mulf %260, %270 : vector<2x32xf32>
    %272 = arith.addf %269, %271 : vector<2x32xf32>
    %273 = math.tanh %272 : vector<2x32xf32>
    %cst_81 = arith.constant 1.000000e+00 : f32
    %274 = vector.broadcast %cst_81 : f32 to vector<2x32xf32>
    %275 = arith.subf %274, %268 : vector<2x32xf32>
    %276 = arith.mulf %275, %273 : vector<2x32xf32>
    %277 = arith.mulf %268, %252 : vector<2x32xf32>
    %278 = arith.addf %276, %277 : vector<2x32xf32>
    %279 = vector.extract_strided_slice %244 {offsets = [0, 96], sizes = [2, 96], strides = [1, 1]} : vector<2x192xf32> to vector<2x96xf32>
    %280 = vector.extract_strided_slice %242 {offsets = [0, 32], sizes = [2, 32], strides = [1, 1]} : vector<2x64xf32> to vector<2x32xf32>
    %281 = vector.extract_strided_slice %250 {offsets = [0, 0], sizes = [2, 32], strides = [1, 1]} : vector<2x96xf32> to vector<2x32xf32>
    %282 = vector.extract_strided_slice %279 {offsets = [0, 0], sizes = [2, 32], strides = [1, 1]} : vector<2x96xf32> to vector<2x32xf32>
    %283 = arith.addf %281, %282 : vector<2x32xf32>
    %284 = arith.negf %283 : vector<2x32xf32>
    %285 = math.exp %284 : vector<2x32xf32>
    %cst_82 = arith.constant 1.000000e+00 : f32
    %286 = vector.broadcast %cst_82 : f32 to vector<2x32xf32>
    %287 = arith.addf %286, %285 : vector<2x32xf32>
    %288 = arith.divf %286, %287 : vector<2x32xf32>
    %289 = vector.extract_strided_slice %250 {offsets = [0, 32], sizes = [2, 32], strides = [1, 1]} : vector<2x96xf32> to vector<2x32xf32>
    %290 = vector.extract_strided_slice %279 {offsets = [0, 32], sizes = [2, 32], strides = [1, 1]} : vector<2x96xf32> to vector<2x32xf32>
    %291 = arith.addf %289, %290 : vector<2x32xf32>
    %292 = arith.negf %291 : vector<2x32xf32>
    %293 = math.exp %292 : vector<2x32xf32>
    %cst_83 = arith.constant 1.000000e+00 : f32
    %294 = vector.broadcast %cst_83 : f32 to vector<2x32xf32>
    %295 = arith.addf %294, %293 : vector<2x32xf32>
    %296 = arith.divf %294, %295 : vector<2x32xf32>
    %297 = vector.extract_strided_slice %250 {offsets = [0, 64], sizes = [2, 32], strides = [1, 1]} : vector<2x96xf32> to vector<2x32xf32>
    %298 = vector.extract_strided_slice %279 {offsets = [0, 64], sizes = [2, 32], strides = [1, 1]} : vector<2x96xf32> to vector<2x32xf32>
    %299 = arith.mulf %288, %298 : vector<2x32xf32>
    %300 = arith.addf %297, %299 : vector<2x32xf32>
    %301 = math.tanh %300 : vector<2x32xf32>
    %cst_84 = arith.constant 1.000000e+00 : f32
    %302 = vector.broadcast %cst_84 : f32 to vector<2x32xf32>
    %303 = arith.subf %302, %296 : vector<2x32xf32>
    %304 = arith.mulf %303, %301 : vector<2x32xf32>
    %305 = arith.mulf %296, %280 : vector<2x32xf32>
    %306 = arith.addf %304, %305 : vector<2x32xf32>
    %307 = tpu.concatenate %278, %306 in 1 : vector<2x32xf32>, vector<2x32xf32> -> vector<2x64xf32>
    %c0_85 = arith.constant 0 : index
    %c0_86 = arith.constant 0 : index
    %308 = vector.load %arg7[%c0_85, %c0_86] : memref<2x64xf32, #tpu.memory_space<vmem>>, vector<2x64xf32>
    tpu.vector_store %arg7[%c0_85, %c0_86], %307 {strides = array<i32>} : memref<2x64xf32, #tpu.memory_space<vmem>>, vector<2x64xf32>,
    %309 = arith.index_cast %c3_i32 : i32 to index
    %c0_87 = arith.constant 0 : index
    %c0_88 = arith.constant 0 : index
    %310 = vector.load %arg5[%309, %c0_87, %c0_88] : memref<8x2x64xf32, #tpu.memory_space<vmem>>, vector<1x2x32xf32>
    %311 = vector.shape_cast %310 : vector<1x2x32xf32> to vector<2x32xf32>
    %312 = vector.shape_cast %278 : vector<2x32xf32> to vector<1x2x32xf32>
    tpu.vector_store %arg5[%309, %c0_87, %c0_88], %312 {strides = array<i32>} : memref<8x2x64xf32, #tpu.memory_space<vmem>>, vector<1x2x32xf32>,
    %313 = arith.index_cast %241 : i32 to index
    %c0_89 = arith.constant 0 : index
    %c32_90 = arith.constant 32 : index
    %314 = vector.load %arg5[%313, %c0_89, %c32_90] : memref<8x2x64xf32, #tpu.memory_space<vmem>>, vector<1x2x32xf32>
    %315 = vector.shape_cast %314 : vector<1x2x32xf32> to vector<2x32xf32>
    %316 = vector.shape_cast %306 : vector<2x32xf32> to vector<1x2x32xf32>
    tpu.vector_store %arg5[%313, %c0_89, %c32_90], %316 {strides = array<i32>} : memref<8x2x64xf32, #tpu.memory_space<vmem>>, vector<1x2x32xf32>,
    %c4_i32 = arith.constant 4 : i32
    %c7_i32_91 = arith.constant 7 : i32
    %317 = arith.subi %c7_i32_91, %c4_i32 : i32
    %c0_92 = arith.constant 0 : index
    %c0_93 = arith.constant 0 : index
    %318 = vector.load %arg7[%c0_92, %c0_93] : memref<2x64xf32, #tpu.memory_space<vmem>>, vector<2x64xf32>
    %cst_94 = arith.constant dense<0.000000e+00> : vector<2x192xf32>
    %319 = tpu.matmul %318, %9, %cst_94 {dimension_numbers = #tpu.dot_dimension_numbers<[1], [0], [0], [1], [0, 0, 1, 1], [], []>} : vector<2x64xf32>, vector<64x192xf32>, vector<2x192xf32> -> vector<2x192xf32>
    %320 = arith.addf %319, %12 : vector<2x192xf32>
    %c2_i32_95 = arith.constant 2 : i32
    %321 = arith.muli %c4_i32, %c2_i32_95 : i32
    %322 = arith.index_cast %321 : i32 to index
    %c0_96 = arith.constant 0 : index
    %323 = vector.load %arg6[%322, %c0_96] : memref<16x192xf32, #tpu.memory_space<vmem>>, vector<2x96xf32>
    %c2_i32_97 = arith.constant 2 : i32
    %324 = arith.muli %317, %c2_i32_97 : i32
    %325 = arith.index_cast %324 : i32 to index
    %c96_98 = arith.constant 96 : index
    %326 = vector.load %arg6[%325, %c96_98] : memref<16x192xf32, #tpu.memory_space<vmem>>, vector<2x96xf32>
    %327 = vector.extract_strided_slice %320 {offsets = [0, 0], sizes = [2, 96], strides = [1, 1]} : vector<2x192xf32> to vector<2x96xf32>
    %328 = vector.extract_strided_slice %318 {offsets = [0, 0], sizes = [2, 32], strides = [1, 1]} : vector<2x64xf32> to vector<2x32xf32>
    %329 = vector.extract_strided_slice %323 {offsets = [0, 0], sizes = [2, 32], strides = [1, 1]} : vector<2x96xf32> to vector<2x32xf32>
    %330 = vector.extract_strided_slice %327 {offsets = [0, 0], sizes = [2, 32], strides = [1, 1]} : vector<2x96xf32> to vector<2x32xf32>
    %331 = arith.addf %329, %330 : vector<2x32xf32>
    %332 = arith.negf %331 : vector<2x32xf32>
    %333 = math.exp %332 : vector<2x32xf32>
    %cst_99 = arith.constant 1.000000e+00 : f32
    %334 = vector.broadcast %cst_99 : f32 to vector<2x32xf32>
    %335 = arith.addf %334, %333 : vector<2x32xf32>
    %336 = arith.divf %334, %335 : vector<2x32xf32>
    %337 = vector.extract_strided_slice %323 {offsets = [0, 32], sizes = [2, 32], strides = [1, 1]} : vector<2x96xf32> to vector<2x32xf32>
    %338 = vector.extract_strided_slice %327 {offsets = [0, 32], sizes = [2, 32], strides = [1, 1]} : vector<2x96xf32> to vector<2x32xf32>
    %339 = arith.addf %337, %338 : vector<2x32xf32>
    %340 = arith.negf %339 : vector<2x32xf32>
    %341 = math.exp %340 : vector<2x32xf32>
    %cst_100 = arith.constant 1.000000e+00 : f32
    %342 = vector.broadcast %cst_100 : f32 to vector<2x32xf32>
    %343 = arith.addf %342, %341 : vector<2x32xf32>
    %344 = arith.divf %342, %343 : vector<2x32xf32>
    %345 = vector.extract_strided_slice %323 {offsets = [0, 64], sizes = [2, 32], strides = [1, 1]} : vector<2x96xf32> to vector<2x32xf32>
    %346 = vector.extract_strided_slice %327 {offsets = [0, 64], sizes = [2, 32], strides = [1, 1]} : vector<2x96xf32> to vector<2x32xf32>
    %347 = arith.mulf %336, %346 : vector<2x32xf32>
    %348 = arith.addf %345, %347 : vector<2x32xf32>
    %349 = math.tanh %348 : vector<2x32xf32>
    %cst_101 = arith.constant 1.000000e+00 : f32
    %350 = vector.broadcast %cst_101 : f32 to vector<2x32xf32>
    %351 = arith.subf %350, %344 : vector<2x32xf32>
    %352 = arith.mulf %351, %349 : vector<2x32xf32>
    %353 = arith.mulf %344, %328 : vector<2x32xf32>
    %354 = arith.addf %352, %353 : vector<2x32xf32>
    %355 = vector.extract_strided_slice %320 {offsets = [0, 96], sizes = [2, 96], strides = [1, 1]} : vector<2x192xf32> to vector<2x96xf32>
    %356 = vector.extract_strided_slice %318 {offsets = [0, 32], sizes = [2, 32], strides = [1, 1]} : vector<2x64xf32> to vector<2x32xf32>
    %357 = vector.extract_strided_slice %326 {offsets = [0, 0], sizes = [2, 32], strides = [1, 1]} : vector<2x96xf32> to vector<2x32xf32>
    %358 = vector.extract_strided_slice %355 {offsets = [0, 0], sizes = [2, 32], strides = [1, 1]} : vector<2x96xf32> to vector<2x32xf32>
    %359 = arith.addf %357, %358 : vector<2x32xf32>
    %360 = arith.negf %359 : vector<2x32xf32>
    %361 = math.exp %360 : vector<2x32xf32>
    %cst_102 = arith.constant 1.000000e+00 : f32
    %362 = vector.broadcast %cst_102 : f32 to vector<2x32xf32>
    %363 = arith.addf %362, %361 : vector<2x32xf32>
    %364 = arith.divf %362, %363 : vector<2x32xf32>
    %365 = vector.extract_strided_slice %326 {offsets = [0, 32], sizes = [2, 32], strides = [1, 1]} : vector<2x96xf32> to vector<2x32xf32>
    %366 = vector.extract_strided_slice %355 {offsets = [0, 32], sizes = [2, 32], strides = [1, 1]} : vector<2x96xf32> to vector<2x32xf32>
    %367 = arith.addf %365, %366 : vector<2x32xf32>
    %368 = arith.negf %367 : vector<2x32xf32>
    %369 = math.exp %368 : vector<2x32xf32>
    %cst_103 = arith.constant 1.000000e+00 : f32
    %370 = vector.broadcast %cst_103 : f32 to vector<2x32xf32>
    %371 = arith.addf %370, %369 : vector<2x32xf32>
    %372 = arith.divf %370, %371 : vector<2x32xf32>
    %373 = vector.extract_strided_slice %326 {offsets = [0, 64], sizes = [2, 32], strides = [1, 1]} : vector<2x96xf32> to vector<2x32xf32>
    %374 = vector.extract_strided_slice %355 {offsets = [0, 64], sizes = [2, 32], strides = [1, 1]} : vector<2x96xf32> to vector<2x32xf32>
    %375 = arith.mulf %364, %374 : vector<2x32xf32>
    %376 = arith.addf %373, %375 : vector<2x32xf32>
    %377 = math.tanh %376 : vector<2x32xf32>
    %cst_104 = arith.constant 1.000000e+00 : f32
    %378 = vector.broadcast %cst_104 : f32 to vector<2x32xf32>
    %379 = arith.subf %378, %372 : vector<2x32xf32>
    %380 = arith.mulf %379, %377 : vector<2x32xf32>
    %381 = arith.mulf %372, %356 : vector<2x32xf32>
    %382 = arith.addf %380, %381 : vector<2x32xf32>
    %383 = tpu.concatenate %354, %382 in 1 : vector<2x32xf32>, vector<2x32xf32> -> vector<2x64xf32>
    %c0_105 = arith.constant 0 : index
    %c0_106 = arith.constant 0 : index
    %384 = vector.load %arg7[%c0_105, %c0_106] : memref<2x64xf32, #tpu.memory_space<vmem>>, vector<2x64xf32>
    tpu.vector_store %arg7[%c0_105, %c0_106], %383 {strides = array<i32>} : memref<2x64xf32, #tpu.memory_space<vmem>>, vector<2x64xf32>,
    %385 = arith.index_cast %c4_i32 : i32 to index
    %c0_107 = arith.constant 0 : index
    %c0_108 = arith.constant 0 : index
    %386 = vector.load %arg5[%385, %c0_107, %c0_108] : memref<8x2x64xf32, #tpu.memory_space<vmem>>, vector<1x2x32xf32>
    %387 = vector.shape_cast %386 : vector<1x2x32xf32> to vector<2x32xf32>
    %388 = vector.shape_cast %354 : vector<2x32xf32> to vector<1x2x32xf32>
    tpu.vector_store %arg5[%385, %c0_107, %c0_108], %388 {strides = array<i32>} : memref<8x2x64xf32, #tpu.memory_space<vmem>>, vector<1x2x32xf32>,
    %389 = arith.index_cast %317 : i32 to index
    %c0_109 = arith.constant 0 : index
    %c32_110 = arith.constant 32 : index
    %390 = vector.load %arg5[%389, %c0_109, %c32_110] : memref<8x2x64xf32, #tpu.memory_space<vmem>>, vector<1x2x32xf32>
    %391 = vector.shape_cast %390 : vector<1x2x32xf32> to vector<2x32xf32>
    %392 = vector.shape_cast %382 : vector<2x32xf32> to vector<1x2x32xf32>
    tpu.vector_store %arg5[%389, %c0_109, %c32_110], %392 {strides = array<i32>} : memref<8x2x64xf32, #tpu.memory_space<vmem>>, vector<1x2x32xf32>,
    %c5_i32 = arith.constant 5 : i32
    %c7_i32_111 = arith.constant 7 : i32
    %393 = arith.subi %c7_i32_111, %c5_i32 : i32
    %c0_112 = arith.constant 0 : index
    %c0_113 = arith.constant 0 : index
    %394 = vector.load %arg7[%c0_112, %c0_113] : memref<2x64xf32, #tpu.memory_space<vmem>>, vector<2x64xf32>
    %cst_114 = arith.constant dense<0.000000e+00> : vector<2x192xf32>
    %395 = tpu.matmul %394, %9, %cst_114 {dimension_numbers = #tpu.dot_dimension_numbers<[1], [0], [0], [1], [0, 0, 1, 1], [], []>} : vector<2x64xf32>, vector<64x192xf32>, vector<2x192xf32> -> vector<2x192xf32>
    %396 = arith.addf %395, %12 : vector<2x192xf32>
    %c2_i32_115 = arith.constant 2 : i32
    %397 = arith.muli %c5_i32, %c2_i32_115 : i32
    %398 = arith.index_cast %397 : i32 to index
    %c0_116 = arith.constant 0 : index
    %399 = vector.load %arg6[%398, %c0_116] : memref<16x192xf32, #tpu.memory_space<vmem>>, vector<2x96xf32>
    %c2_i32_117 = arith.constant 2 : i32
    %400 = arith.muli %393, %c2_i32_117 : i32
    %401 = arith.index_cast %400 : i32 to index
    %c96_118 = arith.constant 96 : index
    %402 = vector.load %arg6[%401, %c96_118] : memref<16x192xf32, #tpu.memory_space<vmem>>, vector<2x96xf32>
    %403 = vector.extract_strided_slice %396 {offsets = [0, 0], sizes = [2, 96], strides = [1, 1]} : vector<2x192xf32> to vector<2x96xf32>
    %404 = vector.extract_strided_slice %394 {offsets = [0, 0], sizes = [2, 32], strides = [1, 1]} : vector<2x64xf32> to vector<2x32xf32>
    %405 = vector.extract_strided_slice %399 {offsets = [0, 0], sizes = [2, 32], strides = [1, 1]} : vector<2x96xf32> to vector<2x32xf32>
    %406 = vector.extract_strided_slice %403 {offsets = [0, 0], sizes = [2, 32], strides = [1, 1]} : vector<2x96xf32> to vector<2x32xf32>
    %407 = arith.addf %405, %406 : vector<2x32xf32>
    %408 = arith.negf %407 : vector<2x32xf32>
    %409 = math.exp %408 : vector<2x32xf32>
    %cst_119 = arith.constant 1.000000e+00 : f32
    %410 = vector.broadcast %cst_119 : f32 to vector<2x32xf32>
    %411 = arith.addf %410, %409 : vector<2x32xf32>
    %412 = arith.divf %410, %411 : vector<2x32xf32>
    %413 = vector.extract_strided_slice %399 {offsets = [0, 32], sizes = [2, 32], strides = [1, 1]} : vector<2x96xf32> to vector<2x32xf32>
    %414 = vector.extract_strided_slice %403 {offsets = [0, 32], sizes = [2, 32], strides = [1, 1]} : vector<2x96xf32> to vector<2x32xf32>
    %415 = arith.addf %413, %414 : vector<2x32xf32>
    %416 = arith.negf %415 : vector<2x32xf32>
    %417 = math.exp %416 : vector<2x32xf32>
    %cst_120 = arith.constant 1.000000e+00 : f32
    %418 = vector.broadcast %cst_120 : f32 to vector<2x32xf32>
    %419 = arith.addf %418, %417 : vector<2x32xf32>
    %420 = arith.divf %418, %419 : vector<2x32xf32>
    %421 = vector.extract_strided_slice %399 {offsets = [0, 64], sizes = [2, 32], strides = [1, 1]} : vector<2x96xf32> to vector<2x32xf32>
    %422 = vector.extract_strided_slice %403 {offsets = [0, 64], sizes = [2, 32], strides = [1, 1]} : vector<2x96xf32> to vector<2x32xf32>
    %423 = arith.mulf %412, %422 : vector<2x32xf32>
    %424 = arith.addf %421, %423 : vector<2x32xf32>
    %425 = math.tanh %424 : vector<2x32xf32>
    %cst_121 = arith.constant 1.000000e+00 : f32
    %426 = vector.broadcast %cst_121 : f32 to vector<2x32xf32>
    %427 = arith.subf %426, %420 : vector<2x32xf32>
    %428 = arith.mulf %427, %425 : vector<2x32xf32>
    %429 = arith.mulf %420, %404 : vector<2x32xf32>
    %430 = arith.addf %428, %429 : vector<2x32xf32>
    %431 = vector.extract_strided_slice %396 {offsets = [0, 96], sizes = [2, 96], strides = [1, 1]} : vector<2x192xf32> to vector<2x96xf32>
    %432 = vector.extract_strided_slice %394 {offsets = [0, 32], sizes = [2, 32], strides = [1, 1]} : vector<2x64xf32> to vector<2x32xf32>
    %433 = vector.extract_strided_slice %402 {offsets = [0, 0], sizes = [2, 32], strides = [1, 1]} : vector<2x96xf32> to vector<2x32xf32>
    %434 = vector.extract_strided_slice %431 {offsets = [0, 0], sizes = [2, 32], strides = [1, 1]} : vector<2x96xf32> to vector<2x32xf32>
    %435 = arith.addf %433, %434 : vector<2x32xf32>
    %436 = arith.negf %435 : vector<2x32xf32>
    %437 = math.exp %436 : vector<2x32xf32>
    %cst_122 = arith.constant 1.000000e+00 : f32
    %438 = vector.broadcast %cst_122 : f32 to vector<2x32xf32>
    %439 = arith.addf %438, %437 : vector<2x32xf32>
    %440 = arith.divf %438, %439 : vector<2x32xf32>
    %441 = vector.extract_strided_slice %402 {offsets = [0, 32], sizes = [2, 32], strides = [1, 1]} : vector<2x96xf32> to vector<2x32xf32>
    %442 = vector.extract_strided_slice %431 {offsets = [0, 32], sizes = [2, 32], strides = [1, 1]} : vector<2x96xf32> to vector<2x32xf32>
    %443 = arith.addf %441, %442 : vector<2x32xf32>
    %444 = arith.negf %443 : vector<2x32xf32>
    %445 = math.exp %444 : vector<2x32xf32>
    %cst_123 = arith.constant 1.000000e+00 : f32
    %446 = vector.broadcast %cst_123 : f32 to vector<2x32xf32>
    %447 = arith.addf %446, %445 : vector<2x32xf32>
    %448 = arith.divf %446, %447 : vector<2x32xf32>
    %449 = vector.extract_strided_slice %402 {offsets = [0, 64], sizes = [2, 32], strides = [1, 1]} : vector<2x96xf32> to vector<2x32xf32>
    %450 = vector.extract_strided_slice %431 {offsets = [0, 64], sizes = [2, 32], strides = [1, 1]} : vector<2x96xf32> to vector<2x32xf32>
    %451 = arith.mulf %440, %450 : vector<2x32xf32>
    %452 = arith.addf %449, %451 : vector<2x32xf32>
    %453 = math.tanh %452 : vector<2x32xf32>
    %cst_124 = arith.constant 1.000000e+00 : f32
    %454 = vector.broadcast %cst_124 : f32 to vector<2x32xf32>
    %455 = arith.subf %454, %448 : vector<2x32xf32>
    %456 = arith.mulf %455, %453 : vector<2x32xf32>
    %457 = arith.mulf %448, %432 : vector<2x32xf32>
    %458 = arith.addf %456, %457 : vector<2x32xf32>
    %459 = tpu.concatenate %430, %458 in 1 : vector<2x32xf32>, vector<2x32xf32> -> vector<2x64xf32>
    %c0_125 = arith.constant 0 : index
    %c0_126 = arith.constant 0 : index
    %460 = vector.load %arg7[%c0_125, %c0_126] : memref<2x64xf32, #tpu.memory_space<vmem>>, vector<2x64xf32>
    tpu.vector_store %arg7[%c0_125, %c0_126], %459 {strides = array<i32>} : memref<2x64xf32, #tpu.memory_space<vmem>>, vector<2x64xf32>,
    %461 = arith.index_cast %c5_i32 : i32 to index
    %c0_127 = arith.constant 0 : index
    %c0_128 = arith.constant 0 : index
    %462 = vector.load %arg5[%461, %c0_127, %c0_128] : memref<8x2x64xf32, #tpu.memory_space<vmem>>, vector<1x2x32xf32>
    %463 = vector.shape_cast %462 : vector<1x2x32xf32> to vector<2x32xf32>
    %464 = vector.shape_cast %430 : vector<2x32xf32> to vector<1x2x32xf32>
    tpu.vector_store %arg5[%461, %c0_127, %c0_128], %464 {strides = array<i32>} : memref<8x2x64xf32, #tpu.memory_space<vmem>>, vector<1x2x32xf32>,
    %465 = arith.index_cast %393 : i32 to index
    %c0_129 = arith.constant 0 : index
    %c32_130 = arith.constant 32 : index
    %466 = vector.load %arg5[%465, %c0_129, %c32_130] : memref<8x2x64xf32, #tpu.memory_space<vmem>>, vector<1x2x32xf32>
    %467 = vector.shape_cast %466 : vector<1x2x32xf32> to vector<2x32xf32>
    %468 = vector.shape_cast %458 : vector<2x32xf32> to vector<1x2x32xf32>
    tpu.vector_store %arg5[%465, %c0_129, %c32_130], %468 {strides = array<i32>} : memref<8x2x64xf32, #tpu.memory_space<vmem>>, vector<1x2x32xf32>,
    %c6_i32 = arith.constant 6 : i32
    %c7_i32_131 = arith.constant 7 : i32
    %469 = arith.subi %c7_i32_131, %c6_i32 : i32
    %c0_132 = arith.constant 0 : index
    %c0_133 = arith.constant 0 : index
    %470 = vector.load %arg7[%c0_132, %c0_133] : memref<2x64xf32, #tpu.memory_space<vmem>>, vector<2x64xf32>
    %cst_134 = arith.constant dense<0.000000e+00> : vector<2x192xf32>
    %471 = tpu.matmul %470, %9, %cst_134 {dimension_numbers = #tpu.dot_dimension_numbers<[1], [0], [0], [1], [0, 0, 1, 1], [], []>} : vector<2x64xf32>, vector<64x192xf32>, vector<2x192xf32> -> vector<2x192xf32>
    %472 = arith.addf %471, %12 : vector<2x192xf32>
    %c2_i32_135 = arith.constant 2 : i32
    %473 = arith.muli %c6_i32, %c2_i32_135 : i32
    %474 = arith.index_cast %473 : i32 to index
    %c0_136 = arith.constant 0 : index
    %475 = vector.load %arg6[%474, %c0_136] : memref<16x192xf32, #tpu.memory_space<vmem>>, vector<2x96xf32>
    %c2_i32_137 = arith.constant 2 : i32
    %476 = arith.muli %469, %c2_i32_137 : i32
    %477 = arith.index_cast %476 : i32 to index
    %c96_138 = arith.constant 96 : index
    %478 = vector.load %arg6[%477, %c96_138] : memref<16x192xf32, #tpu.memory_space<vmem>>, vector<2x96xf32>
    %479 = vector.extract_strided_slice %472 {offsets = [0, 0], sizes = [2, 96], strides = [1, 1]} : vector<2x192xf32> to vector<2x96xf32>
    %480 = vector.extract_strided_slice %470 {offsets = [0, 0], sizes = [2, 32], strides = [1, 1]} : vector<2x64xf32> to vector<2x32xf32>
    %481 = vector.extract_strided_slice %475 {offsets = [0, 0], sizes = [2, 32], strides = [1, 1]} : vector<2x96xf32> to vector<2x32xf32>
    %482 = vector.extract_strided_slice %479 {offsets = [0, 0], sizes = [2, 32], strides = [1, 1]} : vector<2x96xf32> to vector<2x32xf32>
    %483 = arith.addf %481, %482 : vector<2x32xf32>
    %484 = arith.negf %483 : vector<2x32xf32>
    %485 = math.exp %484 : vector<2x32xf32>
    %cst_139 = arith.constant 1.000000e+00 : f32
    %486 = vector.broadcast %cst_139 : f32 to vector<2x32xf32>
    %487 = arith.addf %486, %485 : vector<2x32xf32>
    %488 = arith.divf %486, %487 : vector<2x32xf32>
    %489 = vector.extract_strided_slice %475 {offsets = [0, 32], sizes = [2, 32], strides = [1, 1]} : vector<2x96xf32> to vector<2x32xf32>
    %490 = vector.extract_strided_slice %479 {offsets = [0, 32], sizes = [2, 32], strides = [1, 1]} : vector<2x96xf32> to vector<2x32xf32>
    %491 = arith.addf %489, %490 : vector<2x32xf32>
    %492 = arith.negf %491 : vector<2x32xf32>
    %493 = math.exp %492 : vector<2x32xf32>
    %cst_140 = arith.constant 1.000000e+00 : f32
    %494 = vector.broadcast %cst_140 : f32 to vector<2x32xf32>
    %495 = arith.addf %494, %493 : vector<2x32xf32>
    %496 = arith.divf %494, %495 : vector<2x32xf32>
    %497 = vector.extract_strided_slice %475 {offsets = [0, 64], sizes = [2, 32], strides = [1, 1]} : vector<2x96xf32> to vector<2x32xf32>
    %498 = vector.extract_strided_slice %479 {offsets = [0, 64], sizes = [2, 32], strides = [1, 1]} : vector<2x96xf32> to vector<2x32xf32>
    %499 = arith.mulf %488, %498 : vector<2x32xf32>
    %500 = arith.addf %497, %499 : vector<2x32xf32>
    %501 = math.tanh %500 : vector<2x32xf32>
    %cst_141 = arith.constant 1.000000e+00 : f32
    %502 = vector.broadcast %cst_141 : f32 to vector<2x32xf32>
    %503 = arith.subf %502, %496 : vector<2x32xf32>
    %504 = arith.mulf %503, %501 : vector<2x32xf32>
    %505 = arith.mulf %496, %480 : vector<2x32xf32>
    %506 = arith.addf %504, %505 : vector<2x32xf32>
    %507 = vector.extract_strided_slice %472 {offsets = [0, 96], sizes = [2, 96], strides = [1, 1]} : vector<2x192xf32> to vector<2x96xf32>
    %508 = vector.extract_strided_slice %470 {offsets = [0, 32], sizes = [2, 32], strides = [1, 1]} : vector<2x64xf32> to vector<2x32xf32>
    %509 = vector.extract_strided_slice %478 {offsets = [0, 0], sizes = [2, 32], strides = [1, 1]} : vector<2x96xf32> to vector<2x32xf32>
    %510 = vector.extract_strided_slice %507 {offsets = [0, 0], sizes = [2, 32], strides = [1, 1]} : vector<2x96xf32> to vector<2x32xf32>
    %511 = arith.addf %509, %510 : vector<2x32xf32>
    %512 = arith.negf %511 : vector<2x32xf32>
    %513 = math.exp %512 : vector<2x32xf32>
    %cst_142 = arith.constant 1.000000e+00 : f32
    %514 = vector.broadcast %cst_142 : f32 to vector<2x32xf32>
    %515 = arith.addf %514, %513 : vector<2x32xf32>
    %516 = arith.divf %514, %515 : vector<2x32xf32>
    %517 = vector.extract_strided_slice %478 {offsets = [0, 32], sizes = [2, 32], strides = [1, 1]} : vector<2x96xf32> to vector<2x32xf32>
    %518 = vector.extract_strided_slice %507 {offsets = [0, 32], sizes = [2, 32], strides = [1, 1]} : vector<2x96xf32> to vector<2x32xf32>
    %519 = arith.addf %517, %518 : vector<2x32xf32>
    %520 = arith.negf %519 : vector<2x32xf32>
    %521 = math.exp %520 : vector<2x32xf32>
    %cst_143 = arith.constant 1.000000e+00 : f32
    %522 = vector.broadcast %cst_143 : f32 to vector<2x32xf32>
    %523 = arith.addf %522, %521 : vector<2x32xf32>
    %524 = arith.divf %522, %523 : vector<2x32xf32>
    %525 = vector.extract_strided_slice %478 {offsets = [0, 64], sizes = [2, 32], strides = [1, 1]} : vector<2x96xf32> to vector<2x32xf32>
    %526 = vector.extract_strided_slice %507 {offsets = [0, 64], sizes = [2, 32], strides = [1, 1]} : vector<2x96xf32> to vector<2x32xf32>
    %527 = arith.mulf %516, %526 : vector<2x32xf32>
    %528 = arith.addf %525, %527 : vector<2x32xf32>
    %529 = math.tanh %528 : vector<2x32xf32>
    %cst_144 = arith.constant 1.000000e+00 : f32
    %530 = vector.broadcast %cst_144 : f32 to vector<2x32xf32>
    %531 = arith.subf %530, %524 : vector<2x32xf32>
    %532 = arith.mulf %531, %529 : vector<2x32xf32>
    %533 = arith.mulf %524, %508 : vector<2x32xf32>
    %534 = arith.addf %532, %533 : vector<2x32xf32>
    %535 = tpu.concatenate %506, %534 in 1 : vector<2x32xf32>, vector<2x32xf32> -> vector<2x64xf32>
    %c0_145 = arith.constant 0 : index
    %c0_146 = arith.constant 0 : index
    %536 = vector.load %arg7[%c0_145, %c0_146] : memref<2x64xf32, #tpu.memory_space<vmem>>, vector<2x64xf32>
    tpu.vector_store %arg7[%c0_145, %c0_146], %535 {strides = array<i32>} : memref<2x64xf32, #tpu.memory_space<vmem>>, vector<2x64xf32>,
    %537 = arith.index_cast %c6_i32 : i32 to index
    %c0_147 = arith.constant 0 : index
    %c0_148 = arith.constant 0 : index
    %538 = vector.load %arg5[%537, %c0_147, %c0_148] : memref<8x2x64xf32, #tpu.memory_space<vmem>>, vector<1x2x32xf32>
    %539 = vector.shape_cast %538 : vector<1x2x32xf32> to vector<2x32xf32>
    %540 = vector.shape_cast %506 : vector<2x32xf32> to vector<1x2x32xf32>
    tpu.vector_store %arg5[%537, %c0_147, %c0_148], %540 {strides = array<i32>} : memref<8x2x64xf32, #tpu.memory_space<vmem>>, vector<1x2x32xf32>,
    %541 = arith.index_cast %469 : i32 to index
    %c0_149 = arith.constant 0 : index
    %c32_150 = arith.constant 32 : index
    %542 = vector.load %arg5[%541, %c0_149, %c32_150] : memref<8x2x64xf32, #tpu.memory_space<vmem>>, vector<1x2x32xf32>
    %543 = vector.shape_cast %542 : vector<1x2x32xf32> to vector<2x32xf32>
    %544 = vector.shape_cast %534 : vector<2x32xf32> to vector<1x2x32xf32>
    tpu.vector_store %arg5[%541, %c0_149, %c32_150], %544 {strides = array<i32>} : memref<8x2x64xf32, #tpu.memory_space<vmem>>, vector<1x2x32xf32>,
    %c7_i32_151 = arith.constant 7 : i32
    %c7_i32_152 = arith.constant 7 : i32
    %545 = arith.subi %c7_i32_152, %c7_i32_151 : i32
    %c0_153 = arith.constant 0 : index
    %c0_154 = arith.constant 0 : index
    %546 = vector.load %arg7[%c0_153, %c0_154] : memref<2x64xf32, #tpu.memory_space<vmem>>, vector<2x64xf32>
    %cst_155 = arith.constant dense<0.000000e+00> : vector<2x192xf32>
    %547 = tpu.matmul %546, %9, %cst_155 {dimension_numbers = #tpu.dot_dimension_numbers<[1], [0], [0], [1], [0, 0, 1, 1], [], []>} : vector<2x64xf32>, vector<64x192xf32>, vector<2x192xf32> -> vector<2x192xf32>
    %548 = arith.addf %547, %12 : vector<2x192xf32>
    %c2_i32_156 = arith.constant 2 : i32
    %549 = arith.muli %c7_i32_151, %c2_i32_156 : i32
    %550 = arith.index_cast %549 : i32 to index
    %c0_157 = arith.constant 0 : index
    %551 = vector.load %arg6[%550, %c0_157] : memref<16x192xf32, #tpu.memory_space<vmem>>, vector<2x96xf32>
    %c2_i32_158 = arith.constant 2 : i32
    %552 = arith.muli %545, %c2_i32_158 : i32
    %553 = arith.index_cast %552 : i32 to index
    %c96_159 = arith.constant 96 : index
    %554 = vector.load %arg6[%553, %c96_159] : memref<16x192xf32, #tpu.memory_space<vmem>>, vector<2x96xf32>
    %555 = vector.extract_strided_slice %548 {offsets = [0, 0], sizes = [2, 96], strides = [1, 1]} : vector<2x192xf32> to vector<2x96xf32>
    %556 = vector.extract_strided_slice %546 {offsets = [0, 0], sizes = [2, 32], strides = [1, 1]} : vector<2x64xf32> to vector<2x32xf32>
    %557 = vector.extract_strided_slice %551 {offsets = [0, 0], sizes = [2, 32], strides = [1, 1]} : vector<2x96xf32> to vector<2x32xf32>
    %558 = vector.extract_strided_slice %555 {offsets = [0, 0], sizes = [2, 32], strides = [1, 1]} : vector<2x96xf32> to vector<2x32xf32>
    %559 = arith.addf %557, %558 : vector<2x32xf32>
    %560 = arith.negf %559 : vector<2x32xf32>
    %561 = math.exp %560 : vector<2x32xf32>
    %cst_160 = arith.constant 1.000000e+00 : f32
    %562 = vector.broadcast %cst_160 : f32 to vector<2x32xf32>
    %563 = arith.addf %562, %561 : vector<2x32xf32>
    %564 = arith.divf %562, %563 : vector<2x32xf32>
    %565 = vector.extract_strided_slice %551 {offsets = [0, 32], sizes = [2, 32], strides = [1, 1]} : vector<2x96xf32> to vector<2x32xf32>
    %566 = vector.extract_strided_slice %555 {offsets = [0, 32], sizes = [2, 32], strides = [1, 1]} : vector<2x96xf32> to vector<2x32xf32>
    %567 = arith.addf %565, %566 : vector<2x32xf32>
    %568 = arith.negf %567 : vector<2x32xf32>
    %569 = math.exp %568 : vector<2x32xf32>
    %cst_161 = arith.constant 1.000000e+00 : f32
    %570 = vector.broadcast %cst_161 : f32 to vector<2x32xf32>
    %571 = arith.addf %570, %569 : vector<2x32xf32>
    %572 = arith.divf %570, %571 : vector<2x32xf32>
    %573 = vector.extract_strided_slice %551 {offsets = [0, 64], sizes = [2, 32], strides = [1, 1]} : vector<2x96xf32> to vector<2x32xf32>
    %574 = vector.extract_strided_slice %555 {offsets = [0, 64], sizes = [2, 32], strides = [1, 1]} : vector<2x96xf32> to vector<2x32xf32>
    %575 = arith.mulf %564, %574 : vector<2x32xf32>
    %576 = arith.addf %573, %575 : vector<2x32xf32>
    %577 = math.tanh %576 : vector<2x32xf32>
    %cst_162 = arith.constant 1.000000e+00 : f32
    %578 = vector.broadcast %cst_162 : f32 to vector<2x32xf32>
    %579 = arith.subf %578, %572 : vector<2x32xf32>
    %580 = arith.mulf %579, %577 : vector<2x32xf32>
    %581 = arith.mulf %572, %556 : vector<2x32xf32>
    %582 = arith.addf %580, %581 : vector<2x32xf32>
    %583 = vector.extract_strided_slice %548 {offsets = [0, 96], sizes = [2, 96], strides = [1, 1]} : vector<2x192xf32> to vector<2x96xf32>
    %584 = vector.extract_strided_slice %546 {offsets = [0, 32], sizes = [2, 32], strides = [1, 1]} : vector<2x64xf32> to vector<2x32xf32>
    %585 = vector.extract_strided_slice %554 {offsets = [0, 0], sizes = [2, 32], strides = [1, 1]} : vector<2x96xf32> to vector<2x32xf32>
    %586 = vector.extract_strided_slice %583 {offsets = [0, 0], sizes = [2, 32], strides = [1, 1]} : vector<2x96xf32> to vector<2x32xf32>
    %587 = arith.addf %585, %586 : vector<2x32xf32>
    %588 = arith.negf %587 : vector<2x32xf32>
    %589 = math.exp %588 : vector<2x32xf32>
    %cst_163 = arith.constant 1.000000e+00 : f32
    %590 = vector.broadcast %cst_163 : f32 to vector<2x32xf32>
    %591 = arith.addf %590, %589 : vector<2x32xf32>
    %592 = arith.divf %590, %591 : vector<2x32xf32>
    %593 = vector.extract_strided_slice %554 {offsets = [0, 32], sizes = [2, 32], strides = [1, 1]} : vector<2x96xf32> to vector<2x32xf32>
    %594 = vector.extract_strided_slice %583 {offsets = [0, 32], sizes = [2, 32], strides = [1, 1]} : vector<2x96xf32> to vector<2x32xf32>
    %595 = arith.addf %593, %594 : vector<2x32xf32>
    %596 = arith.negf %595 : vector<2x32xf32>
    %597 = math.exp %596 : vector<2x32xf32>
    %cst_164 = arith.constant 1.000000e+00 : f32
    %598 = vector.broadcast %cst_164 : f32 to vector<2x32xf32>
    %599 = arith.addf %598, %597 : vector<2x32xf32>
    %600 = arith.divf %598, %599 : vector<2x32xf32>
    %601 = vector.extract_strided_slice %554 {offsets = [0, 64], sizes = [2, 32], strides = [1, 1]} : vector<2x96xf32> to vector<2x32xf32>
    %602 = vector.extract_strided_slice %583 {offsets = [0, 64], sizes = [2, 32], strides = [1, 1]} : vector<2x96xf32> to vector<2x32xf32>
    %603 = arith.mulf %592, %602 : vector<2x32xf32>
    %604 = arith.addf %601, %603 : vector<2x32xf32>
    %605 = math.tanh %604 : vector<2x32xf32>
    %cst_165 = arith.constant 1.000000e+00 : f32
    %606 = vector.broadcast %cst_165 : f32 to vector<2x32xf32>
    %607 = arith.subf %606, %600 : vector<2x32xf32>
    %608 = arith.mulf %607, %605 : vector<2x32xf32>
    %609 = arith.mulf %600, %584 : vector<2x32xf32>
    %610 = arith.addf %608, %609 : vector<2x32xf32>
    %611 = tpu.concatenate %582, %610 in 1 : vector<2x32xf32>, vector<2x32xf32> -> vector<2x64xf32>
    %c0_166 = arith.constant 0 : index
    %c0_167 = arith.constant 0 : index
    %612 = vector.load %arg7[%c0_166, %c0_167] : memref<2x64xf32, #tpu.memory_space<vmem>>, vector<2x64xf32>
    tpu.vector_store %arg7[%c0_166, %c0_167], %611 {strides = array<i32>} : memref<2x64xf32, #tpu.memory_space<vmem>>, vector<2x64xf32>,
    %613 = arith.index_cast %c7_i32_151 : i32 to index
    %c0_168 = arith.constant 0 : index
    %c0_169 = arith.constant 0 : index
    %614 = vector.load %arg5[%613, %c0_168, %c0_169] : memref<8x2x64xf32, #tpu.memory_space<vmem>>, vector<1x2x32xf32>
    %615 = vector.shape_cast %614 : vector<1x2x32xf32> to vector<2x32xf32>
    %616 = vector.shape_cast %582 : vector<2x32xf32> to vector<1x2x32xf32>
    tpu.vector_store %arg5[%613, %c0_168, %c0_169], %616 {strides = array<i32>} : memref<8x2x64xf32, #tpu.memory_space<vmem>>, vector<1x2x32xf32>,
    %617 = arith.index_cast %545 : i32 to index
    %c0_170 = arith.constant 0 : index
    %c32_171 = arith.constant 32 : index
    %618 = vector.load %arg5[%617, %c0_170, %c32_171] : memref<8x2x64xf32, #tpu.memory_space<vmem>>, vector<1x2x32xf32>
    %619 = vector.shape_cast %618 : vector<1x2x32xf32> to vector<2x32xf32>
    %620 = vector.shape_cast %610 : vector<2x32xf32> to vector<1x2x32xf32>
    tpu.vector_store %arg5[%617, %c0_170, %c32_171], %620 {strides = array<i32>} : memref<8x2x64xf32, #tpu.memory_space<vmem>>, vector<1x2x32xf32>,
    %c8_i32 = arith.constant 8 : i32
    return
  }
}

module attributes {stable_mosaic.version = 11 : i64} {
  func.func @bigru_layer_kernel(%arg0: memref<16x32xf32, #tpu.memory_space<vmem>>, %arg1: memref<32x192xf32, #tpu.memory_space<vmem>>, %arg2: memref<1x192xf32, #tpu.memory_space<vmem>>, %arg3: memref<64x192xf32, #tpu.memory_space<vmem>>, %arg4: memref<1x192xf32, #tpu.memory_space<vmem>>, %arg5: memref<8x2x64xf32, #tpu.memory_space<vmem>>, %arg6: memref<16x192xf32, #tpu.memory_space<vmem>>, %arg7: memref<2x64xf32, #tpu.memory_space<vmem>>) attributes {dimension_semantics = [], scalar_prefetch = 0 : i64, scratch_operands = 2 : i64, tpu.core_type = #tpu.core_type<tc>} {
    %c0 = arith.constant 0 : index
    %c0_0 = arith.constant 0 : index
    %0 = vector.load %arg0[%c0, %c0_0] : memref<16x32xf32, #tpu.memory_space<vmem>>, vector<16x32xf32>
    %c0_1 = arith.constant 0 : index
    %c0_2 = arith.constant 0 : index
    %1 = vector.load %arg1[%c0_1, %c0_2] : memref<32x192xf32, #tpu.memory_space<vmem>>, vector<32x192xf32>
    %cst = arith.constant dense<0.000000e+00> : vector<16x192xf32>
    %2 = tpu.matmul %0, %1, %cst {dimension_numbers = #tpu.dot_dimension_numbers<[1], [0], [0], [1], [0, 0, 1, 1], [], []>} : vector<16x32xf32>, vector<32x192xf32>, vector<16x192xf32> -> vector<16x192xf32>
    %c0_3 = arith.constant 0 : index
    %c0_4 = arith.constant 0 : index
    %3 = vector.load %arg2[%c0_3, %c0_4] : memref<1x192xf32, #tpu.memory_space<vmem>>, vector<1x192xf32>
    %4 = vector.broadcast %3 : vector<1x192xf32> to vector<16x192xf32>
    %5 = arith.addf %2, %4 : vector<16x192xf32>
    %c0_5 = arith.constant 0 : index
    %c0_6 = arith.constant 0 : index
    %6 = vector.load %arg6[%c0_5, %c0_6] : memref<16x192xf32, #tpu.memory_space<vmem>>, vector<16x192xf32>
    tpu.vector_store %arg6[%c0_5, %c0_6], %5 {strides = array<i32>} : memref<16x192xf32, #tpu.memory_space<vmem>>, vector<16x192xf32>,
    %cst_7 = arith.constant 0.000000e+00 : f32
    %7 = vector.broadcast %cst_7 : f32 to vector<2x64xf32>
    %c0_8 = arith.constant 0 : index
    %c0_9 = arith.constant 0 : index
    %8 = vector.load %arg7[%c0_8, %c0_9] : memref<2x64xf32, #tpu.memory_space<vmem>>, vector<2x64xf32>
    tpu.vector_store %arg7[%c0_8, %c0_9], %7 {strides = array<i32>} : memref<2x64xf32, #tpu.memory_space<vmem>>, vector<2x64xf32>,
    %c0_10 = arith.constant 0 : index
    %c0_11 = arith.constant 0 : index
    %9 = vector.load %arg3[%c0_10, %c0_11] : memref<64x192xf32, #tpu.memory_space<vmem>>, vector<64x192xf32>
    %c0_12 = arith.constant 0 : index
    %c0_13 = arith.constant 0 : index
    %10 = vector.load %arg4[%c0_12, %c0_13] : memref<1x192xf32, #tpu.memory_space<vmem>>, vector<1x192xf32>
    %11 = vector.shape_cast %10 : vector<1x192xf32> to vector<1x192xf32>
    %12 = vector.broadcast %11 : vector<1x192xf32> to vector<2x192xf32>
    %c0_i32 = arith.constant 0 : i32
    %c7_i32 = arith.constant 7 : i32
    %13 = arith.subi %c7_i32, %c0_i32 : i32
    %c0_14 = arith.constant 0 : index
    %c0_15 = arith.constant 0 : index
    %14 = vector.load %arg7[%c0_14, %c0_15] : memref<2x64xf32, #tpu.memory_space<vmem>>, vector<2x64xf32>
    %cst_16 = arith.constant dense<0.000000e+00> : vector<2x192xf32>
    %15 = tpu.matmul %14, %9, %cst_16 {dimension_numbers = #tpu.dot_dimension_numbers<[1], [0], [0], [1], [0, 0, 1, 1], [], []>} : vector<2x64xf32>, vector<64x192xf32>, vector<2x192xf32> -> vector<2x192xf32>
    %16 = arith.addf %15, %12 : vector<2x192xf32>
    %c2_i32 = arith.constant 2 : i32
    %17 = arith.muli %c0_i32, %c2_i32 : i32
    %18 = arith.index_cast %17 : i32 to index
    %c0_17 = arith.constant 0 : index
    %19 = vector.load %arg6[%18, %c0_17] : memref<16x192xf32, #tpu.memory_space<vmem>>, vector<2x96xf32>
    %c2_i32_18 = arith.constant 2 : i32
    %20 = arith.muli %13, %c2_i32_18 : i32
    %21 = arith.index_cast %20 : i32 to index
    %c96 = arith.constant 96 : index
    %22 = vector.load %arg6[%21, %c96] : memref<16x192xf32, #tpu.memory_space<vmem>>, vector<2x96xf32>
    %23 = vector.extract_strided_slice %16 {offsets = [0, 0], sizes = [2, 96], strides = [1, 1]} : vector<2x192xf32> to vector<2x96xf32>
    %24 = vector.extract_strided_slice %14 {offsets = [0, 0], sizes = [2, 32], strides = [1, 1]} : vector<2x64xf32> to vector<2x32xf32>
    %25 = vector.extract_strided_slice %19 {offsets = [0, 0], sizes = [2, 32], strides = [1, 1]} : vector<2x96xf32> to vector<2x32xf32>
    %26 = vector.extract_strided_slice %23 {offsets = [0, 0], sizes = [2, 32], strides = [1, 1]} : vector<2x96xf32> to vector<2x32xf32>
    %27 = arith.addf %25, %26 : vector<2x32xf32>
    %28 = arith.negf %27 : vector<2x32xf32>
    %29 = math.exp %28 : vector<2x32xf32>
    %cst_19 = arith.constant 1.000000e+00 : f32
    %30 = vector.broadcast %cst_19 : f32 to vector<2x32xf32>
    %31 = arith.addf %30, %29 : vector<2x32xf32>
    %32 = arith.divf %30, %31 : vector<2x32xf32>
    %33 = vector.extract_strided_slice %19 {offsets = [0, 32], sizes = [2, 32], strides = [1, 1]} : vector<2x96xf32> to vector<2x32xf32>
    %34 = vector.extract_strided_slice %23 {offsets = [0, 32], sizes = [2, 32], strides = [1, 1]} : vector<2x96xf32> to vector<2x32xf32>
    %35 = arith.addf %33, %34 : vector<2x32xf32>
    %36 = arith.negf %35 : vector<2x32xf32>
    %37 = math.exp %36 : vector<2x32xf32>
    %cst_20 = arith.constant 1.000000e+00 : f32
    %38 = vector.broadcast %cst_20 : f32 to vector<2x32xf32>
    %39 = arith.addf %38, %37 : vector<2x32xf32>
    %40 = arith.divf %38, %39 : vector<2x32xf32>
    %41 = vector.extract_strided_slice %19 {offsets = [0, 64], sizes = [2, 32], strides = [1, 1]} : vector<2x96xf32> to vector<2x32xf32>
    %42 = vector.extract_strided_slice %23 {offsets = [0, 64], sizes = [2, 32], strides = [1, 1]} : vector<2x96xf32> to vector<2x32xf32>
    %43 = arith.mulf %32, %42 : vector<2x32xf32>
    %44 = arith.addf %41, %43 : vector<2x32xf32>
    %45 = math.tanh %44 : vector<2x32xf32>
    %cst_21 = arith.constant 1.000000e+00 : f32
    %46 = vector.broadcast %cst_21 : f32 to vector<2x32xf32>
    %47 = arith.subf %46, %40 : vector<2x32xf32>
    %48 = arith.mulf %47, %45 : vector<2x32xf32>
    %49 = arith.mulf %40, %24 : vector<2x32xf32>
    %50 = arith.addf %48, %49 : vector<2x32xf32>
    %51 = vector.extract_strided_slice %16 {offsets = [0, 96], sizes = [2, 96], strides = [1, 1]} : vector<2x192xf32> to vector<2x96xf32>
    %52 = vector.extract_strided_slice %14 {offsets = [0, 32], sizes = [2, 32], strides = [1, 1]} : vector<2x64xf32> to vector<2x32xf32>
    %53 = vector.extract_strided_slice %22 {offsets = [0, 0], sizes = [2, 32], strides = [1, 1]} : vector<2x96xf32> to vector<2x32xf32>
    %54 = vector.extract_strided_slice %51 {offsets = [0, 0], sizes = [2, 32], strides = [1, 1]} : vector<2x96xf32> to vector<2x32xf32>
    %55 = arith.addf %53, %54 : vector<2x32xf32>
    %56 = arith.negf %55 : vector<2x32xf32>
    %57 = math.exp %56 : vector<2x32xf32>
    %cst_22 = arith.constant 1.000000e+00 : f32
    %58 = vector.broadcast %cst_22 : f32 to vector<2x32xf32>
    %59 = arith.addf %58, %57 : vector<2x32xf32>
    %60 = arith.divf %58, %59 : vector<2x32xf32>
    %61 = vector.extract_strided_slice %22 {offsets = [0, 32], sizes = [2, 32], strides = [1, 1]} : vector<2x96xf32> to vector<2x32xf32>
    %62 = vector.extract_strided_slice %51 {offsets = [0, 32], sizes = [2, 32], strides = [1, 1]} : vector<2x96xf32> to vector<2x32xf32>
    %63 = arith.addf %61, %62 : vector<2x32xf32>
    %64 = arith.negf %63 : vector<2x32xf32>
    %65 = math.exp %64 : vector<2x32xf32>
    %cst_23 = arith.constant 1.000000e+00 : f32
    %66 = vector.broadcast %cst_23 : f32 to vector<2x32xf32>
    %67 = arith.addf %66, %65 : vector<2x32xf32>
    %68 = arith.divf %66, %67 : vector<2x32xf32>
    %69 = vector.extract_strided_slice %22 {offsets = [0, 64], sizes = [2, 32], strides = [1, 1]} : vector<2x96xf32> to vector<2x32xf32>
    %70 = vector.extract_strided_slice %51 {offsets = [0, 64], sizes = [2, 32], strides = [1, 1]} : vector<2x96xf32> to vector<2x32xf32>
    %71 = arith.mulf %60, %70 : vector<2x32xf32>
    %72 = arith.addf %69, %71 : vector<2x32xf32>
    %73 = math.tanh %72 : vector<2x32xf32>
    %cst_24 = arith.constant 1.000000e+00 : f32
    %74 = vector.broadcast %cst_24 : f32 to vector<2x32xf32>
    %75 = arith.subf %74, %68 : vector<2x32xf32>
    %76 = arith.mulf %75, %73 : vector<2x32xf32>
    %77 = arith.mulf %68, %52 : vector<2x32xf32>
    %78 = arith.addf %76, %77 : vector<2x32xf32>
    %79 = tpu.concatenate %50, %78 in 1 : vector<2x32xf32>, vector<2x32xf32> -> vector<2x64xf32>
    %c0_25 = arith.constant 0 : index
    %c0_26 = arith.constant 0 : index
    %80 = vector.load %arg7[%c0_25, %c0_26] : memref<2x64xf32, #tpu.memory_space<vmem>>, vector<2x64xf32>
    tpu.vector_store %arg7[%c0_25, %c0_26], %79 {strides = array<i32>} : memref<2x64xf32, #tpu.memory_space<vmem>>, vector<2x64xf32>,
    %81 = arith.index_cast %c0_i32 : i32 to index
    %c0_27 = arith.constant 0 : index
    %c0_28 = arith.constant 0 : index
    %82 = vector.load %arg5[%81, %c0_27, %c0_28] : memref<8x2x64xf32, #tpu.memory_space<vmem>>, vector<1x2x32xf32>
    %83 = vector.shape_cast %82 : vector<1x2x32xf32> to vector<2x32xf32>
    %84 = vector.shape_cast %50 : vector<2x32xf32> to vector<1x2x32xf32>
    tpu.vector_store %arg5[%81, %c0_27, %c0_28], %84 {strides = array<i32>} : memref<8x2x64xf32, #tpu.memory_space<vmem>>, vector<1x2x32xf32>,
    %85 = arith.index_cast %13 : i32 to index
    %c0_29 = arith.constant 0 : index
    %c32 = arith.constant 32 : index
    %86 = vector.load %arg5[%85, %c0_29, %c32] : memref<8x2x64xf32, #tpu.memory_space<vmem>>, vector<1x2x32xf32>
    %87 = vector.shape_cast %86 : vector<1x2x32xf32> to vector<2x32xf32>
    %88 = vector.shape_cast %78 : vector<2x32xf32> to vector<1x2x32xf32>
    tpu.vector_store %arg5[%85, %c0_29, %c32], %88 {strides = array<i32>} : memref<8x2x64xf32, #tpu.memory_space<vmem>>, vector<1x2x32xf32>,
    %c1_i32 = arith.constant 1 : i32
    %c7_i32_30 = arith.constant 7 : i32
    %89 = arith.subi %c7_i32_30, %c1_i32 : i32
    %c0_31 = arith.constant 0 : index
    %c0_32 = arith.constant 0 : index
    %90 = vector.load %arg7[%c0_31, %c0_32] : memref<2x64xf32, #tpu.memory_space<vmem>>, vector<2x64xf32>
    %cst_33 = arith.constant dense<0.000000e+00> : vector<2x192xf32>
    %91 = tpu.matmul %90, %9, %cst_33 {dimension_numbers = #tpu.dot_dimension_numbers<[1], [0], [0], [1], [0, 0, 1, 1], [], []>} : vector<2x64xf32>, vector<64x192xf32>, vector<2x192xf32> -> vector<2x192xf32>
    %92 = arith.addf %91, %12 : vector<2x192xf32>
    %c2_i32_34 = arith.constant 2 : i32
    %93 = arith.muli %c1_i32, %c2_i32_34 : i32
    %94 = arith.index_cast %93 : i32 to index
    %c0_35 = arith.constant 0 : index
    %95 = vector.load %arg6[%94, %c0_35] : memref<16x192xf32, #tpu.memory_space<vmem>>, vector<2x96xf32>
    %c2_i32_36 = arith.constant 2 : i32
    %96 = arith.muli %89, %c2_i32_36 : i32
    %97 = arith.index_cast %96 : i32 to index
    %c96_37 = arith.constant 96 : index
    %98 = vector.load %arg6[%97, %c96_37] : memref<16x192xf32, #tpu.memory_space<vmem>>, vector<2x96xf32>
    %99 = vector.extract_strided_slice %92 {offsets = [0, 0], sizes = [2, 96], strides = [1, 1]} : vector<2x192xf32> to vector<2x96xf32>
    %100 = vector.extract_strided_slice %90 {offsets = [0, 0], sizes = [2, 32], strides = [1, 1]} : vector<2x64xf32> to vector<2x32xf32>
    %101 = vector.extract_strided_slice %95 {offsets = [0, 0], sizes = [2, 32], strides = [1, 1]} : vector<2x96xf32> to vector<2x32xf32>
    %102 = vector.extract_strided_slice %99 {offsets = [0, 0], sizes = [2, 32], strides = [1, 1]} : vector<2x96xf32> to vector<2x32xf32>
    %103 = arith.addf %101, %102 : vector<2x32xf32>
    %104 = arith.negf %103 : vector<2x32xf32>
    %105 = math.exp %104 : vector<2x32xf32>
    %cst_38 = arith.constant 1.000000e+00 : f32
    %106 = vector.broadcast %cst_38 : f32 to vector<2x32xf32>
    %107 = arith.addf %106, %105 : vector<2x32xf32>
    %108 = arith.divf %106, %107 : vector<2x32xf32>
    %109 = vector.extract_strided_slice %95 {offsets = [0, 32], sizes = [2, 32], strides = [1, 1]} : vector<2x96xf32> to vector<2x32xf32>
    %110 = vector.extract_strided_slice %99 {offsets = [0, 32], sizes = [2, 32], strides = [1, 1]} : vector<2x96xf32> to vector<2x32xf32>
    %111 = arith.addf %109, %110 : vector<2x32xf32>
    %112 = arith.negf %111 : vector<2x32xf32>
    %113 = math.exp %112 : vector<2x32xf32>
    %cst_39 = arith.constant 1.000000e+00 : f32
    %114 = vector.broadcast %cst_39 : f32 to vector<2x32xf32>
    %115 = arith.addf %114, %113 : vector<2x32xf32>
    %116 = arith.divf %114, %115 : vector<2x32xf32>
    %117 = vector.extract_strided_slice %95 {offsets = [0, 64], sizes = [2, 32], strides = [1, 1]} : vector<2x96xf32> to vector<2x32xf32>
    %118 = vector.extract_strided_slice %99 {offsets = [0, 64], sizes = [2, 32], strides = [1, 1]} : vector<2x96xf32> to vector<2x32xf32>
    %119 = arith.mulf %108, %118 : vector<2x32xf32>
    %120 = arith.addf %117, %119 : vector<2x32xf32>
    %121 = math.tanh %120 : vector<2x32xf32>
    %cst_40 = arith.constant 1.000000e+00 : f32
    %122 = vector.broadcast %cst_40 : f32 to vector<2x32xf32>
    %123 = arith.subf %122, %116 : vector<2x32xf32>
    %124 = arith.mulf %123, %121 : vector<2x32xf32>
    %125 = arith.mulf %116, %100 : vector<2x32xf32>
    %126 = arith.addf %124, %125 : vector<2x32xf32>
    %127 = vector.extract_strided_slice %92 {offsets = [0, 96], sizes = [2, 96], strides = [1, 1]} : vector<2x192xf32> to vector<2x96xf32>
    %128 = vector.extract_strided_slice %90 {offsets = [0, 32], sizes = [2, 32], strides = [1, 1]} : vector<2x64xf32> to vector<2x32xf32>
    %129 = vector.extract_strided_slice %98 {offsets = [0, 0], sizes = [2, 32], strides = [1, 1]} : vector<2x96xf32> to vector<2x32xf32>
    %130 = vector.extract_strided_slice %127 {offsets = [0, 0], sizes = [2, 32], strides = [1, 1]} : vector<2x96xf32> to vector<2x32xf32>
    %131 = arith.addf %129, %130 : vector<2x32xf32>
    %132 = arith.negf %131 : vector<2x32xf32>
    %133 = math.exp %132 : vector<2x32xf32>
    %cst_41 = arith.constant 1.000000e+00 : f32
    %134 = vector.broadcast %cst_41 : f32 to vector<2x32xf32>
    %135 = arith.addf %134, %133 : vector<2x32xf32>
    %136 = arith.divf %134, %135 : vector<2x32xf32>
    %137 = vector.extract_strided_slice %98 {offsets = [0, 32], sizes = [2, 32], strides = [1, 1]} : vector<2x96xf32> to vector<2x32xf32>
    %138 = vector.extract_strided_slice %127 {offsets = [0, 32], sizes = [2, 32], strides = [1, 1]} : vector<2x96xf32> to vector<2x32xf32>
    %139 = arith.addf %137, %138 : vector<2x32xf32>
    %140 = arith.negf %139 : vector<2x32xf32>
    %141 = math.exp %140 : vector<2x32xf32>
    %cst_42 = arith.constant 1.000000e+00 : f32
    %142 = vector.broadcast %cst_42 : f32 to vector<2x32xf32>
    %143 = arith.addf %142, %141 : vector<2x32xf32>
    %144 = arith.divf %142, %143 : vector<2x32xf32>
    %145 = vector.extract_strided_slice %98 {offsets = [0, 64], sizes = [2, 32], strides = [1, 1]} : vector<2x96xf32> to vector<2x32xf32>
    %146 = vector.extract_strided_slice %127 {offsets = [0, 64], sizes = [2, 32], strides = [1, 1]} : vector<2x96xf32> to vector<2x32xf32>
    %147 = arith.mulf %136, %146 : vector<2x32xf32>
    %148 = arith.addf %145, %147 : vector<2x32xf32>
    %149 = math.tanh %148 : vector<2x32xf32>
    %cst_43 = arith.constant 1.000000e+00 : f32
    %150 = vector.broadcast %cst_43 : f32 to vector<2x32xf32>
    %151 = arith.subf %150, %144 : vector<2x32xf32>
    %152 = arith.mulf %151, %149 : vector<2x32xf32>
    %153 = arith.mulf %144, %128 : vector<2x32xf32>
    %154 = arith.addf %152, %153 : vector<2x32xf32>
    %155 = tpu.concatenate %126, %154 in 1 : vector<2x32xf32>, vector<2x32xf32> -> vector<2x64xf32>
    %c0_44 = arith.constant 0 : index
    %c0_45 = arith.constant 0 : index
    %156 = vector.load %arg7[%c0_44, %c0_45] : memref<2x64xf32, #tpu.memory_space<vmem>>, vector<2x64xf32>
    tpu.vector_store %arg7[%c0_44, %c0_45], %155 {strides = array<i32>} : memref<2x64xf32, #tpu.memory_space<vmem>>, vector<2x64xf32>,
    %157 = arith.index_cast %c1_i32 : i32 to index
    %c0_46 = arith.constant 0 : index
    %c0_47 = arith.constant 0 : index
    %158 = vector.load %arg5[%157, %c0_46, %c0_47] : memref<8x2x64xf32, #tpu.memory_space<vmem>>, vector<1x2x32xf32>
    %159 = vector.shape_cast %158 : vector<1x2x32xf32> to vector<2x32xf32>
    %160 = vector.shape_cast %126 : vector<2x32xf32> to vector<1x2x32xf32>
    tpu.vector_store %arg5[%157, %c0_46, %c0_47], %160 {strides = array<i32>} : memref<8x2x64xf32, #tpu.memory_space<vmem>>, vector<1x2x32xf32>,
    %161 = arith.index_cast %89 : i32 to index
    %c0_48 = arith.constant 0 : index
    %c32_49 = arith.constant 32 : index
    %162 = vector.load %arg5[%161, %c0_48, %c32_49] : memref<8x2x64xf32, #tpu.memory_space<vmem>>, vector<1x2x32xf32>
    %163 = vector.shape_cast %162 : vector<1x2x32xf32> to vector<2x32xf32>
    %164 = vector.shape_cast %154 : vector<2x32xf32> to vector<1x2x32xf32>
    tpu.vector_store %arg5[%161, %c0_48, %c32_49], %164 {strides = array<i32>} : memref<8x2x64xf32, #tpu.memory_space<vmem>>, vector<1x2x32xf32>,
    %c2_i32_50 = arith.constant 2 : i32
    %c7_i32_51 = arith.constant 7 : i32
    %165 = arith.subi %c7_i32_51, %c2_i32_50 : i32
    %c0_52 = arith.constant 0 : index
    %c0_53 = arith.constant 0 : index
    %166 = vector.load %arg7[%c0_52, %c0_53] : memref<2x64xf32, #tpu.memory_space<vmem>>, vector<2x64xf32>
    %cst_54 = arith.constant dense<0.000000e+00> : vector<2x192xf32>
    %167 = tpu.matmul %166, %9, %cst_54 {dimension_numbers = #tpu.dot_dimension_numbers<[1], [0], [0], [1], [0, 0, 1, 1], [], []>} : vector<2x64xf32>, vector<64x192xf32>, vector<2x192xf32> -> vector<2x192xf32>
    %168 = arith.addf %167, %12 : vector<2x192xf32>
    %c2_i32_55 = arith.constant 2 : i32
    %169 = arith.muli %c2_i32_50, %c2_i32_55 : i32
    %170 = arith.index_cast %169 : i32 to index
    %c0_56 = arith.constant 0 : index
    %171 = vector.load %arg6[%170, %c0_56] : memref<16x192xf32, #tpu.memory_space<vmem>>, vector<2x96xf32>
    %c2_i32_57 = arith.constant 2 : i32
    %172 = arith.muli %165, %c2_i32_57 : i32
    %173 = arith.index_cast %172 : i32 to index
    %c96_58 = arith.constant 96 : index
    %174 = vector.load %arg6[%173, %c96_58] : memref<16x192xf32, #tpu.memory_space<vmem>>, vector<2x96xf32>
    %175 = vector.extract_strided_slice %168 {offsets = [0, 0], sizes = [2, 96], strides = [1, 1]} : vector<2x192xf32> to vector<2x96xf32>
    %176 = vector.extract_strided_slice %166 {offsets = [0, 0], sizes = [2, 32], strides = [1, 1]} : vector<2x64xf32> to vector<2x32xf32>
    %177 = vector.extract_strided_slice %171 {offsets = [0, 0], sizes = [2, 32], strides = [1, 1]} : vector<2x96xf32> to vector<2x32xf32>
    %178 = vector.extract_strided_slice %175 {offsets = [0, 0], sizes = [2, 32], strides = [1, 1]} : vector<2x96xf32> to vector<2x32xf32>
    %179 = arith.addf %177, %178 : vector<2x32xf32>
    %180 = arith.negf %179 : vector<2x32xf32>
    %181 = math.exp %180 : vector<2x32xf32>
    %cst_59 = arith.constant 1.000000e+00 : f32
    %182 = vector.broadcast %cst_59 : f32 to vector<2x32xf32>
    %183 = arith.addf %182, %181 : vector<2x32xf32>
    %184 = arith.divf %182, %183 : vector<2x32xf32>
    %185 = vector.extract_strided_slice %171 {offsets = [0, 32], sizes = [2, 32], strides = [1, 1]} : vector<2x96xf32> to vector<2x32xf32>
    %186 = vector.extract_strided_slice %175 {offsets = [0, 32], sizes = [2, 32], strides = [1, 1]} : vector<2x96xf32> to vector<2x32xf32>
    %187 = arith.addf %185, %186 : vector<2x32xf32>
    %188 = arith.negf %187 : vector<2x32xf32>
    %189 = math.exp %188 : vector<2x32xf32>
    %cst_60 = arith.constant 1.000000e+00 : f32
    %190 = vector.broadcast %cst_60 : f32 to vector<2x32xf32>
    %191 = arith.addf %190, %189 : vector<2x32xf32>
    %192 = arith.divf %190, %191 : vector<2x32xf32>
    %193 = vector.extract_strided_slice %171 {offsets = [0, 64], sizes = [2, 32], strides = [1, 1]} : vector<2x96xf32> to vector<2x32xf32>
    %194 = vector.extract_strided_slice %175 {offsets = [0, 64], sizes = [2, 32], strides = [1, 1]} : vector<2x96xf32> to vector<2x32xf32>
    %195 = arith.mulf %184, %194 : vector<2x32xf32>
    %196 = arith.addf %193, %195 : vector<2x32xf32>
    %197 = math.tanh %196 : vector<2x32xf32>
    %cst_61 = arith.constant 1.000000e+00 : f32
    %198 = vector.broadcast %cst_61 : f32 to vector<2x32xf32>
    %199 = arith.subf %198, %192 : vector<2x32xf32>
    %200 = arith.mulf %199, %197 : vector<2x32xf32>
    %201 = arith.mulf %192, %176 : vector<2x32xf32>
    %202 = arith.addf %200, %201 : vector<2x32xf32>
    %203 = vector.extract_strided_slice %168 {offsets = [0, 96], sizes = [2, 96], strides = [1, 1]} : vector<2x192xf32> to vector<2x96xf32>
    %204 = vector.extract_strided_slice %166 {offsets = [0, 32], sizes = [2, 32], strides = [1, 1]} : vector<2x64xf32> to vector<2x32xf32>
    %205 = vector.extract_strided_slice %174 {offsets = [0, 0], sizes = [2, 32], strides = [1, 1]} : vector<2x96xf32> to vector<2x32xf32>
    %206 = vector.extract_strided_slice %203 {offsets = [0, 0], sizes = [2, 32], strides = [1, 1]} : vector<2x96xf32> to vector<2x32xf32>
    %207 = arith.addf %205, %206 : vector<2x32xf32>
    %208 = arith.negf %207 : vector<2x32xf32>
    %209 = math.exp %208 : vector<2x32xf32>
    %cst_62 = arith.constant 1.000000e+00 : f32
    %210 = vector.broadcast %cst_62 : f32 to vector<2x32xf32>
    %211 = arith.addf %210, %209 : vector<2x32xf32>
    %212 = arith.divf %210, %211 : vector<2x32xf32>
    %213 = vector.extract_strided_slice %174 {offsets = [0, 32], sizes = [2, 32], strides = [1, 1]} : vector<2x96xf32> to vector<2x32xf32>
    %214 = vector.extract_strided_slice %203 {offsets = [0, 32], sizes = [2, 32], strides = [1, 1]} : vector<2x96xf32> to vector<2x32xf32>
    %215 = arith.addf %213, %214 : vector<2x32xf32>
    %216 = arith.negf %215 : vector<2x32xf32>
    %217 = math.exp %216 : vector<2x32xf32>
    %cst_63 = arith.constant 1.000000e+00 : f32
    %218 = vector.broadcast %cst_63 : f32 to vector<2x32xf32>
    %219 = arith.addf %218, %217 : vector<2x32xf32>
    %220 = arith.divf %218, %219 : vector<2x32xf32>
    %221 = vector.extract_strided_slice %174 {offsets = [0, 64], sizes = [2, 32], strides = [1, 1]} : vector<2x96xf32> to vector<2x32xf32>
    %222 = vector.extract_strided_slice %203 {offsets = [0, 64], sizes = [2, 32], strides = [1, 1]} : vector<2x96xf32> to vector<2x32xf32>
    %223 = arith.mulf %212, %222 : vector<2x32xf32>
    %224 = arith.addf %221, %223 : vector<2x32xf32>
    %225 = math.tanh %224 : vector<2x32xf32>
    %cst_64 = arith.constant 1.000000e+00 : f32
    %226 = vector.broadcast %cst_64 : f32 to vector<2x32xf32>
    %227 = arith.subf %226, %220 : vector<2x32xf32>
    %228 = arith.mulf %227, %225 : vector<2x32xf32>
    %229 = arith.mulf %220, %204 : vector<2x32xf32>
    %230 = arith.addf %228, %229 : vector<2x32xf32>
    %231 = tpu.concatenate %202, %230 in 1 : vector<2x32xf32>, vector<2x32xf32> -> vector<2x64xf32>
    %c0_65 = arith.constant 0 : index
    %c0_66 = arith.constant 0 : index
    %232 = vector.load %arg7[%c0_65, %c0_66] : memref<2x64xf32, #tpu.memory_space<vmem>>, vector<2x64xf32>
    tpu.vector_store %arg7[%c0_65, %c0_66], %231 {strides = array<i32>} : memref<2x64xf32, #tpu.memory_space<vmem>>, vector<2x64xf32>,
    %233 = arith.index_cast %c2_i32_50 : i32 to index
    %c0_67 = arith.constant 0 : index
    %c0_68 = arith.constant 0 : index
    %234 = vector.load %arg5[%233, %c0_67, %c0_68] : memref<8x2x64xf32, #tpu.memory_space<vmem>>, vector<1x2x32xf32>
    %235 = vector.shape_cast %234 : vector<1x2x32xf32> to vector<2x32xf32>
    %236 = vector.shape_cast %202 : vector<2x32xf32> to vector<1x2x32xf32>
    tpu.vector_store %arg5[%233, %c0_67, %c0_68], %236 {strides = array<i32>} : memref<8x2x64xf32, #tpu.memory_space<vmem>>, vector<1x2x32xf32>,
    %237 = arith.index_cast %165 : i32 to index
    %c0_69 = arith.constant 0 : index
    %c32_70 = arith.constant 32 : index
    %238 = vector.load %arg5[%237, %c0_69, %c32_70] : memref<8x2x64xf32, #tpu.memory_space<vmem>>, vector<1x2x32xf32>
    %239 = vector.shape_cast %238 : vector<1x2x32xf32> to vector<2x32xf32>
    %240 = vector.shape_cast %230 : vector<2x32xf32> to vector<1x2x32xf32>
    tpu.vector_store %arg5[%237, %c0_69, %c32_70], %240 {strides = array<i32>} : memref<8x2x64xf32, #tpu.memory_space<vmem>>, vector<1x2x32xf32>,
    %c3_i32 = arith.constant 3 : i32
    %c7_i32_71 = arith.constant 7 : i32
    %241 = arith.subi %c7_i32_71, %c3_i32 : i32
    %c0_72 = arith.constant 0 : index
    %c0_73 = arith.constant 0 : index
    %242 = vector.load %arg7[%c0_72, %c0_73] : memref<2x64xf32, #tpu.memory_space<vmem>>, vector<2x64xf32>
    %cst_74 = arith.constant dense<0.000000e+00> : vector<2x192xf32>
    %243 = tpu.matmul %242, %9, %cst_74 {dimension_numbers = #tpu.dot_dimension_numbers<[1], [0], [0], [1], [0, 0, 1, 1], [], []>} : vector<2x64xf32>, vector<64x192xf32>, vector<2x192xf32> -> vector<2x192xf32>
    %244 = arith.addf %243, %12 : vector<2x192xf32>
    %c2_i32_75 = arith.constant 2 : i32
    %245 = arith.muli %c3_i32, %c2_i32_75 : i32
    %246 = arith.index_cast %245 : i32 to index
    %c0_76 = arith.constant 0 : index
    %247 = vector.load %arg6[%246, %c0_76] : memref<16x192xf32, #tpu.memory_space<vmem>>, vector<2x96xf32>
    %c2_i32_77 = arith.constant 2 : i32
    %248 = arith.muli %241, %c2_i32_77 : i32
    %249 = arith.index_cast %248 : i32 to index
    %c96_78 = arith.constant 96 : index
    %250 = vector.load %arg6[%249, %c96_78] : memref<16x192xf32, #tpu.memory_space<vmem>>, vector<2x96xf32>
    %251 = vector.extract_strided_slice %244 {offsets = [0, 0], sizes = [2, 96], strides = [1, 1]} : vector<2x192xf32> to vector<2x96xf32>
    %252 = vector.extract_strided_slice %242 {offsets = [0, 0], sizes = [2, 32], strides = [1, 1]} : vector<2x64xf32> to vector<2x32xf32>
    %253 = vector.extract_strided_slice %247 {offsets = [0, 0], sizes = [2, 32], strides = [1, 1]} : vector<2x96xf32> to vector<2x32xf32>
    %254 = vector.extract_strided_slice %251 {offsets = [0, 0], sizes = [2, 32], strides = [1, 1]} : vector<2x96xf32> to vector<2x32xf32>
    %255 = arith.addf %253, %254 : vector<2x32xf32>
    %256 = arith.negf %255 : vector<2x32xf32>
    %257 = math.exp %256 : vector<2x32xf32>
    %cst_79 = arith.constant 1.000000e+00 : f32
    %258 = vector.broadcast %cst_79 : f32 to vector<2x32xf32>
    %259 = arith.addf %258, %257 : vector<2x32xf32>
    %260 = arith.divf %258, %259 : vector<2x32xf32>
    %261 = vector.extract_strided_slice %247 {offsets = [0, 32], sizes = [2, 32], strides = [1, 1]} : vector<2x96xf32> to vector<2x32xf32>
    %262 = vector.extract_strided_slice %251 {offsets = [0, 32], sizes = [2, 32], strides = [1, 1]} : vector<2x96xf32> to vector<2x32xf32>
    %263 = arith.addf %261, %262 : vector<2x32xf32>
    %264 = arith.negf %263 : vector<2x32xf32>
    %265 = math.exp %264 : vector<2x32xf32>
    %cst_80 = arith.constant 1.000000e+00 : f32
    %266 = vector.broadcast %cst_80 : f32 to vector<2x32xf32>
    %267 = arith.addf %266, %265 : vector<2x32xf32>
    %268 = arith.divf %266, %267 : vector<2x32xf32>
    %269 = vector.extract_strided_slice %247 {offsets = [0, 64], sizes = [2, 32], strides = [1, 1]} : vector<2x96xf32> to vector<2x32xf32>
    %270 = vector.extract_strided_slice %251 {offsets = [0, 64], sizes = [2, 32], strides = [1, 1]} : vector<2x96xf32> to vector<2x32xf32>
    %271 = arith.mulf %260, %270 : vector<2x32xf32>
    %272 = arith.addf %269, %271 : vector<2x32xf32>
    %273 = math.tanh %272 : vector<2x32xf32>
    %cst_81 = arith.constant 1.000000e+00 : f32
    %274 = vector.broadcast %cst_81 : f32 to vector<2x32xf32>
    %275 = arith.subf %274, %268 : vector<2x32xf32>
    %276 = arith.mulf %275, %273 : vector<2x32xf32>
    %277 = arith.mulf %268, %252 : vector<2x32xf32>
    %278 = arith.addf %276, %277 : vector<2x32xf32>
    %279 = vector.extract_strided_slice %244 {offsets = [0, 96], sizes = [2, 96], strides = [1, 1]} : vector<2x192xf32> to vector<2x96xf32>
    %280 = vector.extract_strided_slice %242 {offsets = [0, 32], sizes = [2, 32], strides = [1, 1]} : vector<2x64xf32> to vector<2x32xf32>
    %281 = vector.extract_strided_slice %250 {offsets = [0, 0], sizes = [2, 32], strides = [1, 1]} : vector<2x96xf32> to vector<2x32xf32>
    %282 = vector.extract_strided_slice %279 {offsets = [0, 0], sizes = [2, 32], strides = [1, 1]} : vector<2x96xf32> to vector<2x32xf32>
    %283 = arith.addf %281, %282 : vector<2x32xf32>
    %284 = arith.negf %283 : vector<2x32xf32>
    %285 = math.exp %284 : vector<2x32xf32>
    %cst_82 = arith.constant 1.000000e+00 : f32
    %286 = vector.broadcast %cst_82 : f32 to vector<2x32xf32>
    %287 = arith.addf %286, %285 : vector<2x32xf32>
    %288 = arith.divf %286, %287 : vector<2x32xf32>
    %289 = vector.extract_strided_slice %250 {offsets = [0, 32], sizes = [2, 32], strides = [1, 1]} : vector<2x96xf32> to vector<2x32xf32>
    %290 = vector.extract_strided_slice %279 {offsets = [0, 32], sizes = [2, 32], strides = [1, 1]} : vector<2x96xf32> to vector<2x32xf32>
    %291 = arith.addf %289, %290 : vector<2x32xf32>
    %292 = arith.negf %291 : vector<2x32xf32>
    %293 = math.exp %292 : vector<2x32xf32>
    %cst_83 = arith.constant 1.000000e+00 : f32
    %294 = vector.broadcast %cst_83 : f32 to vector<2x32xf32>
    %295 = arith.addf %294, %293 : vector<2x32xf32>
    %296 = arith.divf %294, %295 : vector<2x32xf32>
    %297 = vector.extract_strided_slice %250 {offsets = [0, 64], sizes = [2, 32], strides = [1, 1]} : vector<2x96xf32> to vector<2x32xf32>
    %298 = vector.extract_strided_slice %279 {offsets = [0, 64], sizes = [2, 32], strides = [1, 1]} : vector<2x96xf32> to vector<2x32xf32>
    %299 = arith.mulf %288, %298 : vector<2x32xf32>
    %300 = arith.addf %297, %299 : vector<2x32xf32>
    %301 = math.tanh %300 : vector<2x32xf32>
    %cst_84 = arith.constant 1.000000e+00 : f32
    %302 = vector.broadcast %cst_84 : f32 to vector<2x32xf32>
    %303 = arith.subf %302, %296 : vector<2x32xf32>
    %304 = arith.mulf %303, %301 : vector<2x32xf32>
    %305 = arith.mulf %296, %280 : vector<2x32xf32>
    %306 = arith.addf %304, %305 : vector<2x32xf32>
    %307 = tpu.concatenate %278, %306 in 1 : vector<2x32xf32>, vector<2x32xf32> -> vector<2x64xf32>
    %c0_85 = arith.constant 0 : index
    %c0_86 = arith.constant 0 : index
    %308 = vector.load %arg7[%c0_85, %c0_86] : memref<2x64xf32, #tpu.memory_space<vmem>>, vector<2x64xf32>
    tpu.vector_store %arg7[%c0_85, %c0_86], %307 {strides = array<i32>} : memref<2x64xf32, #tpu.memory_space<vmem>>, vector<2x64xf32>,
    %309 = arith.index_cast %c3_i32 : i32 to index
    %c0_87 = arith.constant 0 : index
    %c0_88 = arith.constant 0 : index
    %310 = vector.load %arg5[%309, %c0_87, %c0_88] : memref<8x2x64xf32, #tpu.memory_space<vmem>>, vector<1x2x32xf32>
    %311 = vector.shape_cast %310 : vector<1x2x32xf32> to vector<2x32xf32>
    %312 = vector.shape_cast %278 : vector<2x32xf32> to vector<1x2x32xf32>
    tpu.vector_store %arg5[%309, %c0_87, %c0_88], %312 {strides = array<i32>} : memref<8x2x64xf32, #tpu.memory_space<vmem>>, vector<1x2x32xf32>,
    %313 = arith.index_cast %241 : i32 to index
    %c0_89 = arith.constant 0 : index
    %c32_90 = arith.constant 32 : index
    %314 = vector.load %arg5[%313, %c0_89, %c32_90] : memref<8x2x64xf32, #tpu.memory_space<vmem>>, vector<1x2x32xf32>
    %315 = vector.shape_cast %314 : vector<1x2x32xf32> to vector<2x32xf32>
    %316 = vector.shape_cast %306 : vector<2x32xf32> to vector<1x2x32xf32>
    tpu.vector_store %arg5[%313, %c0_89, %c32_90], %316 {strides = array<i32>} : memref<8x2x64xf32, #tpu.memory_space<vmem>>, vector<1x2x32xf32>,
    %c4_i32 = arith.constant 4 : i32
    %c7_i32_91 = arith.constant 7 : i32
    %317 = arith.subi %c7_i32_91, %c4_i32 : i32
    %c0_92 = arith.constant 0 : index
    %c0_93 = arith.constant 0 : index
    %318 = vector.load %arg7[%c0_92, %c0_93] : memref<2x64xf32, #tpu.memory_space<vmem>>, vector<2x64xf32>
    %cst_94 = arith.constant dense<0.000000e+00> : vector<2x192xf32>
    %319 = tpu.matmul %318, %9, %cst_94 {dimension_numbers = #tpu.dot_dimension_numbers<[1], [0], [0], [1], [0, 0, 1, 1], [], []>} : vector<2x64xf32>, vector<64x192xf32>, vector<2x192xf32> -> vector<2x192xf32>
    %320 = arith.addf %319, %12 : vector<2x192xf32>
    %c2_i32_95 = arith.constant 2 : i32
    %321 = arith.muli %c4_i32, %c2_i32_95 : i32
    %322 = arith.index_cast %321 : i32 to index
    %c0_96 = arith.constant 0 : index
    %323 = vector.load %arg6[%322, %c0_96] : memref<16x192xf32, #tpu.memory_space<vmem>>, vector<2x96xf32>
    %c2_i32_97 = arith.constant 2 : i32
    %324 = arith.muli %317, %c2_i32_97 : i32
    %325 = arith.index_cast %324 : i32 to index
    %c96_98 = arith.constant 96 : index
    %326 = vector.load %arg6[%325, %c96_98] : memref<16x192xf32, #tpu.memory_space<vmem>>, vector<2x96xf32>
    %327 = vector.extract_strided_slice %320 {offsets = [0, 0], sizes = [2, 96], strides = [1, 1]} : vector<2x192xf32> to vector<2x96xf32>
    %328 = vector.extract_strided_slice %318 {offsets = [0, 0], sizes = [2, 32], strides = [1, 1]} : vector<2x64xf32> to vector<2x32xf32>
    %329 = vector.extract_strided_slice %323 {offsets = [0, 0], sizes = [2, 32], strides = [1, 1]} : vector<2x96xf32> to vector<2x32xf32>
    %330 = vector.extract_strided_slice %327 {offsets = [0, 0], sizes = [2, 32], strides = [1, 1]} : vector<2x96xf32> to vector<2x32xf32>
    %331 = arith.addf %329, %330 : vector<2x32xf32>
    %332 = arith.negf %331 : vector<2x32xf32>
    %333 = math.exp %332 : vector<2x32xf32>
    %cst_99 = arith.constant 1.000000e+00 : f32
    %334 = vector.broadcast %cst_99 : f32 to vector<2x32xf32>
    %335 = arith.addf %334, %333 : vector<2x32xf32>
    %336 = arith.divf %334, %335 : vector<2x32xf32>
    %337 = vector.extract_strided_slice %323 {offsets = [0, 32], sizes = [2, 32], strides = [1, 1]} : vector<2x96xf32> to vector<2x32xf32>
    %338 = vector.extract_strided_slice %327 {offsets = [0, 32], sizes = [2, 32], strides = [1, 1]} : vector<2x96xf32> to vector<2x32xf32>
    %339 = arith.addf %337, %338 : vector<2x32xf32>
    %340 = arith.negf %339 : vector<2x32xf32>
    %341 = math.exp %340 : vector<2x32xf32>
    %cst_100 = arith.constant 1.000000e+00 : f32
    %342 = vector.broadcast %cst_100 : f32 to vector<2x32xf32>
    %343 = arith.addf %342, %341 : vector<2x32xf32>
    %344 = arith.divf %342, %343 : vector<2x32xf32>
    %345 = vector.extract_strided_slice %323 {offsets = [0, 64], sizes = [2, 32], strides = [1, 1]} : vector<2x96xf32> to vector<2x32xf32>
    %346 = vector.extract_strided_slice %327 {offsets = [0, 64], sizes = [2, 32], strides = [1, 1]} : vector<2x96xf32> to vector<2x32xf32>
    %347 = arith.mulf %336, %346 : vector<2x32xf32>
    %348 = arith.addf %345, %347 : vector<2x32xf32>
    %349 = math.tanh %348 : vector<2x32xf32>
    %cst_101 = arith.constant 1.000000e+00 : f32
    %350 = vector.broadcast %cst_101 : f32 to vector<2x32xf32>
    %351 = arith.subf %350, %344 : vector<2x32xf32>
    %352 = arith.mulf %351, %349 : vector<2x32xf32>
    %353 = arith.mulf %344, %328 : vector<2x32xf32>
    %354 = arith.addf %352, %353 : vector<2x32xf32>
    %355 = vector.extract_strided_slice %320 {offsets = [0, 96], sizes = [2, 96], strides = [1, 1]} : vector<2x192xf32> to vector<2x96xf32>
    %356 = vector.extract_strided_slice %318 {offsets = [0, 32], sizes = [2, 32], strides = [1, 1]} : vector<2x64xf32> to vector<2x32xf32>
    %357 = vector.extract_strided_slice %326 {offsets = [0, 0], sizes = [2, 32], strides = [1, 1]} : vector<2x96xf32> to vector<2x32xf32>
    %358 = vector.extract_strided_slice %355 {offsets = [0, 0], sizes = [2, 32], strides = [1, 1]} : vector<2x96xf32> to vector<2x32xf32>
    %359 = arith.addf %357, %358 : vector<2x32xf32>
    %360 = arith.negf %359 : vector<2x32xf32>
    %361 = math.exp %360 : vector<2x32xf32>
    %cst_102 = arith.constant 1.000000e+00 : f32
    %362 = vector.broadcast %cst_102 : f32 to vector<2x32xf32>
    %363 = arith.addf %362, %361 : vector<2x32xf32>
    %364 = arith.divf %362, %363 : vector<2x32xf32>
    %365 = vector.extract_strided_slice %326 {offsets = [0, 32], sizes = [2, 32], strides = [1, 1]} : vector<2x96xf32> to vector<2x32xf32>
    %366 = vector.extract_strided_slice %355 {offsets = [0, 32], sizes = [2, 32], strides = [1, 1]} : vector<2x96xf32> to vector<2x32xf32>
    %367 = arith.addf %365, %366 : vector<2x32xf32>
    %368 = arith.negf %367 : vector<2x32xf32>
    %369 = math.exp %368 : vector<2x32xf32>
    %cst_103 = arith.constant 1.000000e+00 : f32
    %370 = vector.broadcast %cst_103 : f32 to vector<2x32xf32>
    %371 = arith.addf %370, %369 : vector<2x32xf32>
    %372 = arith.divf %370, %371 : vector<2x32xf32>
    %373 = vector.extract_strided_slice %326 {offsets = [0, 64], sizes = [2, 32], strides = [1, 1]} : vector<2x96xf32> to vector<2x32xf32>
    %374 = vector.extract_strided_slice %355 {offsets = [0, 64], sizes = [2, 32], strides = [1, 1]} : vector<2x96xf32> to vector<2x32xf32>
    %375 = arith.mulf %364, %374 : vector<2x32xf32>
    %376 = arith.addf %373, %375 : vector<2x32xf32>
    %377 = math.tanh %376 : vector<2x32xf32>
    %cst_104 = arith.constant 1.000000e+00 : f32
    %378 = vector.broadcast %cst_104 : f32 to vector<2x32xf32>
    %379 = arith.subf %378, %372 : vector<2x32xf32>
    %380 = arith.mulf %379, %377 : vector<2x32xf32>
    %381 = arith.mulf %372, %356 : vector<2x32xf32>
    %382 = arith.addf %380, %381 : vector<2x32xf32>
    %383 = tpu.concatenate %354, %382 in 1 : vector<2x32xf32>, vector<2x32xf32> -> vector<2x64xf32>
    %c0_105 = arith.constant 0 : index
    %c0_106 = arith.constant 0 : index
    %384 = vector.load %arg7[%c0_105, %c0_106] : memref<2x64xf32, #tpu.memory_space<vmem>>, vector<2x64xf32>
    tpu.vector_store %arg7[%c0_105, %c0_106], %383 {strides = array<i32>} : memref<2x64xf32, #tpu.memory_space<vmem>>, vector<2x64xf32>,
    %385 = arith.index_cast %c4_i32 : i32 to index
    %c0_107 = arith.constant 0 : index
    %c0_108 = arith.constant 0 : index
    %386 = vector.load %arg5[%385, %c0_107, %c0_108] : memref<8x2x64xf32, #tpu.memory_space<vmem>>, vector<1x2x32xf32>
    %387 = vector.shape_cast %386 : vector<1x2x32xf32> to vector<2x32xf32>
    %388 = vector.shape_cast %354 : vector<2x32xf32> to vector<1x2x32xf32>
    tpu.vector_store %arg5[%385, %c0_107, %c0_108], %388 {strides = array<i32>} : memref<8x2x64xf32, #tpu.memory_space<vmem>>, vector<1x2x32xf32>,
    %389 = arith.index_cast %317 : i32 to index
    %c0_109 = arith.constant 0 : index
    %c32_110 = arith.constant 32 : index
    %390 = vector.load %arg5[%389, %c0_109, %c32_110] : memref<8x2x64xf32, #tpu.memory_space<vmem>>, vector<1x2x32xf32>
    %391 = vector.shape_cast %390 : vector<1x2x32xf32> to vector<2x32xf32>
    %392 = vector.shape_cast %382 : vector<2x32xf32> to vector<1x2x32xf32>
    tpu.vector_store %arg5[%389, %c0_109, %c32_110], %392 {strides = array<i32>} : memref<8x2x64xf32, #tpu.memory_space<vmem>>, vector<1x2x32xf32>,
    %c5_i32 = arith.constant 5 : i32
    %c7_i32_111 = arith.constant 7 : i32
    %393 = arith.subi %c7_i32_111, %c5_i32 : i32
    %c0_112 = arith.constant 0 : index
    %c0_113 = arith.constant 0 : index
    %394 = vector.load %arg7[%c0_112, %c0_113] : memref<2x64xf32, #tpu.memory_space<vmem>>, vector<2x64xf32>
    %cst_114 = arith.constant dense<0.000000e+00> : vector<2x192xf32>
    %395 = tpu.matmul %394, %9, %cst_114 {dimension_numbers = #tpu.dot_dimension_numbers<[1], [0], [0], [1], [0, 0, 1, 1], [], []>} : vector<2x64xf32>, vector<64x192xf32>, vector<2x192xf32> -> vector<2x192xf32>
    %396 = arith.addf %395, %12 : vector<2x192xf32>
    %c2_i32_115 = arith.constant 2 : i32
    %397 = arith.muli %c5_i32, %c2_i32_115 : i32
    %398 = arith.index_cast %397 : i32 to index
    %c0_116 = arith.constant 0 : index
    %399 = vector.load %arg6[%398, %c0_116] : memref<16x192xf32, #tpu.memory_space<vmem>>, vector<2x96xf32>
    %c2_i32_117 = arith.constant 2 : i32
    %400 = arith.muli %393, %c2_i32_117 : i32
    %401 = arith.index_cast %400 : i32 to index
    %c96_118 = arith.constant 96 : index
    %402 = vector.load %arg6[%401, %c96_118] : memref<16x192xf32, #tpu.memory_space<vmem>>, vector<2x96xf32>
    %403 = vector.extract_strided_slice %396 {offsets = [0, 0], sizes = [2, 96], strides = [1, 1]} : vector<2x192xf32> to vector<2x96xf32>
    %404 = vector.extract_strided_slice %394 {offsets = [0, 0], sizes = [2, 32], strides = [1, 1]} : vector<2x64xf32> to vector<2x32xf32>
    %405 = vector.extract_strided_slice %399 {offsets = [0, 0], sizes = [2, 32], strides = [1, 1]} : vector<2x96xf32> to vector<2x32xf32>
    %406 = vector.extract_strided_slice %403 {offsets = [0, 0], sizes = [2, 32], strides = [1, 1]} : vector<2x96xf32> to vector<2x32xf32>
    %407 = arith.addf %405, %406 : vector<2x32xf32>
    %408 = arith.negf %407 : vector<2x32xf32>
    %409 = math.exp %408 : vector<2x32xf32>
    %cst_119 = arith.constant 1.000000e+00 : f32
    %410 = vector.broadcast %cst_119 : f32 to vector<2x32xf32>
    %411 = arith.addf %410, %409 : vector<2x32xf32>
    %412 = arith.divf %410, %411 : vector<2x32xf32>
    %413 = vector.extract_strided_slice %399 {offsets = [0, 32], sizes = [2, 32], strides = [1, 1]} : vector<2x96xf32> to vector<2x32xf32>
    %414 = vector.extract_strided_slice %403 {offsets = [0, 32], sizes = [2, 32], strides = [1, 1]} : vector<2x96xf32> to vector<2x32xf32>
    %415 = arith.addf %413, %414 : vector<2x32xf32>
    %416 = arith.negf %415 : vector<2x32xf32>
    %417 = math.exp %416 : vector<2x32xf32>
    %cst_120 = arith.constant 1.000000e+00 : f32
    %418 = vector.broadcast %cst_120 : f32 to vector<2x32xf32>
    %419 = arith.addf %418, %417 : vector<2x32xf32>
    %420 = arith.divf %418, %419 : vector<2x32xf32>
    %421 = vector.extract_strided_slice %399 {offsets = [0, 64], sizes = [2, 32], strides = [1, 1]} : vector<2x96xf32> to vector<2x32xf32>
    %422 = vector.extract_strided_slice %403 {offsets = [0, 64], sizes = [2, 32], strides = [1, 1]} : vector<2x96xf32> to vector<2x32xf32>
    %423 = arith.mulf %412, %422 : vector<2x32xf32>
    %424 = arith.addf %421, %423 : vector<2x32xf32>
    %425 = math.tanh %424 : vector<2x32xf32>
    %cst_121 = arith.constant 1.000000e+00 : f32
    %426 = vector.broadcast %cst_121 : f32 to vector<2x32xf32>
    %427 = arith.subf %426, %420 : vector<2x32xf32>
    %428 = arith.mulf %427, %425 : vector<2x32xf32>
    %429 = arith.mulf %420, %404 : vector<2x32xf32>
    %430 = arith.addf %428, %429 : vector<2x32xf32>
    %431 = vector.extract_strided_slice %396 {offsets = [0, 96], sizes = [2, 96], strides = [1, 1]} : vector<2x192xf32> to vector<2x96xf32>
    %432 = vector.extract_strided_slice %394 {offsets = [0, 32], sizes = [2, 32], strides = [1, 1]} : vector<2x64xf32> to vector<2x32xf32>
    %433 = vector.extract_strided_slice %402 {offsets = [0, 0], sizes = [2, 32], strides = [1, 1]} : vector<2x96xf32> to vector<2x32xf32>
    %434 = vector.extract_strided_slice %431 {offsets = [0, 0], sizes = [2, 32], strides = [1, 1]} : vector<2x96xf32> to vector<2x32xf32>
    %435 = arith.addf %433, %434 : vector<2x32xf32>
    %436 = arith.negf %435 : vector<2x32xf32>
    %437 = math.exp %436 : vector<2x32xf32>
    %cst_122 = arith.constant 1.000000e+00 : f32
    %438 = vector.broadcast %cst_122 : f32 to vector<2x32xf32>
    %439 = arith.addf %438, %437 : vector<2x32xf32>
    %440 = arith.divf %438, %439 : vector<2x32xf32>
    %441 = vector.extract_strided_slice %402 {offsets = [0, 32], sizes = [2, 32], strides = [1, 1]} : vector<2x96xf32> to vector<2x32xf32>
    %442 = vector.extract_strided_slice %431 {offsets = [0, 32], sizes = [2, 32], strides = [1, 1]} : vector<2x96xf32> to vector<2x32xf32>
    %443 = arith.addf %441, %442 : vector<2x32xf32>
    %444 = arith.negf %443 : vector<2x32xf32>
    %445 = math.exp %444 : vector<2x32xf32>
    %cst_123 = arith.constant 1.000000e+00 : f32
    %446 = vector.broadcast %cst_123 : f32 to vector<2x32xf32>
    %447 = arith.addf %446, %445 : vector<2x32xf32>
    %448 = arith.divf %446, %447 : vector<2x32xf32>
    %449 = vector.extract_strided_slice %402 {offsets = [0, 64], sizes = [2, 32], strides = [1, 1]} : vector<2x96xf32> to vector<2x32xf32>
    %450 = vector.extract_strided_slice %431 {offsets = [0, 64], sizes = [2, 32], strides = [1, 1]} : vector<2x96xf32> to vector<2x32xf32>
    %451 = arith.mulf %440, %450 : vector<2x32xf32>
    %452 = arith.addf %449, %451 : vector<2x32xf32>
    %453 = math.tanh %452 : vector<2x32xf32>
    %cst_124 = arith.constant 1.000000e+00 : f32
    %454 = vector.broadcast %cst_124 : f32 to vector<2x32xf32>
    %455 = arith.subf %454, %448 : vector<2x32xf32>
    %456 = arith.mulf %455, %453 : vector<2x32xf32>
    %457 = arith.mulf %448, %432 : vector<2x32xf32>
    %458 = arith.addf %456, %457 : vector<2x32xf32>
    %459 = tpu.concatenate %430, %458 in 1 : vector<2x32xf32>, vector<2x32xf32> -> vector<2x64xf32>
    %c0_125 = arith.constant 0 : index
    %c0_126 = arith.constant 0 : index
    %460 = vector.load %arg7[%c0_125, %c0_126] : memref<2x64xf32, #tpu.memory_space<vmem>>, vector<2x64xf32>
    tpu.vector_store %arg7[%c0_125, %c0_126], %459 {strides = array<i32>} : memref<2x64xf32, #tpu.memory_space<vmem>>, vector<2x64xf32>,
    %461 = arith.index_cast %c5_i32 : i32 to index
    %c0_127 = arith.constant 0 : index
    %c0_128 = arith.constant 0 : index
    %462 = vector.load %arg5[%461, %c0_127, %c0_128] : memref<8x2x64xf32, #tpu.memory_space<vmem>>, vector<1x2x32xf32>
    %463 = vector.shape_cast %462 : vector<1x2x32xf32> to vector<2x32xf32>
    %464 = vector.shape_cast %430 : vector<2x32xf32> to vector<1x2x32xf32>
    tpu.vector_store %arg5[%461, %c0_127, %c0_128], %464 {strides = array<i32>} : memref<8x2x64xf32, #tpu.memory_space<vmem>>, vector<1x2x32xf32>,
    %465 = arith.index_cast %393 : i32 to index
    %c0_129 = arith.constant 0 : index
    %c32_130 = arith.constant 32 : index
    %466 = vector.load %arg5[%465, %c0_129, %c32_130] : memref<8x2x64xf32, #tpu.memory_space<vmem>>, vector<1x2x32xf32>
    %467 = vector.shape_cast %466 : vector<1x2x32xf32> to vector<2x32xf32>
    %468 = vector.shape_cast %458 : vector<2x32xf32> to vector<1x2x32xf32>
    tpu.vector_store %arg5[%465, %c0_129, %c32_130], %468 {strides = array<i32>} : memref<8x2x64xf32, #tpu.memory_space<vmem>>, vector<1x2x32xf32>,
    %c6_i32 = arith.constant 6 : i32
    %c7_i32_131 = arith.constant 7 : i32
    %469 = arith.subi %c7_i32_131, %c6_i32 : i32
    %c0_132 = arith.constant 0 : index
    %c0_133 = arith.constant 0 : index
    %470 = vector.load %arg7[%c0_132, %c0_133] : memref<2x64xf32, #tpu.memory_space<vmem>>, vector<2x64xf32>
    %cst_134 = arith.constant dense<0.000000e+00> : vector<2x192xf32>
    %471 = tpu.matmul %470, %9, %cst_134 {dimension_numbers = #tpu.dot_dimension_numbers<[1], [0], [0], [1], [0, 0, 1, 1], [], []>} : vector<2x64xf32>, vector<64x192xf32>, vector<2x192xf32> -> vector<2x192xf32>
    %472 = arith.addf %471, %12 : vector<2x192xf32>
    %c2_i32_135 = arith.constant 2 : i32
    %473 = arith.muli %c6_i32, %c2_i32_135 : i32
    %474 = arith.index_cast %473 : i32 to index
    %c0_136 = arith.constant 0 : index
    %475 = vector.load %arg6[%474, %c0_136] : memref<16x192xf32, #tpu.memory_space<vmem>>, vector<2x96xf32>
    %c2_i32_137 = arith.constant 2 : i32
    %476 = arith.muli %469, %c2_i32_137 : i32
    %477 = arith.index_cast %476 : i32 to index
    %c96_138 = arith.constant 96 : index
    %478 = vector.load %arg6[%477, %c96_138] : memref<16x192xf32, #tpu.memory_space<vmem>>, vector<2x96xf32>
    %479 = vector.extract_strided_slice %472 {offsets = [0, 0], sizes = [2, 96], strides = [1, 1]} : vector<2x192xf32> to vector<2x96xf32>
    %480 = vector.extract_strided_slice %470 {offsets = [0, 0], sizes = [2, 32], strides = [1, 1]} : vector<2x64xf32> to vector<2x32xf32>
    %481 = vector.extract_strided_slice %475 {offsets = [0, 0], sizes = [2, 32], strides = [1, 1]} : vector<2x96xf32> to vector<2x32xf32>
    %482 = vector.extract_strided_slice %479 {offsets = [0, 0], sizes = [2, 32], strides = [1, 1]} : vector<2x96xf32> to vector<2x32xf32>
    %483 = arith.addf %481, %482 : vector<2x32xf32>
    %484 = arith.negf %483 : vector<2x32xf32>
    %485 = math.exp %484 : vector<2x32xf32>
    %cst_139 = arith.constant 1.000000e+00 : f32
    %486 = vector.broadcast %cst_139 : f32 to vector<2x32xf32>
    %487 = arith.addf %486, %485 : vector<2x32xf32>
    %488 = arith.divf %486, %487 : vector<2x32xf32>
    %489 = vector.extract_strided_slice %475 {offsets = [0, 32], sizes = [2, 32], strides = [1, 1]} : vector<2x96xf32> to vector<2x32xf32>
    %490 = vector.extract_strided_slice %479 {offsets = [0, 32], sizes = [2, 32], strides = [1, 1]} : vector<2x96xf32> to vector<2x32xf32>
    %491 = arith.addf %489, %490 : vector<2x32xf32>
    %492 = arith.negf %491 : vector<2x32xf32>
    %493 = math.exp %492 : vector<2x32xf32>
    %cst_140 = arith.constant 1.000000e+00 : f32
    %494 = vector.broadcast %cst_140 : f32 to vector<2x32xf32>
    %495 = arith.addf %494, %493 : vector<2x32xf32>
    %496 = arith.divf %494, %495 : vector<2x32xf32>
    %497 = vector.extract_strided_slice %475 {offsets = [0, 64], sizes = [2, 32], strides = [1, 1]} : vector<2x96xf32> to vector<2x32xf32>
    %498 = vector.extract_strided_slice %479 {offsets = [0, 64], sizes = [2, 32], strides = [1, 1]} : vector<2x96xf32> to vector<2x32xf32>
    %499 = arith.mulf %488, %498 : vector<2x32xf32>
    %500 = arith.addf %497, %499 : vector<2x32xf32>
    %501 = math.tanh %500 : vector<2x32xf32>
    %cst_141 = arith.constant 1.000000e+00 : f32
    %502 = vector.broadcast %cst_141 : f32 to vector<2x32xf32>
    %503 = arith.subf %502, %496 : vector<2x32xf32>
    %504 = arith.mulf %503, %501 : vector<2x32xf32>
    %505 = arith.mulf %496, %480 : vector<2x32xf32>
    %506 = arith.addf %504, %505 : vector<2x32xf32>
    %507 = vector.extract_strided_slice %472 {offsets = [0, 96], sizes = [2, 96], strides = [1, 1]} : vector<2x192xf32> to vector<2x96xf32>
    %508 = vector.extract_strided_slice %470 {offsets = [0, 32], sizes = [2, 32], strides = [1, 1]} : vector<2x64xf32> to vector<2x32xf32>
    %509 = vector.extract_strided_slice %478 {offsets = [0, 0], sizes = [2, 32], strides = [1, 1]} : vector<2x96xf32> to vector<2x32xf32>
    %510 = vector.extract_strided_slice %507 {offsets = [0, 0], sizes = [2, 32], strides = [1, 1]} : vector<2x96xf32> to vector<2x32xf32>
    %511 = arith.addf %509, %510 : vector<2x32xf32>
    %512 = arith.negf %511 : vector<2x32xf32>
    %513 = math.exp %512 : vector<2x32xf32>
    %cst_142 = arith.constant 1.000000e+00 : f32
    %514 = vector.broadcast %cst_142 : f32 to vector<2x32xf32>
    %515 = arith.addf %514, %513 : vector<2x32xf32>
    %516 = arith.divf %514, %515 : vector<2x32xf32>
    %517 = vector.extract_strided_slice %478 {offsets = [0, 32], sizes = [2, 32], strides = [1, 1]} : vector<2x96xf32> to vector<2x32xf32>
    %518 = vector.extract_strided_slice %507 {offsets = [0, 32], sizes = [2, 32], strides = [1, 1]} : vector<2x96xf32> to vector<2x32xf32>
    %519 = arith.addf %517, %518 : vector<2x32xf32>
    %520 = arith.negf %519 : vector<2x32xf32>
    %521 = math.exp %520 : vector<2x32xf32>
    %cst_143 = arith.constant 1.000000e+00 : f32
    %522 = vector.broadcast %cst_143 : f32 to vector<2x32xf32>
    %523 = arith.addf %522, %521 : vector<2x32xf32>
    %524 = arith.divf %522, %523 : vector<2x32xf32>
    %525 = vector.extract_strided_slice %478 {offsets = [0, 64], sizes = [2, 32], strides = [1, 1]} : vector<2x96xf32> to vector<2x32xf32>
    %526 = vector.extract_strided_slice %507 {offsets = [0, 64], sizes = [2, 32], strides = [1, 1]} : vector<2x96xf32> to vector<2x32xf32>
    %527 = arith.mulf %516, %526 : vector<2x32xf32>
    %528 = arith.addf %525, %527 : vector<2x32xf32>
    %529 = math.tanh %528 : vector<2x32xf32>
    %cst_144 = arith.constant 1.000000e+00 : f32
    %530 = vector.broadcast %cst_144 : f32 to vector<2x32xf32>
    %531 = arith.subf %530, %524 : vector<2x32xf32>
    %532 = arith.mulf %531, %529 : vector<2x32xf32>
    %533 = arith.mulf %524, %508 : vector<2x32xf32>
    %534 = arith.addf %532, %533 : vector<2x32xf32>
    %535 = tpu.concatenate %506, %534 in 1 : vector<2x32xf32>, vector<2x32xf32> -> vector<2x64xf32>
    %c0_145 = arith.constant 0 : index
    %c0_146 = arith.constant 0 : index
    %536 = vector.load %arg7[%c0_145, %c0_146] : memref<2x64xf32, #tpu.memory_space<vmem>>, vector<2x64xf32>
    tpu.vector_store %arg7[%c0_145, %c0_146], %535 {strides = array<i32>} : memref<2x64xf32, #tpu.memory_space<vmem>>, vector<2x64xf32>,
    %537 = arith.index_cast %c6_i32 : i32 to index
    %c0_147 = arith.constant 0 : index
    %c0_148 = arith.constant 0 : index
    %538 = vector.load %arg5[%537, %c0_147, %c0_148] : memref<8x2x64xf32, #tpu.memory_space<vmem>>, vector<1x2x32xf32>
    %539 = vector.shape_cast %538 : vector<1x2x32xf32> to vector<2x32xf32>
    %540 = vector.shape_cast %506 : vector<2x32xf32> to vector<1x2x32xf32>
    tpu.vector_store %arg5[%537, %c0_147, %c0_148], %540 {strides = array<i32>} : memref<8x2x64xf32, #tpu.memory_space<vmem>>, vector<1x2x32xf32>,
    %541 = arith.index_cast %469 : i32 to index
    %c0_149 = arith.constant 0 : index
    %c32_150 = arith.constant 32 : index
    %542 = vector.load %arg5[%541, %c0_149, %c32_150] : memref<8x2x64xf32, #tpu.memory_space<vmem>>, vector<1x2x32xf32>
    %543 = vector.shape_cast %542 : vector<1x2x32xf32> to vector<2x32xf32>
    %544 = vector.shape_cast %534 : vector<2x32xf32> to vector<1x2x32xf32>
    tpu.vector_store %arg5[%541, %c0_149, %c32_150], %544 {strides = array<i32>} : memref<8x2x64xf32, #tpu.memory_space<vmem>>, vector<1x2x32xf32>,
    %c7_i32_151 = arith.constant 7 : i32
    %c7_i32_152 = arith.constant 7 : i32
    %545 = arith.subi %c7_i32_152, %c7_i32_151 : i32
    %c0_153 = arith.constant 0 : index
    %c0_154 = arith.constant 0 : index
    %546 = vector.load %arg7[%c0_153, %c0_154] : memref<2x64xf32, #tpu.memory_space<vmem>>, vector<2x64xf32>
    %cst_155 = arith.constant dense<0.000000e+00> : vector<2x192xf32>
    %547 = tpu.matmul %546, %9, %cst_155 {dimension_numbers = #tpu.dot_dimension_numbers<[1], [0], [0], [1], [0, 0, 1, 1], [], []>} : vector<2x64xf32>, vector<64x192xf32>, vector<2x192xf32> -> vector<2x192xf32>
    %548 = arith.addf %547, %12 : vector<2x192xf32>
    %c2_i32_156 = arith.constant 2 : i32
    %549 = arith.muli %c7_i32_151, %c2_i32_156 : i32
    %550 = arith.index_cast %549 : i32 to index
    %c0_157 = arith.constant 0 : index
    %551 = vector.load %arg6[%550, %c0_157] : memref<16x192xf32, #tpu.memory_space<vmem>>, vector<2x96xf32>
    %c2_i32_158 = arith.constant 2 : i32
    %552 = arith.muli %545, %c2_i32_158 : i32
    %553 = arith.index_cast %552 : i32 to index
    %c96_159 = arith.constant 96 : index
    %554 = vector.load %arg6[%553, %c96_159] : memref<16x192xf32, #tpu.memory_space<vmem>>, vector<2x96xf32>
    %555 = vector.extract_strided_slice %548 {offsets = [0, 0], sizes = [2, 96], strides = [1, 1]} : vector<2x192xf32> to vector<2x96xf32>
    %556 = vector.extract_strided_slice %546 {offsets = [0, 0], sizes = [2, 32], strides = [1, 1]} : vector<2x64xf32> to vector<2x32xf32>
    %557 = vector.extract_strided_slice %551 {offsets = [0, 0], sizes = [2, 32], strides = [1, 1]} : vector<2x96xf32> to vector<2x32xf32>
    %558 = vector.extract_strided_slice %555 {offsets = [0, 0], sizes = [2, 32], strides = [1, 1]} : vector<2x96xf32> to vector<2x32xf32>
    %559 = arith.addf %557, %558 : vector<2x32xf32>
    %560 = arith.negf %559 : vector<2x32xf32>
    %561 = math.exp %560 : vector<2x32xf32>
    %cst_160 = arith.constant 1.000000e+00 : f32
    %562 = vector.broadcast %cst_160 : f32 to vector<2x32xf32>
    %563 = arith.addf %562, %561 : vector<2x32xf32>
    %564 = arith.divf %562, %563 : vector<2x32xf32>
    %565 = vector.extract_strided_slice %551 {offsets = [0, 32], sizes = [2, 32], strides = [1, 1]} : vector<2x96xf32> to vector<2x32xf32>
    %566 = vector.extract_strided_slice %555 {offsets = [0, 32], sizes = [2, 32], strides = [1, 1]} : vector<2x96xf32> to vector<2x32xf32>
    %567 = arith.addf %565, %566 : vector<2x32xf32>
    %568 = arith.negf %567 : vector<2x32xf32>
    %569 = math.exp %568 : vector<2x32xf32>
    %cst_161 = arith.constant 1.000000e+00 : f32
    %570 = vector.broadcast %cst_161 : f32 to vector<2x32xf32>
    %571 = arith.addf %570, %569 : vector<2x32xf32>
    %572 = arith.divf %570, %571 : vector<2x32xf32>
    %573 = vector.extract_strided_slice %551 {offsets = [0, 64], sizes = [2, 32], strides = [1, 1]} : vector<2x96xf32> to vector<2x32xf32>
    %574 = vector.extract_strided_slice %555 {offsets = [0, 64], sizes = [2, 32], strides = [1, 1]} : vector<2x96xf32> to vector<2x32xf32>
    %575 = arith.mulf %564, %574 : vector<2x32xf32>
    %576 = arith.addf %573, %575 : vector<2x32xf32>
    %577 = math.tanh %576 : vector<2x32xf32>
    %cst_162 = arith.constant 1.000000e+00 : f32
    %578 = vector.broadcast %cst_162 : f32 to vector<2x32xf32>
    %579 = arith.subf %578, %572 : vector<2x32xf32>
    %580 = arith.mulf %579, %577 : vector<2x32xf32>
    %581 = arith.mulf %572, %556 : vector<2x32xf32>
    %582 = arith.addf %580, %581 : vector<2x32xf32>
    %583 = vector.extract_strided_slice %548 {offsets = [0, 96], sizes = [2, 96], strides = [1, 1]} : vector<2x192xf32> to vector<2x96xf32>
    %584 = vector.extract_strided_slice %546 {offsets = [0, 32], sizes = [2, 32], strides = [1, 1]} : vector<2x64xf32> to vector<2x32xf32>
    %585 = vector.extract_strided_slice %554 {offsets = [0, 0], sizes = [2, 32], strides = [1, 1]} : vector<2x96xf32> to vector<2x32xf32>
    %586 = vector.extract_strided_slice %583 {offsets = [0, 0], sizes = [2, 32], strides = [1, 1]} : vector<2x96xf32> to vector<2x32xf32>
    %587 = arith.addf %585, %586 : vector<2x32xf32>
    %588 = arith.negf %587 : vector<2x32xf32>
    %589 = math.exp %588 : vector<2x32xf32>
    %cst_163 = arith.constant 1.000000e+00 : f32
    %590 = vector.broadcast %cst_163 : f32 to vector<2x32xf32>
    %591 = arith.addf %590, %589 : vector<2x32xf32>
    %592 = arith.divf %590, %591 : vector<2x32xf32>
    %593 = vector.extract_strided_slice %554 {offsets = [0, 32], sizes = [2, 32], strides = [1, 1]} : vector<2x96xf32> to vector<2x32xf32>
    %594 = vector.extract_strided_slice %583 {offsets = [0, 32], sizes = [2, 32], strides = [1, 1]} : vector<2x96xf32> to vector<2x32xf32>
    %595 = arith.addf %593, %594 : vector<2x32xf32>
    %596 = arith.negf %595 : vector<2x32xf32>
    %597 = math.exp %596 : vector<2x32xf32>
    %cst_164 = arith.constant 1.000000e+00 : f32
    %598 = vector.broadcast %cst_164 : f32 to vector<2x32xf32>
    %599 = arith.addf %598, %597 : vector<2x32xf32>
    %600 = arith.divf %598, %599 : vector<2x32xf32>
    %601 = vector.extract_strided_slice %554 {offsets = [0, 64], sizes = [2, 32], strides = [1, 1]} : vector<2x96xf32> to vector<2x32xf32>
    %602 = vector.extract_strided_slice %583 {offsets = [0, 64], sizes = [2, 32], strides = [1, 1]} : vector<2x96xf32> to vector<2x32xf32>
    %603 = arith.mulf %592, %602 : vector<2x32xf32>
    %604 = arith.addf %601, %603 : vector<2x32xf32>
    %605 = math.tanh %604 : vector<2x32xf32>
    %cst_165 = arith.constant 1.000000e+00 : f32
    %606 = vector.broadcast %cst_165 : f32 to vector<2x32xf32>
    %607 = arith.subf %606, %600 : vector<2x32xf32>
    %608 = arith.mulf %607, %605 : vector<2x32xf32>
    %609 = arith.mulf %600, %584 : vector<2x32xf32>
    %610 = arith.addf %608, %609 : vector<2x32xf32>
    %611 = tpu.concatenate %582, %610 in 1 : vector<2x32xf32>, vector<2x32xf32> -> vector<2x64xf32>
    %c0_166 = arith.constant 0 : index
    %c0_167 = arith.constant 0 : index
    %612 = vector.load %arg7[%c0_166, %c0_167] : memref<2x64xf32, #tpu.memory_space<vmem>>, vector<2x64xf32>
    tpu.vector_store %arg7[%c0_166, %c0_167], %611 {strides = array<i32>} : memref<2x64xf32, #tpu.memory_space<vmem>>, vector<2x64xf32>,
    %613 = arith.index_cast %c7_i32_151 : i32 to index
    %c0_168 = arith.constant 0 : index
    %c0_169 = arith.constant 0 : index
    %614 = vector.load %arg5[%613, %c0_168, %c0_169] : memref<8x2x64xf32, #tpu.memory_space<vmem>>, vector<1x2x32xf32>
    %615 = vector.shape_cast %614 : vector<1x2x32xf32> to vector<2x32xf32>
    %616 = vector.shape_cast %582 : vector<2x32xf32> to vector<1x2x32xf32>
    tpu.vector_store %arg5[%613, %c0_168, %c0_169], %616 {strides = array<i32>} : memref<8x2x64xf32, #tpu.memory_space<vmem>>, vector<1x2x32xf32>,
    %617 = arith.index_cast %545 : i32 to index
    %c0_170 = arith.constant 0 : index
    %c32_171 = arith.constant 32 : index
    %618 = vector.load %arg5[%617, %c0_170, %c32_171] : memref<8x2x64xf32, #tpu.memory_space<vmem>>, vector<1x2x32xf32>
    %619 = vector.shape_cast %618 : vector<1x2x32xf32> to vector<2x32xf32>
    %620 = vector.shape_cast %610 : vector<2x32xf32> to vector<1x2x32xf32>
    tpu.vector_store %arg5[%617, %c0_170, %c32_171], %620 {strides = array<i32>} : memref<8x2x64xf32, #tpu.memory_space<vmem>>, vector<1x2x32xf32>,
    %c8_i32 = arith.constant 8 : i32
    return
  }
}

module attributes {stable_mosaic.version = 11 : i64} {
  func.func @attn_classifier_kernel(%arg0: memref<2x8x64xf32, #tpu.memory_space<vmem>>, %arg1: memref<2x8xf32, #tpu.memory_space<vmem>>, %arg2: memref<1x64xf32, #tpu.memory_space<vmem>>, %arg3: memref<1x1xf32, #tpu.memory_space<vmem>>, %arg4: memref<64x4xf32, #tpu.memory_space<vmem>>, %arg5: memref<1x4xf32, #tpu.memory_space<vmem>>, %arg6: memref<2x4xf32, #tpu.memory_space<vmem>>, %arg7: memref<2x8xf32, #tpu.memory_space<vmem>>) attributes {dimension_semantics = [], scalar_prefetch = 0 : i64, scratch_operands = 0 : i64, tpu.core_type = #tpu.core_type<tc>} {
    %c0 = arith.constant 0 : index
    %c0_0 = arith.constant 0 : index
    %c0_1 = arith.constant 0 : index
    %0 = vector.load %arg0[%c0, %c0_0, %c0_1] : memref<2x8x64xf32, #tpu.memory_space<vmem>>, vector<2x8x64xf32>
    %c0_2 = arith.constant 0 : index
    %c0_3 = arith.constant 0 : index
    %1 = vector.load %arg2[%c0_2, %c0_3] : memref<1x64xf32, #tpu.memory_space<vmem>>, vector<1x64xf32>
    %2 = vector.shape_cast %1 : vector<1x64xf32> to vector<1x1x64xf32>
    %3 = vector.broadcast %2 : vector<1x1x64xf32> to vector<2x8x64xf32>
    %4 = arith.mulf %0, %3 : vector<2x8x64xf32>
    %cst = arith.constant dense<0.000000e+00> : vector<2x8xf32>
    %5 = vector.multi_reduction <add>, %4, %cst [2] : vector<2x8x64xf32> to vector<2x8xf32>
    %c0_4 = arith.constant 0 : index
    %c0_5 = arith.constant 0 : index
    %6 = vector.load %arg3[%c0_4, %c0_5] : memref<1x1xf32, #tpu.memory_space<vmem>>, vector<1x1xf32>
    %7 = vector.extract %6[0, 0] : f32 from vector<1x1xf32>
    %8 = vector.broadcast %7 : f32 to vector<2x8xf32>
    %9 = arith.addf %5, %8 : vector<2x8xf32>
    %c0_6 = arith.constant 0 : index
    %c0_7 = arith.constant 0 : index
    %10 = vector.load %arg1[%c0_6, %c0_7] : memref<2x8xf32, #tpu.memory_space<vmem>>, vector<2x8xf32>
    %cst_8 = arith.constant 0.000000e+00 : f32
    %11 = vector.broadcast %cst_8 : f32 to vector<2x8xf32>
    %12 = arith.cmpf ogt, %10, %11 : vector<2x8xf32>
    %cst_9 = arith.constant -1.000000e+30 : f32
    %13 = vector.broadcast %cst_9 : f32 to vector<2x8xf32>
    %14 = arith.select %12, %9, %13 : vector<2x8xi1>, vector<2x8xf32>
    %cst_10 = arith.constant dense<0xFF800000> : vector<2xf32>
    %15 = vector.multi_reduction <maximumf>, %14, %cst_10 [1] : vector<2x8xf32> to vector<2xf32>
    %16 = vector.shape_cast %15 : vector<2xf32> to vector<2x1xf32>
    %17 = vector.broadcast %16 : vector<2x1xf32> to vector<2x8xf32>
    %18 = arith.subf %14, %17 : vector<2x8xf32>
    %19 = math.exp %18 : vector<2x8xf32>
    %cst_11 = arith.constant dense<0.000000e+00> : vector<2xf32>
    %20 = vector.multi_reduction <add>, %19, %cst_11 [1] : vector<2x8xf32> to vector<2xf32>
    %21 = vector.shape_cast %20 : vector<2xf32> to vector<2x1xf32>
    %22 = vector.broadcast %21 : vector<2x1xf32> to vector<2x8xf32>
    %23 = arith.divf %19, %22 : vector<2x8xf32>
    %c0_12 = arith.constant 0 : index
    %c0_13 = arith.constant 0 : index
    %24 = vector.load %arg7[%c0_12, %c0_13] : memref<2x8xf32, #tpu.memory_space<vmem>>, vector<2x8xf32>
    tpu.vector_store %arg7[%c0_12, %c0_13], %23 {strides = array<i32>} : memref<2x8xf32, #tpu.memory_space<vmem>>, vector<2x8xf32>,
    %25 = vector.shape_cast %23 : vector<2x8xf32> to vector<2x1x8xf32>
    "tpu.trace_start"() <{level = 10 : i32, message = "bqt,bth->bqh"}> : () -> ()
    %cst_14 = arith.constant dense<0.000000e+00> : vector<2x1x64xf32>
    %26 = tpu.matmul %25, %0, %cst_14 {dimension_numbers = #tpu.dot_dimension_numbers<[2], [1], [1], [2], [0, 0, 0, 1, 1, 2], [0], [0]>} : vector<2x1x8xf32>, vector<2x8x64xf32>, vector<2x1x64xf32> -> vector<2x1x64xf32>
    "tpu.trace_stop"() : () -> ()
    %27 = vector.shape_cast %26 : vector<2x1x64xf32> to vector<2x64xf32>
    %c0_15 = arith.constant 0 : index
    %c0_16 = arith.constant 0 : index
    %28 = vector.load %arg4[%c0_15, %c0_16] : memref<64x4xf32, #tpu.memory_space<vmem>>, vector<64x4xf32>
    %cst_17 = arith.constant dense<0.000000e+00> : vector<2x4xf32>
    %29 = tpu.matmul %27, %28, %cst_17 {dimension_numbers = #tpu.dot_dimension_numbers<[1], [0], [0], [1], [0, 0, 1, 1], [], []>} : vector<2x64xf32>, vector<64x4xf32>, vector<2x4xf32> -> vector<2x4xf32>
    %c0_18 = arith.constant 0 : index
    %c0_19 = arith.constant 0 : index
    %30 = vector.load %arg5[%c0_18, %c0_19] : memref<1x4xf32, #tpu.memory_space<vmem>>, vector<1x4xf32>
    %31 = vector.broadcast %30 : vector<1x4xf32> to vector<2x4xf32>
    %32 = arith.addf %29, %31 : vector<2x4xf32>
    %c0_20 = arith.constant 0 : index
    %c0_21 = arith.constant 0 : index
    %33 = vector.load %arg6[%c0_20, %c0_21] : memref<2x4xf32, #tpu.memory_space<vmem>>, vector<2x4xf32>
    tpu.vector_store %arg6[%c0_20, %c0_21], %32 {strides = array<i32>} : memref<2x4xf32, #tpu.memory_space<vmem>>, vector<2x4xf32>,
    return
  }
}

</mosaic_0001>

<bundles_post_ra>
// kernel: nlp_classifier_forward.5
= control target key start
LH: loop header
LB: loop body
LE: loop exit
PB: predicated region body
PF: predicated region fallthrough
CT: control target
= control target key end

     0   :  { %s582_s0 = inlined_call_operand.vmem [shape: f32[2,8,64], index: 0, kind: input, shape index: {}]   ;;  %s583_s1 = inlined_call_operand.vmem [shape: f32[2,8], index: 1, kind: input, shape index: {}]   ;;  %s584_s2 = inlined_call_operand.vmem [shape: f32[1,64], index: 2, kind: input, shape index: {}]   ;;  %s585_s3 = inlined_call_operand.<no memory space> [shape: f32[1,1], index: 3, kind: input, shape index: {}]   ;;  %s586_s4 = inlined_call_operand.vmem [shape: f32[64,4], index: 4, kind: input, shape index: {}]   ;;  %s587_s5 = inlined_call_operand.vmem [shape: f32[1,4], index: 5, kind: input, shape index: {}]   ;;  %s588_s6 = inlined_call_operand.hbm [shape: f32[2,4], index: 6, kind: output, shape index: {0}]   ;;  %s589_s7 = inlined_call_operand.hbm [shape: f32[2,8], index: 7, kind: output, shape index: {1}]  }
   0x1   :  { %v13_v0 = vstv %s585_s3 }
   0x2   :  { %14 = vst [vmem:[#allocation2] sm:$0x1] %v13_v0 }
   0x3   :  { %15 = vsyncpa [#allocation4], 0  ;;  %v29_v1 = vld [vmem:[%s582_s0] sm:$0xff]  ;;  %vm40_vm0 = vcmask 523264   ;;  %v531_v3 = vld [vmem:[%s582_s0 + $0x8] sm:$0xff] }
   0x4   :  { %v372_v2 = vld [vmem:[%s584_s2] ss:$0 sm:$0xff] }
   0x5   :  { %v38_v4 = vmul.f32 %v372_v2, %v29_v1  ;;  %v39_v5 = vmul.f32 %v372_v2, %v531_v3 }
   0x9   :  { %v47_v6 = vld [vmem:[#allocation2] sm:$0x1] }
   0xa   :  { %16 = vsyncpa [#allocation6], 0  ;;  %419 = vpush %v47_v6  ;;  %v41_v7 = vsel %vm40_vm0, %v38_v4, 0.0  ;;  %v44_v8 = vsel %vm40_vm0, %v39_v5, 0.0  ;;  %v56_v9 = vlaneseq  ;;  %v52_v17 = vld [vmem:[%s583_s1] sm:$0x3] }
   0xb   :  { %42 = vadd.xlane.f32.xlu0 %v41_v7  ;;  %vm66_vm1 = vcmask 1041409   ;;  %vm53_vm2 = vcmp.gt.f32.partialorder %v52_v17, 0.0  ;;  %vm70_vm3 = vcmask 58368   ;;  %v474_v29 = vmov 0.0   ;;  %v258_v30 = vld [vmem:[%s586_s4 + $0x38] sm:$0xff]  ;;  %v257_v31 = vld [vmem:[%s586_s4 + $0x30] sm:$0xff] }
   0xc   :  { %v57_v10 = vand.u32 127, %v56_v9  ;;  %v59_v11 = vshrl.u32 %v56_v9, 7  ;;  %390 = vmatprep.subr.mxu1 %v474_v29  ;;  %vm475_vm4 = vmmov 0   ;;  %400 = vmatprep.subr.mxu0 %v474_v29  ;;  %v256_v32 = vld [vmem:[%s586_s4 + $0x28] sm:$0xff]  ;;  %v255_v33 = vld [vmem:[%s586_s4 + $0x20] sm:$0xff]  ;;  %vm106_vm5 = vcmask 64512  }
   0xd   :  { %392 = vmatprep.mubr.msk.f32.mxu1 %vm475_vm4, %v474_v29  ;;  %391 = vmatpush3.msra.mxu1 %v29_v1  ;;  %v476_v35 = vmov 1966171168   ;;  %v254_v45 = vld [vmem:[%s586_s4 + $0x18] sm:$0xff]  ;;  %v253_v46 = vld [vmem:[%s586_s4 + $0x10] sm:$0xff]  ;;  %v252_v47 = vld [vmem:[%s586_s4 + $0x8] sm:$0xff]  ;;  %s477_s24 = smov [#allocation5]  }
   0xe   :  { %v60_v14 = vsub.s32 %v57_v10, %v59_v11  ;;  %395 = vmatprep.subr.mxu1 %v474_v29  ;;  %416 = vmatprep.mubr.msk.f32.mxu0 %vm475_vm4, %v474_v29  ;;  %v85_v36 = vunpack.c.l.s4 %v476_v35  ;;  %v251_v48 = vld [vmem:[%s586_s4] sm:$0xff]  ;;  %s360_s25 = sshll.u32 %s477_s24, 4  ;;  %s361_s25 = int_to_ptr.vmem [resolvable:$true] %s360_s25 }
   0xf   :  { %45 = vadd.xlane.f32.xlu0 %v44_v8  ;;  %401 = vmatpush3.msra.mxu0 %v258_v30  ;;  %s430_s26 = scalar_lea.vmem %s361_s25, 32  ;;  %p435_p1 = scmp.lt.s32.totalorder %s361_s25, %s361_s25 }
  0x10   :  { %402 = vmatprep.subr.mxu0 %v474_v29  ;;  %v86_v37 = vunpack.c.0.s8 %v85_v36  ;;  %p431_p0 = scmp.ne.s32.totalorder %s361_s25, %s430_s26  ;;  %p436_p2 = scmp.lt.s32.totalorder %s430_s26, %s430_s26 }
  0x11   :  { %403 = vmatpush3.msra.mxu0 %v257_v31 }
  0x12   :  { %404 = vmatprep.subr.mxu0 %v474_v29  ;;  %v89_v38 = vsub.s32 %v86_v37, %v59_v11  ;;  %p437_p3 = por %p436_p2, %p435_p1 }
  0x13   :  { %405 = vmatpush3.msra.mxu0 %v256_v32 }
  0x14   :  { %406 = vmatprep.subr.mxu0 %v474_v29  ;;  %p438_p4 = pnand %p437_p3, %p431_p0 }
  0x15   :  { %407 = vmatpush3.msra.mxu0 %v255_v33 }
  0x16   :  { %408 = vmatprep.subr.mxu0 %v474_v29 }
  0x17   :  { %409 = vmatpush3.msra.mxu0 %v254_v45 }
  0x18   :  { %410 = vmatprep.subr.mxu0 %v474_v29 }
  0x19   :  { %411 = vmatpush3.msra.mxu0 %v253_v46 }
  0x1a   :  { %412 = vmatprep.subr.mxu0 %v474_v29 }
  0x1b   :  { %413 = vmatpush3.msra.mxu0 %v252_v47 }
  0x1c   :  { %414 = vmatprep.subr.mxu0 %v474_v29 }
  0x1d   :  { %415 = vmatpush3.msra.mxu0 %v251_v48 }
  0x3b   :  { %s420_s2 = spop %419 }
  0x3c   :  { %v49_v12 = vstv %s420_s2 }
  0x94   :  { %v43_v13 = vpop.xlane.xlu0 %42 }
  0x95   :  { %v50_v15 = vadd.f32 %v49_v12, %v43_v13 }
  0x97   :  { %v61_v19 = vrot.slane %v50_v15, %v60_v14 }
  0x98   :  { %v46_v16 = vpop.xlane.xlu0 %45 }
  0x99   :  { %v51_v18 = vadd.f32 %v49_v12, %v46_v16 }
  0x9b   :  { %v65_v20 = vrot.slane %v51_v18, %v60_v14 }
  0x9d   :  { %v67_v21 = vsel %vm66_vm1, %v65_v20, %v61_v19 }
  0x9e   :  { %v69_v22 = vsel %vm53_vm2, %v67_v21, -1e+30 }
  0x9f   :  { %v71_v23 = vsel %vm70_vm3, %v69_v22, -inf }
  0xa0   :  { %72 = vmax.xlane.f32.xlu1 %v71_v23 }
 0x129   :  { %v73_v24 = vpop.xlane.xlu1 %72 }
 0x12a   :  { %v74_v25 = vsub.f32 %v69_v22, %v73_v24 }
 0x12c   :  { %v75_v26 = vmul.f32 1.442695, %v74_v25 }
 0x12e   :  { %426 = vpow2.f32 %v75_v26 }
 0x13b   :  { %v427_v27 = vpop.eup %426 }
 0x13c   :  { %v77_v28 = vsel %vm70_vm3, %v427_v27, 0.0 }
 0x13d   :  { %78 = vadd.xlane.f32.xlu1 %v77_v28 }
 0x1c6   :  { %v79_v34 = vpop.xlane.xlu1 %78 }
 0x1c7   :  { %428 = vrcp.f32 %v79_v34 }
 0x1d4   :  { %v429_v39 = vpop.eup %428 }
 0x1d5   :  { %v81_v40 = vmul.f32 %v429_v39, %v427_v27 }
 0x1d7   :  { %v90_v41 = vrot.slane %v81_v40, %v89_v38  ;;  %82 = vst.msk [vmem:[#allocation5] sm:$0x3] %vm70_vm3, %v81_v40 }
 0x1d9   :  { %v91_v42 = vcombine.high %v90_v41, %v90_v41  ;;  %v98_v43 = vrot.slane %v90_v41, %v89_v38 }
 0x1db   :  { %393 = vmatmul.mubr.msk.f32.vlgmr.msra.gmra.mxu1 %vm106_vm5, %v98_v43  ;;  %v105_v44 = vrot.slane %v91_v42, %v89_v38 }
 0x1dc   :  { %396 = vmatpush3.msra.mxu1 %v531_v3  ;;  %397 = vmatprep.mubr.msk.f32.mxu1 %vm475_vm4, %v474_v29 }
 0x1df   :  { %398 = vmatmul.mubr.msk.f32.vlgmr.msra.gmra.mxu1 %vm106_vm5, %v105_v44 }
 0x29b   :  { %v175_v49 = vpop.f32.mrf.mxu1 }
 0x29d   :  { %v394_v50 = vpop.f32.mrf.mxu1 }
 0x29f   :  { %v247_v51 = vpop.f32.mrf.mxu1 }
 0x2a0   :  { %v268_v52 = vrot.slane %v247_v51, 7 }
 0x2a1   :  { %v399_v53 = vpop.f32.mrf.mxu1 }
 0x2a2   :  { %v269_v54 = vsel %vm66_vm1, %v268_v52, %v175_v49 }
 0x2a3   :  { %417 = vmatmul.mubr.msk.f32.vlgmr.msra.gmra.mxu0 %vm40_vm0, %v269_v54 }
 0x2a4   :  { %441 = shalt.err (!%p438_p4)
}
 0x2a5   :  { %363 = dma.vmem_to_hbm [thread:$0]  %s361_s25, 32, %s589_s7, [#allocation6]   ;;  %v375_v55 = vld [vmem:[%s587_s5] ss:$0 sm:$0xff]  ;;  %vm342_vm6 = vcmask 25600  }
 0x2a6   :  { %s478_s30 = smov [#allocation3]  }
 0x2a7   :  { %s350_s8 = sshll.u32 %s478_s30, 4  ;;  %s351_s8 = int_to_ptr.vmem [resolvable:$true] %s350_s8 }
 0x2a8   :  { %s450_s2 = scalar_lea.vmem %s351_s8, 32  ;;  %p455_p6 = scmp.lt.s32.totalorder %s351_s8, %s351_s8 }
 0x2a9   :  { %p451_p5 = scmp.ne.s32.totalorder %s351_s8, %s450_s2  ;;  %p456_p7 = scmp.lt.s32.totalorder %s450_s2, %s450_s2 }
 0x2ab   :  { %p457_p8 = por %p456_p7, %p455_p6 }
 0x2ad   :  { %p458_p9 = pnand %p457_p8, %p451_p5 }
 0x363   :  { %v338_v56 = vpop.f32.mrf.mxu0 }
 0x364   :  { %v339_v57 = vadd.f32 %v375_v55, %v338_v56 }
 0x365   :  { %v418_v58 = vpop.f32.mrf.mxu0 }
 0x366   :  { %343 = vst.msk [vmem:[#allocation3] sm:$0x3] %vm342_vm6, %v339_v57 }
 0x367   :  { %461 = shalt.err (!%p458_p9)
}
 0x368   :  { %353 = dma.vmem_to_hbm [thread:$0]  %s351_s8, 32, %s588_s6, [#allocation4]  }
 0x369   :  { %470 = dma.done.wait [#allocation4], 32  }
 0x36a   :  { %471 = vsyncadd [#allocation4], 4294967264 }
 0x36b   :  { %472 = dma.done.wait [#allocation6], 32  }
 0x36c   :  { %473 = vsyncadd [#allocation6], 4294967264 }
 0x36d   :  { %370 = vsyncpa [#allocation4], 1 }
 0x36e   :  { %371 = vsyncpa [#allocation6], 1 }

// kernel: nlp_classifier_forward.3
= control target key start
LH: loop header
LB: loop body
LE: loop exit
PB: predicated region body
PF: predicated region fallthrough
CT: control target
= control target key end

     0   :  { %vm131_vm0 = vcmask 517120   ;;  %v1698_v3 = vmov 0.0   ;;  %vm42_vm1 = vcmask 261120   ;;  %vm127_vm2 = vcmask 523264   ;;  %s1701_s22 = smov 32   ;;  %s2260_s1 = inlined_call_operand.vmem [shape: f32[32,192], index: 1, kind: input, shape index: {}]   ;;  %s2261_s3 = inlined_call_operand.vmem [shape: f32[64,192], index: 3, kind: input, shape index: {}]   ;;  %s2262_s0 = inlined_call_operand.vmem [shape: f32[16,32], index: 0, kind: input, shape index: {}]   ;;  %s2263_s2 = inlined_call_operand.vmem [shape: f32[1,192], index: 2, kind: input, shape index: {}]   ;;  %s2264_s4 = inlined_call_operand.vmem [shape: f32[1,192], index: 4, kind: input, shape index: {}]   ;;  %s2265_s5 = inlined_call_operand.vmem [shape: f32[8,2,64], index: 5, kind: output, shape index: {}]  }
   0x1   :  { %v29_v0 = vld [vmem:[%s2260_s1 + $0x38] sm:$0xff]  ;;  %v28_v2 = vld [vmem:[%s2260_s1 + $0x30] sm:$0xff]  ;;  %113 = vmatprep.mubr.f32.mxu0 %v1698_v3  ;;  %132 = vst.msk [vmem:[#allocation3] sm:$0x3] %vm131_vm0, %v1698_v3  ;;  %229 = vmatprep.mubr.f32.mxu1 %v1698_v3  ;;  %v27_v5 = vld [vmem:[%s2260_s1 + $0x28] sm:$0xff]  ;;  %v32_v28 = vlaneseq  ;;  %vm320_vm3 = vcmask 254976  }
   0x2   :  { %v1738_v1 = vld [vmem:[%s2261_s3 + $0x78] sm:$0xff]  ;;  %73 = vmatprep.subr.mxu0 %v29_v0  ;;  %v1751_v4 = vld [vmem:[%s2261_s3 + $0x70] sm:$0xff]  ;;  %v1759_v6 = vld [vmem:[%s2261_s3 + $0x68] sm:$0xff]  ;;  %vm492_vm4 = vcmask 257026   ;;  %vm489_vm5 = vcmask 519170   ;;  %vm664_vm6 = vcmask 259076  }
   0x3   :  { %181 = vmatprep.subr.mxu1 %v1738_v1  ;;  %74 = vmatpush1.msra.mxu0 %v28_v2  ;;  %v26_v7 = vld [vmem:[%s2260_s1 + $0x20] sm:$0xff]  ;;  %v25_v9 = vld [vmem:[%s2260_s1 + $0x18] sm:$0xff]  ;;  %v24_v11 = vld [vmem:[%s2260_s1 + $0x10] sm:$0xff]  ;;  %v33_v29 = vshrl.u32 %v32_v28, 7  ;;  %vm661_vm7 = vcmask 521220   ;;  %vm831_vm8 = vcmask 261126  }
   0x4   :  { %182 = vmatpush1.msra.mxu1 %v1751_v4  ;;  %v1768_v8 = vld [vmem:[%s2261_s3 + $0x60] sm:$0xff]  ;;  %75 = vmatprep.subr.mxu0 %v27_v5  ;;  %v1777_v10 = vld [vmem:[%s2261_s3 + $0x58] sm:$0xff]  ;;  %v1785_v12 = vld [vmem:[%s2261_s3 + $0x50] sm:$0xff]  ;;  %vm828_vm9 = vcmask 523270   ;;  %vm498_vm10 = vcmask 521476   ;;  %vm837_vm11 = vcmask 517376  }
   0x5   :  { %183 = vmatprep.subr.mxu1 %v1759_v6  ;;  %76 = vmatpush1.msra.mxu0 %v26_v7  ;;  %v23_v13 = vld [vmem:[%s2260_s1 + $0x8] sm:$0xff]  ;;  %v22_v15 = vld [vmem:[%s2260_s1] sm:$0xff]  ;;  %v1812_v18 = vld [vmem:[%s2261_s3 + $0x38] sm:$0xff]  ;;  %v34_v30 = vsub.s32 0, %v33_v29  ;;  %v38_v33 = vsub.s32 1, %v33_v29  ;;  %vm326_vm12 = vcmask 523526  }
   0x6   :  { %184 = vmatpush1.msra.mxu1 %v1768_v8  ;;  %v1794_v14 = vld [vmem:[%s2261_s3 + $0x48] sm:$0xff]  ;;  %77 = vmatprep.subr.mxu0 %v25_v9  ;;  %v1803_v16 = vld [vmem:[%s2261_s3 + $0x40] sm:$0xff]  ;;  %v1818_v19 = vld [vmem:[%s2261_s3 + $0x30] sm:$0xff]  ;;  %vm670_vm13 = vcmask 519426  }
   0x7   :  { %185 = vmatprep.subr.mxu1 %v1777_v10  ;;  %78 = vmatpush1.msra.mxu0 %v24_v11  ;;  %v20_v17 = vld [vmem:[%s2262_s0] sm:$0xff]  ;;  %v1824_v20 = vld [vmem:[%s2261_s3 + $0x28] sm:$0xff]  ;;  %v1841_v23 = vld [vmem:[%s2261_s3 + $0x18] sm:$0xff] }
   0x8   :  { %186 = vmatpush1.msra.mxu1 %v1785_v12  ;;  %79 = vmatprep.subr.mxu0 %v23_v13  ;;  %v1831_v21 = vld [vmem:[%s2261_s3 + $0x20] sm:$0xff]  ;;  %v21_v22 = vld [vmem:[%s2262_s0 + $0x8] sm:$0xff]  ;;  %v1847_v24 = vld [vmem:[%s2261_s3 + $0x10] sm:$0xff] }
   0x9   :  { %187 = vmatprep.subr.mxu1 %v1794_v14  ;;  %80 = vmatpush1.msra.mxu0 %v22_v15  ;;  %v1854_v25 = vld [vmem:[%s2261_s3 + $0x8] sm:$0xff]  ;;  %v1862_v26 = vld [vmem:[%s2261_s3] sm:$0xff] }
   0xa   :  { %188 = vmatpush1.msra.mxu1 %v1803_v16  ;;  %1503 = vmatmul.mubr.msk.f32.vlgmr.msra.gmra.mxu0 %vm42_vm1, %v20_v17  ;;  %v1865_v27 = vld [vmem:[#allocation3] sm:$0x3] }
   0xb   :  { %189 = vmatprep.subr.mxu1 %v1812_v18  ;;  %119 = vmatprep.mubr.f32.mxu0 %v1698_v3  ;;  %v30_v31 = vld [vmem:[%s2263_s2] sm:$0x3]  ;;  %s1699_s2 = smov 64   ;;  %v303_v9 = vrot.slane %v1865_v27, 2 }
   0xc   :  { %190 = vmatpush1.msra.mxu1 %v1818_v19  ;;  %348 = vmatprep.subr.mxu0 %v1738_v1  ;;  %v35_v32 = vrot.slane %v30_v31, %v34_v30  ;;  %v39_v36 = vrot.slane %v30_v31, %v38_v33  ;;  %v149_v41 = vld [vmem:[%s2264_s4] sm:$0x3]  ;;  %s1700_s4 = smov 96  }
   0xd   :  { %191 = vmatprep.subr.mxu1 %v1824_v20  ;;  %349 = vmatpush1.msra.mxu0 %v1751_v4  ;;  %v1912_v43 = vrot.slane %v149_v41, %v38_v33  ;;  %v1916_v48 = vrot.slane %v149_v41, %v34_v30 }
   0xe   :  { %192 = vmatpush1.msra.mxu1 %v1831_v21  ;;  %1504 = vmatmul.mubr.msk.f32.gmra.mxu0 %vm42_vm1, %v21_v22 }
   0xf   :  { %193 = vmatprep.subr.mxu1 %v1841_v23  ;;  %350 = vmatprep.subr.mxu0 %v1759_v6 }
  0x10   :  { %194 = vmatpush1.msra.mxu1 %v1847_v24  ;;  %351 = vmatpush1.msra.mxu0 %v1768_v8 }
  0x11   :  { %195 = vmatprep.subr.mxu1 %v1854_v25  ;;  %352 = vmatprep.subr.mxu0 %v1777_v10 }
  0x12   :  { %196 = vmatpush1.msra.mxu1 %v1862_v26  ;;  %353 = vmatpush1.msra.mxu0 %v1785_v12 }
  0x13   :  { %1505 = vmatmul.mubr.msk.f32.vlgmr.msra.gmra.mxu1 %vm127_vm2, %v1865_v27  ;;  %354 = vmatprep.subr.mxu0 %v1794_v14 }
  0x14   :  { %396 = vmatprep.mubr.f32.mxu0 %v1698_v3  ;;  %355 = vmatpush1.msra.mxu0 %v1803_v16 }
  0x15   :  { %520 = vmatprep.subr.mxu1 %v1738_v1  ;;  %356 = vmatprep.subr.mxu0 %v1812_v18 }
  0x16   :  { %521 = vmatpush1.msra.mxu1 %v1751_v4  ;;  %357 = vmatpush1.msra.mxu0 %v1818_v19 }
  0x17   :  { %522 = vmatprep.subr.mxu1 %v1759_v6  ;;  %358 = vmatprep.subr.mxu0 %v1824_v20 }
  0x18   :  { %523 = vmatpush1.msra.mxu1 %v1768_v8  ;;  %359 = vmatpush1.msra.mxu0 %v1831_v21 }
  0x19   :  { %524 = vmatprep.subr.mxu1 %v1777_v10  ;;  %360 = vmatprep.subr.mxu0 %v1841_v23 }
  0x1a   :  { %525 = vmatpush1.msra.mxu1 %v1785_v12  ;;  %361 = vmatpush1.msra.mxu0 %v1847_v24 }
  0x1b   :  { %526 = vmatprep.subr.mxu1 %v1794_v14  ;;  %362 = vmatprep.subr.mxu0 %v1854_v25 }
  0x1c   :  { %527 = vmatpush1.msra.mxu1 %v1803_v16  ;;  %363 = vmatpush1.msra.mxu0 %v1862_v26 }
  0x1d   :  { %528 = vmatprep.subr.mxu1 %v1812_v18  ;;  %568 = vmatprep.mubr.f32.mxu1 %v1698_v3 }
  0x1e   :  { %529 = vmatpush1.msra.mxu1 %v1818_v19  ;;  %692 = vmatprep.subr.mxu0 %v1738_v1 }
  0x1f   :  { %530 = vmatprep.subr.mxu1 %v1824_v20 }
  0x20   :  { %531 = vmatpush1.msra.mxu1 %v1831_v21 }
  0x21   :  { %532 = vmatprep.subr.mxu1 %v1841_v23 }
  0x22   :  { %533 = vmatpush1.msra.mxu1 %v1847_v24 }
  0x23   :  { %534 = vmatprep.subr.mxu1 %v1854_v25 }
  0x24   :  { %535 = vmatpush1.msra.mxu1 %v1862_v26 }
  0x25   :  { %859 = vmatprep.subr.mxu1 %v1738_v1 }
  0xca   :  { %v115_v34 = vpop.f32.mrf.mxu0 }
  0xcb   :  { %v116_v35 = vadd.f32 %v115_v34, %v35_v32 }
  0xcc   :  { %v117_v37 = vpop.f32.mrf.mxu0 }
  0xcd   :  { %126 = vst [vmem:[#allocation2] sm:$0xff] %v116_v35  ;;  %v118_v38 = vadd.f32 %v117_v37, %v39_v36 }
  0xce   :  { %v121_v39 = vpop.f32.mrf.mxu0 }
  0xcf   :  { %128 = vst.msk [vmem:[#allocation2 + $0x8] sm:$0xff] %vm127_vm2, %v118_v38  ;;  %v122_v40 = vadd.f32 %v121_v39, %v35_v32 }
  0xd0   :  { %v123_v42 = vpop.f32.mrf.mxu0 }
  0xd1   :  { %129 = vst [vmem:[#allocation2 + $0x10] sm:$0xff] %v122_v40  ;;  %v124_v44 = vadd.f32 %v123_v42, %v39_v36 }
  0xd3   :  { %v231_v45 = vpop.f32.mrf.mxu1  ;;  %130 = vst.msk [vmem:[#allocation2 + $0x18] sm:$0xff] %vm127_vm2, %v124_v44 }
  0xd4   :  { %v232_v50 = vadd.f32 %v231_v45, %v1916_v48  ;;  %v236_v54 = vld [vmem:[#allocation2] sm:$0x3] }
  0xd5   :  { %v233_v46 = vpop.f32.mrf.mxu1 }
  0xd6   :  { %v234_v47 = vadd.f32 %v233_v46, %v1912_v43  ;;  %v268_v52 = vrot.slane %v232_v50, 2  ;;  %v239_v55 = vadd.f32 %v236_v54, %v232_v50 }
  0xd8   :  { %v278_v49 = vrot.slane %v234_v47, 2  ;;  %v237_v51 = vld [vmem:[#allocation2 + $0x10] sm:$0xc0]  ;;  %v1506_v57 = vmul.f32 -1.442695, %v239_v55 }
  0xd9   :  { %v270_v53 = vadd.f32 %v268_v52, %v237_v51 }
  0xda   :  { %287 = vrot.lane.b32.xlu0 %v278_v49, %s1699_s2  ;;  %v238_v11 = vld [vmem:[#allocation2 + $0x18] sm:$0xc0] }
  0xdb   :  { %v1507_v56 = vmul.f32 -1.442695, %v270_v53  ;;  %v280_v30 = vadd.f32 %v278_v49, %v238_v11 }
  0xdd   :  { %1555 = vpow2.f32 %v1507_v56  ;;  %v1508_v31 = vmul.f32 -1.442695, %v280_v30 }
  0xde   :  { %247 = vrot.lane.b32.xlu0 %v232_v50, %s1699_s2  ;;  %1557 = vpow2.f32 %v1506_v57 }
  0xea   :  { %v1556_v58 = vpop.eup %1555 }
  0xeb   :  { %v274_v59 = vadd.f32 1.0, %v1556_v58  ;;  %v1558_v60 = vpop.eup %1557 }
  0xec   :  { %v243_v61 = vadd.f32 1.0, %v1558_v60  ;;  %v403_v60 = vld [vmem:[#allocation2] sm:$0xc] }
  0xed   :  { %1559 = vrcp.f32 %v274_v59 }
  0xee   :  { %1561 = vrcp.f32 %v243_v61 }
  0xfa   :  { %v1560_v62 = vpop.eup %1559 }
  0xfb   :  { %v1562_v2 = vpop.eup %1561 }
  0xfc   :  { %v257_v41 = vsub.f32 1.0, %v1562_v2 }
 0x14c   :  { %v288_v63 = vpop.permute.xlu0 %287 }
 0x14d   :  { %v290_v0 = vmul.f32 %v1560_v62, %v288_v63  ;;  %v404_v62 = vld [vmem:[#allocation2 + $0x10] sm:$0x30] }
 0x14f   :  { %292 = vrot.lane.b32.xlu1 %v290_v0, %s1699_s2 }
 0x150   :  { %v248_v5 = vpop.permute.xlu0 %247 }
 0x151   :  { %v250_v7 = vmul.f32 %v1562_v2, %v248_v5 }
 0x153   :  { %252 = vrot.lane.b32.xlu1 %v250_v7, %s1699_s2 }
 0x157   :  { %304 = vrot.lane.b32.xlu1 %v303_v9, %s1700_s4 }
 0x15b   :  { %263 = vrot.lane.b32.xlu1 %v1865_v27, %s1701_s22 }
 0x1c1   :  { %v293_v13 = vpop.permute.xlu1 %292 }
 0x1c2   :  { %v295_v15 = vadd.f32 %v293_v13, %v238_v11 }
 0x1c4   :  { %1563 = vtanh.f32 %v295_v15 }
 0x1c5   :  { %v253_v17 = vpop.permute.xlu1 %252 }
 0x1c6   :  { %v255_v22 = vadd.f32 %v253_v17, %v236_v54 }
 0x1c8   :  { %1565 = vtanh.f32 %v255_v22 }
 0x1c9   :  { %1567 = vpow2.f32 %v1508_v31  ;;  %v305_v34 = vpop.permute.xlu1 %304 }
 0x1cd   :  { %v264_v39 = vpop.permute.xlu1 %263 }
 0x1ce   :  { %v266_v44 = vmul.f32 %v1562_v2, %v264_v39 }
 0x1d1   :  { %v1564_v28 = vpop.eup %1563 }
 0x1d2   :  { %299 = vrot.lane.b32.xlu0 %v1564_v28, %s1700_s4 }
 0x1d5   :  { %v1566_v29 = vpop.eup %1565 }
 0x1d6   :  { %259 = vrot.lane.b32.xlu0 %v1566_v29, %s1700_s4  ;;  %v1568_v32 = vpop.eup %1567 }
 0x1d7   :  { %v284_v33 = vadd.f32 1.0, %v1568_v32 }
 0x1d9   :  { %1569 = vrcp.f32 %v284_v33  ;;  %v405_v33 = vld [vmem:[#allocation2 + $0x18] sm:$0x30] }
 0x1e6   :  { %v1570_v27 = vpop.eup %1569 }
 0x1e7   :  { %v297_v35 = vsub.f32 1.0, %v1570_v27  ;;  %v307_v37 = vmul.f32 %v1570_v27, %v305_v34 }
 0x244   :  { %v300_v36 = vpop.permute.xlu0 %299 }
 0x245   :  { %v302_v38 = vmul.f32 %v300_v36, %v297_v35 }
 0x247   :  { %v1929_v40 = vadd.f32 %v307_v37, %v302_v38 }
 0x248   :  { %v260_v42 = vpop.permute.xlu0 %259 }
 0x249   :  { %v262_v45 = vmul.f32 %v260_v42, %v257_v41  ;;  %v314_v46 = vrot.slane %v1929_v40, 6 }
 0x24b   :  { %v267_v47 = vadd.f32 %v266_v44, %v262_v45  ;;  %315 = vrot.lane.b32.xlu1 %v314_v46, %s1701_s22 }
 0x24d   :  { %310 = vrot.lane.b32.xlu0 %v267_v47, %s1700_s4 }
 0x2bd   :  { %v316_v49 = vpop.permute.xlu1 %315 }
 0x2bf   :  { %v311_v50 = vpop.permute.xlu0 %310 }
 0x2c0   :  { %v318_v51 = vsel %vm42_vm1, %v311_v50, %v316_v49  ;;  %321 = vst.msk [vmem:[%s2265_s5] sm:$0x3] %vm320_vm3, %v311_v50 }
 0x2c1   :  { %319 = vst.msk [vmem:[#allocation3] sm:$0x3] %vm131_vm0, %v318_v51 }
 0x2c8   :  { %v328_v52 = vld [vmem:[#allocation3] sm:$0x3] }
 0x2c9   :  { %1510 = vmatmul.mubr.msk.f32.vlgmr.msra.gmra.mxu0 %vm127_vm2, %v328_v52  ;;  %v473_v30 = vrot.slane %v328_v52, 4  ;;  %v432_v31 = vrot.slane %v328_v52, 6 }
 0x2ca   :  { %693 = vmatpush1.msra.mxu0 %v1751_v4  ;;  %740 = vmatprep.mubr.f32.mxu0 %v1698_v3 }
 0x2cb   :  { %694 = vmatprep.subr.mxu0 %v1759_v6 }
 0x2cc   :  { %695 = vmatpush1.msra.mxu0 %v1768_v8 }
 0x2cd   :  { %696 = vmatprep.subr.mxu0 %v1777_v10 }
 0x2ce   :  { %697 = vmatpush1.msra.mxu0 %v1785_v12 }
 0x2cf   :  { %698 = vmatprep.subr.mxu0 %v1794_v14 }
 0x2d0   :  { %699 = vmatpush1.msra.mxu0 %v1803_v16 }
 0x2d1   :  { %700 = vmatprep.subr.mxu0 %v1812_v18 }
 0x2d2   :  { %701 = vmatpush1.msra.mxu0 %v1818_v19 }
 0x2d3   :  { %702 = vmatprep.subr.mxu0 %v1824_v20 }
 0x2d4   :  { %703 = vmatpush1.msra.mxu0 %v1831_v21 }
 0x2d5   :  { %704 = vmatprep.subr.mxu0 %v1841_v23 }
 0x2d6   :  { %705 = vmatpush1.msra.mxu0 %v1847_v24 }
 0x2d7   :  { %706 = vmatprep.subr.mxu0 %v1854_v25 }
 0x2d8   :  { %707 = vmatpush1.msra.mxu0 %v1862_v26 }
 0x2d9   :  { %1023 = vmatprep.subr.mxu0 %v1738_v1 }
 0x389   :  { %v398_v53 = vpop.f32.mrf.mxu0 }
 0x38a   :  { %v399_v54 = vadd.f32 %v398_v53, %v1916_v48 }
 0x38b   :  { %v400_v55 = vpop.f32.mrf.mxu0 }
 0x38c   :  { %v407_v56 = vrot.slane %v399_v54, 6  ;;  %v401_v57 = vadd.f32 %v400_v55, %v1912_v43  ;;  %v438_v59 = vrot.slane %v399_v54, 4 }
 0x38e   :  { %v448_v58 = vrot.slane %v401_v57, 4  ;;  %416 = vrot.lane.b32.xlu1 %v407_v56, %s1699_s2  ;;  %v409_v61 = vadd.f32 %v407_v56, %v403_v60  ;;  %v440_v63 = vadd.f32 %v438_v59, %v404_v62 }
 0x390   :  { %457 = vrot.lane.b32.xlu0 %v448_v58, %s1699_s2  ;;  %v1511_v0 = vmul.f32 -1.442695, %v409_v61  ;;  %v1512_v2 = vmul.f32 -1.442695, %v440_v63  ;;  %v450_v38 = vadd.f32 %v448_v58, %v405_v33 }
 0x392   :  { %1571 = vpow2.f32 %v1511_v0  ;;  %v1513_v39 = vmul.f32 -1.442695, %v450_v38 }
 0x393   :  { %1573 = vpow2.f32 %v1512_v2 }
 0x39f   :  { %v1572_v5 = vpop.eup %1571 }
 0x3a0   :  { %v1574_v7 = vpop.eup %1573  ;;  %v413_v9 = vadd.f32 1.0, %v1572_v5 }
 0x3a1   :  { %v444_v11 = vadd.f32 1.0, %v1574_v7 }
 0x3a2   :  { %1575 = vrcp.f32 %v413_v9 }
 0x3a3   :  { %1577 = vrcp.f32 %v444_v11 }
 0x3af   :  { %v1576_v13 = vpop.eup %1575 }
 0x3b0   :  { %v1578_v22 = vpop.eup %1577  ;;  %v426_v53 = vsub.f32 1.0, %v1576_v13 }
 0x400   :  { %v417_v15 = vpop.permute.xlu1 %416 }
 0x401   :  { %v419_v17 = vmul.f32 %v1576_v13, %v417_v15 }
 0x402   :  { %v458_v28 = vpop.permute.xlu0 %457 }
 0x403   :  { %v460_v29 = vmul.f32 %v1578_v22, %v458_v28  ;;  %421 = vrot.lane.b32.xlu1 %v419_v17, %s1699_s2  ;;  %v576_v17 = vld [vmem:[#allocation2 + $0x10] sm:$0xc] }
 0x405   :  { %462 = vrot.lane.b32.xlu0 %v460_v29, %s1699_s2 }
 0x407   :  { %474 = vrot.lane.b32.xlu1 %v473_v30, %s1700_s4 }
 0x40b   :  { %433 = vrot.lane.b32.xlu1 %v432_v31, %s1701_s22 }
 0x475   :  { %v422_v32 = vpop.permute.xlu1 %421 }
 0x476   :  { %v424_v35 = vadd.f32 %v422_v32, %v403_v60 }
 0x477   :  { %v463_v27 = vpop.permute.xlu0 %462 }
 0x478   :  { %v465_v34 = vadd.f32 %v463_v27, %v405_v33 }
 0x479   :  { %v475_v45 = vpop.permute.xlu1 %474 }
 0x47a   :  { %1579 = vtanh.f32 %v465_v34 }
 0x47b   :  { %1581 = vtanh.f32 %v424_v35 }
 0x47c   :  { %1583 = vpow2.f32 %v1513_v39 }
 0x47d   :  { %v434_v51 = vpop.permute.xlu1 %433 }
 0x47e   :  { %v436_v55 = vmul.f32 %v1576_v13, %v434_v51  ;;  %v575_v13 = vld [vmem:[#allocation2] sm:$0x30] }
 0x487   :  { %v1580_v36 = vpop.eup %1579 }
 0x488   :  { %469 = vrot.lane.b32.xlu0 %v1580_v36, %s1700_s4  ;;  %v1582_v37 = vpop.eup %1581 }
 0x489   :  { %v1584_v41 = vpop.eup %1583 }
 0x48a   :  { %v454_v42 = vadd.f32 1.0, %v1584_v41 }
 0x48c   :  { %428 = vrot.lane.b32.xlu0 %v1582_v37, %s1700_s4  ;;  %1585 = vrcp.f32 %v454_v42 }
 0x499   :  { %v1586_v44 = vpop.eup %1585 }
 0x49a   :  { %v467_v46 = vsub.f32 1.0, %v1586_v44  ;;  %v477_v49 = vmul.f32 %v1586_v44, %v475_v45  ;;  %v577_v44 = vld [vmem:[#allocation2 + $0x18] sm:$0xc] }
 0x4fa   :  { %v470_v47 = vpop.permute.xlu0 %469 }
 0x4fb   :  { %v472_v50 = vmul.f32 %v470_v47, %v467_v46 }
 0x4fd   :  { %v1968_v52 = vadd.f32 %v477_v49, %v472_v50 }
 0x4fe   :  { %v429_v54 = vpop.permute.xlu0 %428 }
 0x4ff   :  { %v431_v56 = vmul.f32 %v429_v54, %v426_v53  ;;  %v484_v57 = vrot.slane %v1968_v52, 2 }
 0x501   :  { %v437_v58 = vadd.f32 %v436_v55, %v431_v56  ;;  %485 = vrot.lane.b32.xlu1 %v484_v57, %s1701_s22 }
 0x503   :  { %480 = vrot.lane.b32.xlu0 %v437_v58, %s1700_s4 }
 0x573   :  { %v486_v59 = vpop.permute.xlu1 %485 }
 0x575   :  { %v481_v60 = vpop.permute.xlu0 %480 }
 0x576   :  { %v488_v61 = vsel %vm42_vm1, %v481_v60, %v486_v59  ;;  %1514 = vst.msk [vmem:[%s2265_s5] sm:$0xc] %vm492_vm4, %v481_v60 }
 0x577   :  { %490 = vst.msk [vmem:[#allocation3 - $0x2] sm:$0xc] %vm489_vm5, %v488_v61 }
 0x57e   :  { %v500_v62 = vld [vmem:[#allocation3] sm:$0x3] }
 0x57f   :  { %1516 = vmatmul.mubr.msk.f32.vlgmr.msra.gmra.mxu1 %vm127_vm2, %v500_v62  ;;  %v645_v39 = vrot.slane %v500_v62, 6  ;;  %v604_v41 = vrot.slane %v500_v62, 4 }
 0x580   :  { %860 = vmatpush1.msra.mxu1 %v1751_v4  ;;  %907 = vmatprep.mubr.f32.mxu1 %v1698_v3 }
 0x581   :  { %861 = vmatprep.subr.mxu1 %v1759_v6 }
 0x582   :  { %862 = vmatpush1.msra.mxu1 %v1768_v8 }
 0x583   :  { %863 = vmatprep.subr.mxu1 %v1777_v10 }
 0x584   :  { %864 = vmatpush1.msra.mxu1 %v1785_v12 }
 0x585   :  { %865 = vmatprep.subr.mxu1 %v1794_v14 }
 0x586   :  { %866 = vmatpush1.msra.mxu1 %v1803_v16 }
 0x587   :  { %867 = vmatprep.subr.mxu1 %v1812_v18 }
 0x588   :  { %868 = vmatpush1.msra.mxu1 %v1818_v19 }
 0x589   :  { %869 = vmatprep.subr.mxu1 %v1824_v20 }
 0x58a   :  { %870 = vmatpush1.msra.mxu1 %v1831_v21 }
 0x58b   :  { %871 = vmatprep.subr.mxu1 %v1841_v23 }
 0x58c   :  { %872 = vmatpush1.msra.mxu1 %v1847_v24 }
 0x58d   :  { %873 = vmatprep.subr.mxu1 %v1854_v25 }
 0x58e   :  { %874 = vmatpush1.msra.mxu1 %v1862_v26 }
 0x58f   :  { %1190 = vmatprep.subr.mxu1 %v1738_v1 }
 0x63f   :  { %v570_v63 = vpop.f32.mrf.mxu1 }
 0x640   :  { %v571_v0 = vadd.f32 %v570_v63, %v1916_v48 }
 0x641   :  { %v572_v2 = vpop.f32.mrf.mxu1 }
 0x642   :  { %v579_v5 = vrot.slane %v571_v0, 4  ;;  %v573_v7 = vadd.f32 %v572_v2, %v1912_v43  ;;  %v610_v11 = vrot.slane %v571_v0, 6 }
 0x644   :  { %v620_v9 = vrot.slane %v573_v7, 6  ;;  %588 = vrot.lane.b32.xlu1 %v579_v5, %s1699_s2  ;;  %v581_v15 = vadd.f32 %v579_v5, %v575_v13  ;;  %v612_v22 = vadd.f32 %v610_v11, %v576_v17 }
 0x646   :  { %629 = vrot.lane.b32.xlu0 %v620_v9, %s1699_s2  ;;  %v1517_v28 = vmul.f32 -1.442695, %v581_v15  ;;  %v1518_v29 = vmul.f32 -1.442695, %v612_v22  ;;  %v622_v51 = vadd.f32 %v620_v9, %v577_v44 }
 0x648   :  { %1587 = vpow2.f32 %v1517_v28  ;;  %v1519_v53 = vmul.f32 -1.442695, %v622_v51  ;;  %v749_v51 = vld [vmem:[#allocation2 + $0x18] sm:$0x3] }
 0x649   :  { %1589 = vpow2.f32 %v1518_v29 }
 0x655   :  { %v1588_v30 = vpop.eup %1587 }
 0x656   :  { %v1590_v31 = vpop.eup %1589  ;;  %v585_v32 = vadd.f32 1.0, %v1588_v30 }
 0x657   :  { %v616_v33 = vadd.f32 1.0, %v1590_v31 }
 0x658   :  { %1591 = vrcp.f32 %v585_v32 }
 0x659   :  { %1593 = vrcp.f32 %v616_v33  ;;  %v748_v33 = vld [vmem:[#allocation2 + $0x10] sm:$0x3] }
 0x665   :  { %v1592_v27 = vpop.eup %1591 }
 0x666   :  { %v1594_v36 = vpop.eup %1593  ;;  %v598_v0 = vsub.f32 1.0, %v1592_v27 }
 0x6b6   :  { %v589_v34 = vpop.permute.xlu1 %588 }
 0x6b7   :  { %v591_v35 = vmul.f32 %v1592_v27, %v589_v34 }
 0x6b8   :  { %v630_v37 = vpop.permute.xlu0 %629 }
 0x6b9   :  { %v632_v38 = vmul.f32 %v1594_v36, %v630_v37  ;;  %593 = vrot.lane.b32.xlu1 %v591_v35, %s1699_s2 }
 0x6bb   :  { %634 = vrot.lane.b32.xlu0 %v632_v38, %s1699_s2 }
 0x6bd   :  { %646 = vrot.lane.b32.xlu1 %v645_v39, %s1700_s4 }
 0x6c1   :  { %605 = vrot.lane.b32.xlu1 %v604_v41, %s1701_s22 }
 0x72b   :  { %v594_v42 = vpop.permute.xlu1 %593 }
 0x72c   :  { %v596_v47 = vadd.f32 %v594_v42, %v575_v13 }
 0x72d   :  { %v635_v45 = vpop.permute.xlu0 %634 }
 0x72e   :  { %v637_v46 = vadd.f32 %v635_v45, %v577_v44 }
 0x72f   :  { %v647_v57 = vpop.permute.xlu1 %646 }
 0x730   :  { %1595 = vtanh.f32 %v637_v46 }
 0x731   :  { %1597 = vtanh.f32 %v596_v47 }
 0x732   :  { %1599 = vpow2.f32 %v1519_v53 }
 0x733   :  { %v606_v62 = vpop.permute.xlu1 %605 }
 0x734   :  { %v608_v5 = vmul.f32 %v1592_v27, %v606_v62  ;;  %v747_v27 = vld [vmem:[#allocation2] sm:$0xc0] }
 0x73d   :  { %v1596_v49 = vpop.eup %1595 }
 0x73e   :  { %641 = vrot.lane.b32.xlu0 %v1596_v49, %s1700_s4  ;;  %v1598_v50 = vpop.eup %1597 }
 0x73f   :  { %v1600_v54 = vpop.eup %1599 }
 0x740   :  { %v626_v55 = vadd.f32 1.0, %v1600_v54 }
 0x742   :  { %600 = vrot.lane.b32.xlu0 %v1598_v50, %s1700_s4  ;;  %1601 = vrcp.f32 %v626_v55 }
 0x74f   :  { %v1602_v56 = vpop.eup %1601 }
 0x750   :  { %v639_v58 = vsub.f32 1.0, %v1602_v56  ;;  %v649_v60 = vmul.f32 %v1602_v56, %v647_v57 }
 0x7b0   :  { %v642_v59 = vpop.permute.xlu0 %641 }
 0x7b1   :  { %v644_v61 = vmul.f32 %v642_v59, %v639_v58 }
 0x7b3   :  { %v2007_v63 = vadd.f32 %v649_v60, %v644_v61 }
 0x7b4   :  { %v601_v2 = vpop.permute.xlu0 %600 }
 0x7b5   :  { %v603_v7 = vmul.f32 %v601_v2, %v598_v0  ;;  %v656_v9 = vrot.slane %v2007_v63, 6 }
 0x7b7   :  { %v609_v11 = vadd.f32 %v608_v5, %v603_v7  ;;  %657 = vrot.lane.b32.xlu1 %v656_v9, %s1701_s22 }
 0x7b9   :  { %652 = vrot.lane.b32.xlu0 %v609_v11, %s1700_s4 }
 0x829   :  { %v658_v13 = vpop.permute.xlu1 %657 }
 0x82b   :  { %v653_v15 = vpop.permute.xlu0 %652 }
 0x82c   :  { %v660_v17 = vsel %vm42_vm1, %v653_v15, %v658_v13  ;;  %1520 = vst.msk [vmem:[%s2265_s5] sm:$0x30] %vm664_vm6, %v653_v15 }
 0x82d   :  { %662 = vst.msk [vmem:[#allocation3 - $0x4] sm:$0x30] %vm661_vm7, %v660_v17 }
 0x834   :  { %v672_v22 = vld [vmem:[#allocation3] sm:$0x3] }
 0x835   :  { %1522 = vmatmul.mubr.msk.f32.vlgmr.msra.gmra.mxu0 %vm127_vm2, %v672_v22  ;;  %v776_v50 = vrot.slane %v672_v22, 2 }
 0x836   :  { %1024 = vmatpush1.msra.mxu0 %v1751_v4  ;;  %1071 = vmatprep.mubr.f32.mxu0 %v1698_v3 }
 0x837   :  { %1025 = vmatprep.subr.mxu0 %v1759_v6 }
 0x838   :  { %1026 = vmatpush1.msra.mxu0 %v1768_v8 }
 0x839   :  { %1027 = vmatprep.subr.mxu0 %v1777_v10 }
 0x83a   :  { %1028 = vmatpush1.msra.mxu0 %v1785_v12 }
 0x83b   :  { %1029 = vmatprep.subr.mxu0 %v1794_v14 }
 0x83c   :  { %1030 = vmatpush1.msra.mxu0 %v1803_v16 }
 0x83d   :  { %1031 = vmatprep.subr.mxu0 %v1812_v18 }
 0x83e   :  { %1032 = vmatpush1.msra.mxu0 %v1818_v19 }
 0x83f   :  { %1033 = vmatprep.subr.mxu0 %v1824_v20 }
 0x840   :  { %1034 = vmatpush1.msra.mxu0 %v1831_v21 }
 0x841   :  { %1035 = vmatprep.subr.mxu0 %v1841_v23 }
 0x842   :  { %1036 = vmatpush1.msra.mxu0 %v1847_v24 }
 0x843   :  { %1037 = vmatprep.subr.mxu0 %v1854_v25 }
 0x844   :  { %1038 = vmatpush1.msra.mxu0 %v1862_v26 }
 0x845   :  { %1357 = vmatprep.subr.mxu0 %v1738_v1 }
 0x8f5   :  { %v742_v28 = vpop.f32.mrf.mxu0 }
 0x8f6   :  { %v743_v29 = vadd.f32 %v742_v28, %v1916_v48 }
 0x8f7   :  { %v744_v30 = vpop.f32.mrf.mxu0 }
 0x8f8   :  { %v751_v31 = vrot.slane %v743_v29, 2  ;;  %v745_v32 = vadd.f32 %v744_v30, %v1912_v43  ;;  %v782_v34 = vadd.f32 %v748_v33, %v743_v29 }
 0x8fa   :  { %797 = vrot.lane.b32.xlu0 %v745_v32, %s1699_s2  ;;  %760 = vrot.lane.b32.xlu1 %v751_v31, %s1699_s2  ;;  %v753_v35 = vadd.f32 %v751_v31, %v747_v27  ;;  %v1524_v36 = vmul.f32 -1.442695, %v782_v34  ;;  %v789_v59 = vadd.f32 %v749_v51, %v745_v32 }
 0x8fc   :  { %v1523_v37 = vmul.f32 -1.442695, %v753_v35  ;;  %1603 = vpow2.f32 %v1524_v36  ;;  %v1525_v60 = vmul.f32 -1.442695, %v789_v59 }
 0x8fe   :  { %1605 = vpow2.f32 %v1523_v37 }
 0x909   :  { %v1604_v1 = vpop.eup %1603 }
 0x90a   :  { %v786_v39 = vadd.f32 1.0, %v1604_v1 }
 0x90b   :  { %v1606_v38 = vpop.eup %1605 }
 0x90c   :  { %v757_v41 = vadd.f32 1.0, %v1606_v38  ;;  %1607 = vrcp.f32 %v786_v39 }
 0x90e   :  { %1609 = vrcp.f32 %v757_v41 }
 0x919   :  { %v1608_v42 = vpop.eup %1607 }
 0x91b   :  { %v1610_v44 = vpop.eup %1609 }
 0x91c   :  { %v770_v17 = vsub.f32 1.0, %v1610_v44 }
 0x96c   :  { %v798_v45 = vpop.permute.xlu0 %797  ;;  %v761_v46 = vpop.permute.xlu1 %760 }
 0x96d   :  { %v800_v47 = vmul.f32 %v1608_v42, %v798_v45  ;;  %v763_v49 = vmul.f32 %v1610_v44, %v761_v46  ;;  %v916_v45 = vld [vmem:[#allocation2 + $0x8] sm:$0xc0] }
 0x96f   :  { %802 = vrot.lane.b32.xlu0 %v800_v47, %s1699_s2  ;;  %765 = vrot.lane.b32.xlu1 %v763_v49, %s1699_s2 }
 0x973   :  { %813 = vrot.lane.b32.xlu1 %v672_v22, %s1700_s4 }
 0x977   :  { %777 = vrot.lane.b32.xlu1 %v776_v50, %s1701_s22 }
 0x9e1   :  { %v803_v53 = vpop.permute.xlu0 %802  ;;  %v766_v54 = vpop.permute.xlu1 %765 }
 0x9e2   :  { %v805_v55 = vadd.f32 %v803_v53, %v749_v51  ;;  %v768_v56 = vadd.f32 %v766_v54, %v747_v27 }
 0x9e4   :  { %1611 = vtanh.f32 %v805_v55 }
 0x9e5   :  { %1613 = vtanh.f32 %v768_v56  ;;  %v814_v2 = vpop.permute.xlu1 %813 }
 0x9e6   :  { %1615 = vpow2.f32 %v1525_v60 }
 0x9e9   :  { %v778_v13 = vpop.permute.xlu1 %777 }
 0x9ea   :  { %v780_v28 = vmul.f32 %v1610_v44, %v778_v13 }
 0x9f1   :  { %v1612_v57 = vpop.eup %1611 }
 0x9f2   :  { %809 = vrot.lane.b32.xlu0 %v1612_v57, %s1700_s4  ;;  %v1614_v58 = vpop.eup %1613 }
 0x9f3   :  { %v1616_v61 = vpop.eup %1615 }
 0x9f4   :  { %v793_v62 = vadd.f32 1.0, %v1616_v61 }
 0x9f6   :  { %772 = vrot.lane.b32.xlu0 %v1614_v58, %s1700_s4  ;;  %1617 = vrcp.f32 %v793_v62 }
 0xa03   :  { %v1618_v0 = vpop.eup %1617 }
 0xa04   :  { %v807_v5 = vsub.f32 1.0, %v1618_v0  ;;  %v816_v9 = vmul.f32 %v1618_v0, %v814_v2 }
 0xa64   :  { %v810_v7 = vpop.permute.xlu0 %809 }
 0xa65   :  { %v812_v11 = vmul.f32 %v810_v7, %v807_v5 }
 0xa67   :  { %v2046_v15 = vadd.f32 %v816_v9, %v812_v11 }
 0xa68   :  { %v773_v22 = vpop.permute.xlu0 %772 }
 0xa69   :  { %v775_v29 = vmul.f32 %v773_v22, %v770_v17  ;;  %v823_v30 = vrot.slane %v2046_v15, 2 }
 0xa6b   :  { %v781_v31 = vadd.f32 %v780_v28, %v775_v29  ;;  %824 = vrot.lane.b32.xlu1 %v823_v30, %s1701_s22 }
 0xa6d   :  { %819 = vrot.lane.b32.xlu0 %v781_v31, %s1700_s4  ;;  %v1683_v31 = vld [vmem:[%s2261_s3 + $0x70] sm:$0xff] }
 0xadd   :  { %v825_v32 = vpop.permute.xlu1 %824 }
 0xadf   :  { %v820_v33 = vpop.permute.xlu0 %819 }
 0xae0   :  { %v827_v27 = vsel %vm42_vm1, %v820_v33, %v825_v32  ;;  %1526 = vst.msk [vmem:[%s2265_s5] sm:$0xc0] %vm831_vm8, %v820_v33  ;;  %v1684_v32 = vld [vmem:[%s2261_s3 + $0x68] sm:$0xff]  ;;  %v1685_v33 = vld [vmem:[%s2261_s3 + $0x60] sm:$0xff] }
 0xae1   :  { %829 = vst.msk [vmem:[#allocation3 - $0x6] sm:$0xc0] %vm828_vm9, %v827_v27  ;;  %v1686_v27 = vld [vmem:[%s2261_s3 + $0x58] sm:$0xff] }
 0xae8   :  { %v839_v34 = vld [vmem:[#allocation3] sm:$0x3] }
 0xae9   :  { %1528 = vmatmul.mubr.msk.f32.vlgmr.msra.gmra.mxu1 %vm127_vm2, %v839_v34  ;;  %v981_v42 = vrot.slane %v839_v34, 2 }
 0xaea   :  { %1191 = vmatpush1.msra.mxu1 %v1751_v4  ;;  %1238 = vmatprep.mubr.f32.mxu1 %v1698_v3 }
 0xaeb   :  { %1192 = vmatprep.subr.mxu1 %v1759_v6 }
 0xaec   :  { %1193 = vmatpush1.msra.mxu1 %v1768_v8 }
 0xaed   :  { %1194 = vmatprep.subr.mxu1 %v1777_v10 }
 0xaee   :  { %1195 = vmatpush1.msra.mxu1 %v1785_v12 }
 0xaef   :  { %1196 = vmatprep.subr.mxu1 %v1794_v14  ;;  %v914_v14 = vld [vmem:[#allocation2 + $0x10] sm:$0x3] }
 0xaf0   :  { %1197 = vmatpush1.msra.mxu1 %v1803_v16 }
 0xaf1   :  { %1198 = vmatprep.subr.mxu1 %v1812_v18 }
 0xaf2   :  { %1199 = vmatpush1.msra.mxu1 %v1818_v19  ;;  %v915_v19 = vld [vmem:[#allocation2] sm:$0xc0] }
 0xaf3   :  { %1200 = vmatprep.subr.mxu1 %v1824_v20 }
 0xaf4   :  { %1201 = vmatpush1.msra.mxu1 %v1831_v21 }
 0xaf5   :  { %1202 = vmatprep.subr.mxu1 %v1841_v23 }
 0xaf6   :  { %1203 = vmatpush1.msra.mxu1 %v1847_v24 }
 0xaf7   :  { %1204 = vmatprep.subr.mxu1 %v1854_v25 }
 0xaf8   :  { %1205 = vmatpush1.msra.mxu1 %v1862_v26 }
 0xba9   :  { %v909_v4 = vpop.f32.mrf.mxu1 }
 0xbaa   :  { %v910_v6 = vadd.f32 %v909_v4, %v1916_v48  ;;  %v1689_v4 = vld [vmem:[%s2261_s3 + $0x40] sm:$0xff] }
 0xbab   :  { %v911_v8 = vpop.f32.mrf.mxu1 }
 0xbac   :  { %v912_v10 = vadd.f32 %v911_v8, %v1912_v43  ;;  %925 = vrot.lane.b32.xlu1 %v910_v6, %s1699_s2  ;;  %v917_v16 = vadd.f32 %v914_v14, %v910_v6  ;;  %v946_v18 = vrot.slane %v910_v6, 2  ;;  %v1690_v6 = vld [vmem:[%s2261_s3 + $0x38] sm:$0xff]  ;;  %v1691_v8 = vld [vmem:[%s2261_s3 + $0x30] sm:$0xff] }
 0xbae   :  { %v956_v12 = vrot.slane %v912_v10, 2  ;;  %v1529_v20 = vmul.f32 -1.442695, %v917_v16  ;;  %v948_v21 = vadd.f32 %v946_v18, %v915_v19  ;;  %v1692_v10 = vld [vmem:[%s2261_s3 + $0x28] sm:$0xff]  ;;  %v1695_v16 = vld [vmem:[%s2261_s3 + $0x10] sm:$0xff]  ;;  %v1697_v19 = vld [vmem:[%s2261_s3] sm:$0xff] }
 0xbaf   :  { %v1696_v18 = vld [vmem:[%s2261_s3 + $0x8] sm:$0xff] }
 0xbb0   :  { %965 = vrot.lane.b32.xlu0 %v956_v12, %s1699_s2  ;;  %1619 = vpow2.f32 %v1529_v20  ;;  %v1530_v23 = vmul.f32 -1.442695, %v948_v21  ;;  %v958_v53 = vadd.f32 %v956_v12, %v916_v45  ;;  %v1693_v12 = vld [vmem:[%s2261_s3 + $0x20] sm:$0xff] }
 0xbb2   :  { %1621 = vpow2.f32 %v1530_v23  ;;  %v1531_v54 = vmul.f32 -1.442695, %v958_v53 }
 0xbbd   :  { %v1620_v24 = vpop.eup %1619 }
 0xbbe   :  { %v921_v25 = vadd.f32 1.0, %v1620_v24 }
 0xbbf   :  { %v1622_v26 = vpop.eup %1621 }
 0xbc0   :  { %1623 = vrcp.f32 %v921_v25  ;;  %v952_v35 = vadd.f32 1.0, %v1622_v26 }
 0xbc2   :  { %1625 = vrcp.f32 %v952_v35 }
 0xbcd   :  { %v1624_v36 = vpop.eup %1623 }
 0xbce   :  { %v935_v5 = vsub.f32 1.0, %v1624_v36 }
 0xbcf   :  { %v1626_v38 = vpop.eup %1625 }
 0xc1e   :  { %v926_v37 = vpop.permute.xlu1 %925 }
 0xc1f   :  { %v928_v1 = vmul.f32 %v1624_v36, %v926_v37 }
 0xc21   :  { %930 = vrot.lane.b32.xlu1 %v928_v1, %s1699_s2  ;;  %v1079_v1 = vld [vmem:[#allocation2] sm:$0x30] }
 0xc22   :  { %v966_v39 = vpop.permute.xlu0 %965 }
 0xc23   :  { %v968_v41 = vmul.f32 %v1626_v38, %v966_v39 }
 0xc25   :  { %970 = vrot.lane.b32.xlu0 %v968_v41, %s1699_s2  ;;  %982 = vrot.lane.b32.xlu1 %v981_v42, %s1700_s4 }
 0xc29   :  { %941 = vrot.lane.b32.xlu1 %v839_v34, %s1701_s22  ;;  %v1687_v34 = vld [vmem:[%s2261_s3 + $0x50] sm:$0xff] }
 0xc93   :  { %v931_v44 = vpop.permute.xlu1 %930 }
 0xc94   :  { %v933_v49 = vadd.f32 %v931_v44, %v914_v14  ;;  %v1694_v14 = vld [vmem:[%s2261_s3 + $0x18] sm:$0xff] }
 0xc97   :  { %v971_v46 = vpop.permute.xlu0 %970  ;;  %v983_v58 = vpop.permute.xlu1 %982 }
 0xc98   :  { %v973_v47 = vadd.f32 %v971_v46, %v916_v45 }
 0xc9a   :  { %1627 = vtanh.f32 %v973_v47 }
 0xc9b   :  { %1629 = vtanh.f32 %v933_v49  ;;  %v942_v0 = vpop.permute.xlu1 %941 }
 0xc9c   :  { %1631 = vpow2.f32 %v1531_v54  ;;  %v944_v9 = vmul.f32 %v1624_v36, %v942_v0  ;;  %v1078_v36 = vld [vmem:[#allocation2 + $0x10] sm:$0xc] }
 0xca7   :  { %v1628_v50 = vpop.eup %1627 }
 0xca8   :  { %977 = vrot.lane.b32.xlu0 %v1628_v50, %s1700_s4  ;;  %v1630_v51 = vpop.eup %1629 }
 0xca9   :  { %v1632_v55 = vpop.eup %1631 }
 0xcaa   :  { %v962_v56 = vadd.f32 1.0, %v1632_v55 }
 0xcac   :  { %937 = vrot.lane.b32.xlu0 %v1630_v51, %s1700_s4  ;;  %1633 = vrcp.f32 %v962_v56 }
 0xcb9   :  { %v1634_v57 = vpop.eup %1633 }
 0xcba   :  { %v975_v59 = vsub.f32 1.0, %v1634_v57  ;;  %v985_v61 = vmul.f32 %v1634_v57, %v983_v58  ;;  %v1080_v58 = vld [vmem:[#allocation2 + $0x8] sm:$0x30] }
 0xd1a   :  { %v978_v60 = vpop.permute.xlu0 %977 }
 0xd1b   :  { %v980_v62 = vmul.f32 %v978_v60, %v975_v59 }
 0xd1d   :  { %v2084_v2 = vadd.f32 %v985_v61, %v980_v62 }
 0xd1e   :  { %v938_v7 = vpop.permute.xlu0 %937 }
 0xd1f   :  { %v940_v11 = vmul.f32 %v938_v7, %v935_v5  ;;  %v992_v13 = vrot.slane %v2084_v2, 6 }
 0xd21   :  { %v945_v17 = vadd.f32 %v944_v9, %v940_v11  ;;  %993 = vrot.lane.b32.xlu1 %v992_v13, %s1701_s22 }
 0xd23   :  { %988 = vrot.lane.b32.xlu0 %v945_v17, %s1700_s4 }
 0xd93   :  { %v994_v22 = vpop.permute.xlu1 %993 }
 0xd95   :  { %v2089_v28 = vpop.permute.xlu0 %988 }
 0xd96   :  { %v996_v29 = vsel %vm42_vm1, %v2089_v28, %v994_v22 }
 0xd97   :  { %997 = vst.msk [vmem:[#allocation3] sm:$0x3] %vm131_vm0, %v996_v29 }
 0xd9e   :  { %v2094_v30 = vld [vmem:[#allocation3] sm:$0x3] }
 0xd9f   :  { %1534 = vmatmul.mubr.msk.f32.vlgmr.msra.gmra.mxu0 %vm127_vm2, %v2094_v30  ;;  %v1148_v55 = vrot.slane %v2094_v30, 4  ;;  %v1107_v56 = vrot.slane %v2094_v30, 6 }
 0xda0   :  { %1358 = vmatpush1.msra.mxu0 %v1683_v31  ;;  %1405 = vmatprep.mubr.f32.mxu0 %v1698_v3  ;;  %v1688_v3 = vld [vmem:[%s2261_s3 + $0x48] sm:$0xff] }
 0xda1   :  { %1359 = vmatprep.subr.mxu0 %v1684_v32 }
 0xda2   :  { %1360 = vmatpush1.msra.mxu0 %v1685_v33 }
 0xda3   :  { %1361 = vmatprep.subr.mxu0 %v1686_v27 }
 0xda4   :  { %1362 = vmatpush1.msra.mxu0 %v1687_v34 }
 0xda5   :  { %1363 = vmatprep.subr.mxu0 %v1688_v3 }
 0xda6   :  { %1364 = vmatpush1.msra.mxu0 %v1689_v4 }
 0xda7   :  { %1365 = vmatprep.subr.mxu0 %v1690_v6 }
 0xda8   :  { %1366 = vmatpush1.msra.mxu0 %v1691_v8 }
 0xda9   :  { %1367 = vmatprep.subr.mxu0 %v1692_v10 }
 0xdaa   :  { %1368 = vmatpush1.msra.mxu0 %v1693_v12 }
 0xdab   :  { %1369 = vmatprep.subr.mxu0 %v1694_v14 }
 0xdac   :  { %1370 = vmatpush1.msra.mxu0 %v1695_v16 }
 0xdad   :  { %1371 = vmatprep.subr.mxu0 %v1696_v18 }
 0xdae   :  { %1372 = vmatpush1.msra.mxu0 %v1697_v19 }
 0xe5f   :  { %v1073_v20 = vpop.f32.mrf.mxu0 }
 0xe60   :  { %v1074_v21 = vadd.f32 %v1073_v20, %v1916_v48 }
 0xe61   :  { %v1075_v23 = vpop.f32.mrf.mxu0 }
 0xe62   :  { %v1082_v24 = vrot.slane %v1074_v21, 6  ;;  %v1076_v25 = vadd.f32 %v1075_v23, %v1912_v43  ;;  %v1113_v35 = vrot.slane %v1074_v21, 4 }
 0xe64   :  { %v1123_v26 = vrot.slane %v1076_v25, 4  ;;  %1091 = vrot.lane.b32.xlu1 %v1082_v24, %s1699_s2  ;;  %v1084_v37 = vadd.f32 %v1082_v24, %v1078_v36  ;;  %v1115_v38 = vadd.f32 %v1113_v35, %v1079_v1 }
 0xe66   :  { %1132 = vrot.lane.b32.xlu0 %v1123_v26, %s1699_s2  ;;  %v1535_v39 = vmul.f32 -1.442695, %v1084_v37  ;;  %v1536_v41 = vmul.f32 -1.442695, %v1115_v38  ;;  %v1125_v5 = vadd.f32 %v1123_v26, %v1080_v58  ;;  %v1245_v26 = vld [vmem:[#allocation2 + $0x10] sm:$0x30] }
 0xe68   :  { %1635 = vpow2.f32 %v1535_v39  ;;  %v1537_v7 = vmul.f32 -1.442695, %v1125_v5 }
 0xe69   :  { %1637 = vpow2.f32 %v1536_v41 }
 0xe75   :  { %v1636_v42 = vpop.eup %1635 }
 0xe76   :  { %v1638_v44 = vpop.eup %1637  ;;  %v1088_v45 = vadd.f32 1.0, %v1636_v42 }
 0xe77   :  { %v1119_v46 = vadd.f32 1.0, %v1638_v44 }
 0xe78   :  { %1639 = vrcp.f32 %v1088_v45 }
 0xe79   :  { %1641 = vrcp.f32 %v1119_v46 }
 0xe85   :  { %v1640_v47 = vpop.eup %1639 }
 0xe86   :  { %v1642_v51 = vpop.eup %1641  ;;  %v1101_v27 = vsub.f32 1.0, %v1640_v47 }
 0xed6   :  { %v1092_v49 = vpop.permute.xlu1 %1091 }
 0xed7   :  { %v1094_v50 = vmul.f32 %v1640_v47, %v1092_v49 }
 0xed8   :  { %v1133_v53 = vpop.permute.xlu0 %1132 }
 0xed9   :  { %v1135_v54 = vmul.f32 %v1642_v51, %v1133_v53  ;;  %1096 = vrot.lane.b32.xlu1 %v1094_v50, %s1699_s2 }
 0xedb   :  { %1137 = vrot.lane.b32.xlu0 %v1135_v54, %s1699_s2 }
 0xedd   :  { %1149 = vrot.lane.b32.xlu1 %v1148_v55, %s1700_s4 }
 0xee1   :  { %1108 = vrot.lane.b32.xlu1 %v1107_v56, %s1701_s22  ;;  %v1247_v56 = vld [vmem:[#allocation2 + $0x8] sm:$0xc] }
 0xf4b   :  { %v1097_v57 = vpop.permute.xlu1 %1096 }
 0xf4c   :  { %v1099_v61 = vadd.f32 %v1097_v57, %v1078_v36  ;;  %v1246_v36 = vld [vmem:[#allocation2] sm:$0xc] }
 0xf4d   :  { %v1138_v59 = vpop.permute.xlu0 %1137 }
 0xf4e   :  { %v1140_v60 = vadd.f32 %v1138_v59, %v1080_v58 }
 0xf4f   :  { %v1150_v17 = vpop.permute.xlu1 %1149 }
 0xf50   :  { %1643 = vtanh.f32 %v1140_v60 }
 0xf51   :  { %1645 = vtanh.f32 %v1099_v61 }
 0xf52   :  { %1647 = vpow2.f32 %v1537_v7 }
 0xf53   :  { %v1109_v32 = vpop.permute.xlu1 %1108 }
 0xf54   :  { %v1111_v3 = vmul.f32 %v1640_v47, %v1109_v32 }
 0xf5d   :  { %v1644_v62 = vpop.eup %1643 }
 0xf5e   :  { %1144 = vrot.lane.b32.xlu0 %v1644_v62, %s1700_s4  ;;  %v1646_v0 = vpop.eup %1645 }
 0xf5f   :  { %v1648_v9 = vpop.eup %1647 }
 0xf60   :  { %v1129_v11 = vadd.f32 1.0, %v1648_v9 }
 0xf62   :  { %1103 = vrot.lane.b32.xlu0 %v1646_v0, %s1700_s4  ;;  %1649 = vrcp.f32 %v1129_v11 }
 0xf6f   :  { %v1650_v13 = vpop.eup %1649 }
 0xf70   :  { %v1142_v22 = vsub.f32 1.0, %v1650_v13  ;;  %v1152_v30 = vmul.f32 %v1650_v13, %v1150_v17 }
 0xfd0   :  { %v1145_v29 = vpop.permute.xlu0 %1144 }
 0xfd1   :  { %v1147_v31 = vmul.f32 %v1145_v29, %v1142_v22 }
 0xfd3   :  { %v2156_v33 = vadd.f32 %v1152_v30, %v1147_v31 }
 0xfd4   :  { %v1104_v34 = vpop.permute.xlu0 %1103 }
 0xfd5   :  { %v1106_v4 = vmul.f32 %v1104_v34, %v1101_v27  ;;  %v1159_v6 = vrot.slane %v2156_v33, 2 }
 0xfd7   :  { %v1112_v8 = vadd.f32 %v1111_v3, %v1106_v4  ;;  %1160 = vrot.lane.b32.xlu1 %v1159_v6, %s1701_s22 }
 0xfd9   :  { %1155 = vrot.lane.b32.xlu0 %v1112_v8, %s1700_s4 }
0x1049   :  { %v1161_v10 = vpop.permute.xlu1 %1160 }
0x104b   :  { %v2161_v12 = vpop.permute.xlu0 %1155 }
0x104c   :  { %v1163_v14 = vsel %vm42_vm1, %v2161_v12, %v1161_v10 }
0x104d   :  { %1164 = vst.msk [vmem:[#allocation3 - $0x2] sm:$0xc] %vm489_vm5, %v1163_v14 }
0x1054   :  { %v1170_v16 = vld [vmem:[#allocation3] sm:$0x3] }
0x1055   :  { %1540 = vmatmul.mubr.msk.f32.vlgmr.msra.gmra.mxu1 %vm127_vm2, %v1170_v16  ;;  %v1315_v53 = vrot.slane %v1170_v16, 6  ;;  %v1274_v54 = vrot.slane %v1170_v16, 4 }
0x1115   :  { %v1240_v18 = vpop.f32.mrf.mxu1 }
0x1116   :  { %v1241_v19 = vadd.f32 %v1240_v18, %v1916_v48 }
0x1117   :  { %v1242_v20 = vpop.f32.mrf.mxu1 }
0x1118   :  { %v1249_v21 = vrot.slane %v1241_v19, 4  ;;  %v1243_v23 = vadd.f32 %v1242_v20, %v1912_v43  ;;  %v1280_v25 = vrot.slane %v1241_v19, 6 }
0x111a   :  { %v1290_v24 = vrot.slane %v1243_v23, 6  ;;  %1258 = vrot.lane.b32.xlu1 %v1249_v21, %s1699_s2  ;;  %v1251_v35 = vadd.f32 %v1249_v21, %v1245_v26  ;;  %v1282_v37 = vadd.f32 %v1280_v25, %v1246_v36  ;;  %v1412_v25 = vld [vmem:[#allocation2 + $0x10] sm:$0xc0] }
0x111c   :  { %1299 = vrot.lane.b32.xlu0 %v1290_v24, %s1699_s2  ;;  %v1541_v1 = vmul.f32 -1.442695, %v1251_v35  ;;  %v1542_v38 = vmul.f32 -1.442695, %v1282_v37  ;;  %v1292_v62 = vadd.f32 %v1290_v24, %v1247_v56  ;;  %v1413_v24 = vld [vmem:[#allocation2] sm:$0x3] }
0x111e   :  { %1651 = vpow2.f32 %v1541_v1  ;;  %v1543_v0 = vmul.f32 -1.442695, %v1292_v62 }
0x111f   :  { %1653 = vpow2.f32 %v1542_v38 }
0x112b   :  { %v1652_v39 = vpop.eup %1651 }
0x112c   :  { %v1654_v41 = vpop.eup %1653  ;;  %v1255_v42 = vadd.f32 1.0, %v1652_v39 }
0x112d   :  { %v1286_v44 = vadd.f32 1.0, %v1654_v41 }
0x112e   :  { %1655 = vrcp.f32 %v1255_v42 }
0x112f   :  { %1657 = vrcp.f32 %v1286_v44 }
0x113b   :  { %v1656_v45 = vpop.eup %1655 }
0x113c   :  { %v1658_v49 = vpop.eup %1657  ;;  %v1268_v32 = vsub.f32 1.0, %v1656_v45 }
0x118c   :  { %v1259_v46 = vpop.permute.xlu1 %1258 }
0x118d   :  { %v1261_v47 = vmul.f32 %v1656_v45, %v1259_v46 }
0x118e   :  { %v1300_v50 = vpop.permute.xlu0 %1299 }
0x118f   :  { %v1302_v51 = vmul.f32 %v1658_v49, %v1300_v50  ;;  %1263 = vrot.lane.b32.xlu1 %v1261_v47, %s1699_s2  ;;  %v1414_v49 = vld [vmem:[#allocation2 + $0x8] sm:$0x3] }
0x1191   :  { %1304 = vrot.lane.b32.xlu0 %v1302_v51, %s1699_s2 }
0x1193   :  { %1316 = vrot.lane.b32.xlu1 %v1315_v53, %s1700_s4 }
0x1197   :  { %1275 = vrot.lane.b32.xlu1 %v1274_v54, %s1701_s22 }
0x1201   :  { %v1264_v55 = vpop.permute.xlu1 %1263 }
0x1202   :  { %v1266_v59 = vadd.f32 %v1264_v55, %v1245_v26 }
0x1203   :  { %v1305_v57 = vpop.permute.xlu0 %1304 }
0x1204   :  { %v1307_v58 = vadd.f32 %v1305_v57, %v1247_v56 }
0x1205   :  { %v1317_v11 = vpop.permute.xlu1 %1316 }
0x1206   :  { %1659 = vtanh.f32 %v1307_v58 }
0x1207   :  { %1661 = vtanh.f32 %v1266_v59 }
0x1208   :  { %1663 = vpow2.f32 %v1543_v0 }
0x1209   :  { %v1276_v30 = vpop.permute.xlu1 %1275 }
0x120a   :  { %v1278_v34 = vmul.f32 %v1656_v45, %v1276_v30 }
0x1213   :  { %v1660_v60 = vpop.eup %1659 }
0x1214   :  { %1311 = vrot.lane.b32.xlu0 %v1660_v60, %s1700_s4  ;;  %v1662_v61 = vpop.eup %1661 }
0x1215   :  { %v1664_v5 = vpop.eup %1663 }
0x1216   :  { %v1296_v7 = vadd.f32 1.0, %v1664_v5 }
0x1218   :  { %1270 = vrot.lane.b32.xlu0 %v1662_v61, %s1700_s4  ;;  %1665 = vrcp.f32 %v1296_v7 }
0x1225   :  { %v1666_v9 = vpop.eup %1665 }
0x1226   :  { %v1309_v13 = vsub.f32 1.0, %v1666_v9  ;;  %v1319_v22 = vmul.f32 %v1666_v9, %v1317_v11 }
0x1286   :  { %v1312_v17 = vpop.permute.xlu0 %1311 }
0x1287   :  { %v1314_v29 = vmul.f32 %v1312_v17, %v1309_v13 }
0x1289   :  { %v2177_v31 = vadd.f32 %v1319_v22, %v1314_v29 }
0x128a   :  { %v1271_v27 = vpop.permute.xlu0 %1270 }
0x128b   :  { %v1273_v3 = vmul.f32 %v1271_v27, %v1268_v32  ;;  %v1326_v4 = vrot.slane %v2177_v31, 6 }
0x128d   :  { %v1279_v6 = vadd.f32 %v1278_v34, %v1273_v3  ;;  %1327 = vrot.lane.b32.xlu1 %v1326_v4, %s1701_s22 }
0x128f   :  { %1322 = vrot.lane.b32.xlu0 %v1279_v6, %s1700_s4 }
0x12ff   :  { %v1328_v8 = vpop.permute.xlu1 %1327 }
0x1301   :  { %v1323_v10 = vpop.permute.xlu0 %1322 }
0x1302   :  { %v1330_v14 = vsel %vm42_vm1, %v1323_v10, %v1328_v8 }
0x1303   :  { %1331 = vst.msk [vmem:[#allocation3 - $0x4] sm:$0x30] %vm661_vm7, %v1330_v14 }
0x130a   :  { %v1337_v16 = vld [vmem:[#allocation3] sm:$0x3] }
0x130b   :  { %1546 = vmatmul.mubr.msk.f32.vlgmr.msra.gmra.mxu0 %vm127_vm2, %v1337_v16  ;;  %v1441_v47 = vrot.slane %v1337_v16, 2 }
0x13cb   :  { %v1407_v18 = vpop.f32.mrf.mxu0 }
0x13cc   :  { %v1408_v19 = vadd.f32 %v1407_v18, %v1916_v48 }
0x13cd   :  { %v1409_v20 = vpop.f32.mrf.mxu0 }
0x13ce   :  { %v1416_v21 = vrot.slane %v1408_v19, 2  ;;  %v1410_v23 = vadd.f32 %v1409_v20, %v1912_v43  ;;  %v1447_v26 = vadd.f32 %v1413_v24, %v1408_v19 }
0x13d0   :  { %1462 = vrot.lane.b32.xlu0 %v1410_v23, %s1699_s2  ;;  %1425 = vrot.lane.b32.xlu1 %v1416_v21, %s1699_s2  ;;  %v1418_v35 = vadd.f32 %v1416_v21, %v1412_v25  ;;  %v1548_v36 = vmul.f32 -1.442695, %v1447_v26  ;;  %v1454_v50 = vadd.f32 %v1414_v49, %v1410_v23 }
0x13d2   :  { %v1547_v37 = vmul.f32 -1.442695, %v1418_v35  ;;  %1667 = vpow2.f32 %v1548_v36  ;;  %v1549_v51 = vmul.f32 -1.442695, %v1454_v50 }
0x13d4   :  { %1669 = vpow2.f32 %v1547_v37 }
0x13df   :  { %v1668_v1 = vpop.eup %1667 }
0x13e0   :  { %v1451_v39 = vadd.f32 1.0, %v1668_v1 }
0x13e1   :  { %v1670_v38 = vpop.eup %1669 }
0x13e2   :  { %v1422_v48 = vadd.f32 1.0, %v1670_v38  ;;  %1671 = vrcp.f32 %v1451_v39 }
0x13e4   :  { %1673 = vrcp.f32 %v1422_v48 }
0x13e5   :  { %1675 = vpow2.f32 %v1549_v51 }
0x13ef   :  { %v1672_v41 = vpop.eup %1671 }
0x13f1   :  { %v1674_v43 = vpop.eup %1673 }
0x13f2   :  { %v1676_v53 = vpop.eup %1675  ;;  %v1435_v13 = vsub.f32 1.0, %v1674_v43 }
0x13f3   :  { %v1458_v54 = vadd.f32 1.0, %v1676_v53 }
0x13f5   :  { %1677 = vrcp.f32 %v1458_v54 }
0x1402   :  { %v1678_v59 = vpop.eup %1677 }
0x1403   :  { %v1472_v7 = vsub.f32 1.0, %v1678_v59 }
0x1442   :  { %v1463_v42 = vpop.permute.xlu0 %1462  ;;  %v1426_v44 = vpop.permute.xlu1 %1425 }
0x1443   :  { %v1465_v45 = vmul.f32 %v1672_v41, %v1463_v42  ;;  %v1428_v46 = vmul.f32 %v1674_v43, %v1426_v44 }
0x1445   :  { %1467 = vrot.lane.b32.xlu0 %v1465_v45, %s1699_s2  ;;  %1430 = vrot.lane.b32.xlu1 %v1428_v46, %s1699_s2 }
0x1449   :  { %1478 = vrot.lane.b32.xlu1 %v1337_v16, %s1700_s4 }
0x144d   :  { %1442 = vrot.lane.b32.xlu1 %v1441_v47, %s1701_s22 }
0x1451   :  { %494 = vrot.lane.b32.xlu1 %v1968_v52, %s1701_s22 }
0x1455   :  { %833 = vrot.lane.b32.xlu1 %v2046_v15, %s1701_s22 }
0x1459   :  { %1166 = vrot.lane.b32.xlu1 %v2156_v33, %s1701_s22 }
0x14b7   :  { %v1468_v55 = vpop.permute.xlu0 %1467  ;;  %v1431_v56 = vpop.permute.xlu1 %1430 }
0x14b8   :  { %v1470_v57 = vadd.f32 %v1468_v55, %v1414_v49  ;;  %v1433_v58 = vadd.f32 %v1431_v56, %v1412_v25 }
0x14ba   :  { %1679 = vtanh.f32 %v1470_v57 }
0x14bb   :  { %v1479_v52 = vpop.permute.xlu1 %1478  ;;  %1681 = vtanh.f32 %v1433_v58 }
0x14bc   :  { %v1481_v60 = vmul.f32 %v1678_v59, %v1479_v52 }
0x14bf   :  { %v1443_v15 = vpop.permute.xlu1 %1442 }
0x14c0   :  { %v1445_v22 = vmul.f32 %v1674_v43, %v1443_v15 }
0x14c3   :  { %v495_v61 = vpop.permute.xlu1 %494 }
0x14c4   :  { %1515 = vst.msk [vmem:[%s2265_s5 + $0x8] sm:$0x30] %vm498_vm10, %v495_v61 }
0x14c5   :  { %1544 = vst.msk [vmem:[%s2265_s5 + $0x8] sm:$0x30] %vm664_vm6, %v1323_v10 }
0x14c7   :  { %v1680_v33 = vpop.eup %1679  ;;  %v834_v62 = vpop.permute.xlu1 %833 }
0x14c8   :  { %1527 = vst.msk [vmem:[%s2265_s5 + $0x8] sm:$0x3] %vm837_vm11, %v834_v62  ;;  %1474 = vrot.lane.b32.xlu0 %v1680_v33, %s1700_s4  ;;  %v1682_v0 = vpop.eup %1681 }
0x14c9   :  { %1532 = vst.msk [vmem:[%s2265_s5 + $0x8] sm:$0x3] %vm320_vm3, %v2089_v28 }
0x14cb   :  { %v1167_v5 = vpop.permute.xlu1 %1166 }
0x14cc   :  { %1539 = vst.msk [vmem:[%s2265_s5] sm:$0x30] %vm498_vm10, %v1167_v5  ;;  %1437 = vrot.lane.b32.xlu0 %v1682_v0, %s1700_s4 }
0x14d0   :  { %322 = vrot.lane.b32.xlu0 %v1929_v40, %s1701_s22 }
0x14d4   :  { %666 = vrot.lane.b32.xlu0 %v2007_v63, %s1701_s22 }
0x14d8   :  { %999 = vrot.lane.b32.xlu0 %v2084_v2, %s1701_s22 }
0x153a   :  { %v1475_v9 = vpop.permute.xlu0 %1474 }
0x153b   :  { %v1477_v28 = vmul.f32 %v1475_v9, %v1472_v7 }
0x153d   :  { %v1482_v11 = vadd.f32 %v1481_v60, %v1477_v28 }
0x153e   :  { %v1438_v17 = vpop.permute.xlu0 %1437 }
0x153f   :  { %v1440_v29 = vmul.f32 %v1438_v17, %v1435_v13  ;;  %v1488_v30 = vrot.slane %v1482_v11, 2 }
0x1541   :  { %v1446_v32 = vadd.f32 %v1445_v22, %v1440_v29  ;;  %1489 = vrot.lane.b32.xlu1 %v1488_v30, %s1701_s22 }
0x1542   :  { %v323_v40 = vpop.permute.xlu0 %322 }
0x1543   :  { %1509 = vst.msk [vmem:[%s2265_s5 + $0x8] sm:$0xc0] %vm326_vm12, %v323_v40  ;;  %1484 = vrot.lane.b32.xlu0 %v1446_v32, %s1700_s4 }
0x1545   :  { %1495 = vrot.lane.b32.xlu1 %v1482_v11, %s1701_s22 }
0x1546   :  { %v667_v63 = vpop.permute.xlu0 %666 }
0x1547   :  { %1521 = vst.msk [vmem:[%s2265_s5 + $0x8] sm:$0xc] %vm670_vm13, %v667_v63  ;;  %1333 = vrot.lane.b32.xlu0 %v2177_v31, %s1701_s22 }
0x1548   :  { %1538 = vst.msk [vmem:[%s2265_s5 + $0x8] sm:$0xc] %vm492_vm4, %v2161_v12 }
0x154a   :  { %v1000_v2 = vpop.permute.xlu0 %999 }
0x154b   :  { %1533 = vst.msk [vmem:[%s2265_s5] sm:$0xc0] %vm326_vm12, %v1000_v2 }
0x15b3   :  { %v1490_v27 = vpop.permute.xlu1 %1489 }
0x15b5   :  { %v1485_v34 = vpop.permute.xlu0 %1484 }
0x15b6   :  { %v1492_v3 = vsel %vm42_vm1, %v1485_v34, %v1490_v27  ;;  %1550 = vst.msk [vmem:[%s2265_s5 + $0x8] sm:$0xc0] %vm831_vm8, %v1485_v34 }
0x15b7   :  { %1493 = vst.msk [vmem:[#allocation3 - $0x6] sm:$0xc0] %vm828_vm9, %v1492_v3  ;;  %v1496_v31 = vpop.permute.xlu1 %1495 }
0x15b8   :  { %1498 = vst.msk [vmem:[%s2265_s5] sm:$0x3] %vm837_vm11, %v1496_v31 }
0x15b9   :  { %v1334_v12 = vpop.permute.xlu0 %1333 }
0x15ba   :  { %1545 = vst.msk [vmem:[%s2265_s5] sm:$0xc] %vm670_vm13, %v1334_v12 }

// kernel: nlp_classifier_forward.4
= control target key start
LH: loop header
LB: loop body
LE: loop exit
PB: predicated region body
PF: predicated region fallthrough
CT: control target
= control target key end

     0   :  { %vm138_vm0 = vcmask 517120   ;;  %v1706_v3 = vmov 0.0   ;;  %vm50_vm1 = vcmask 523264   ;;  %v40_v36 = vlaneseq  ;;  %s1709_s13 = smov 32   ;;  %s2292_s1 = inlined_call_operand.vmem [shape: f32[64,192], index: 1, kind: input, shape index: {}]   ;;  %s2293_s3 = inlined_call_operand.vmem [shape: f32[64,192], index: 3, kind: input, shape index: {}]   ;;  %s2294_s0 = inlined_call_operand.vmem [shape: f32[16,64], index: 0, kind: input, shape index: {}]   ;;  %s2295_s2 = inlined_call_operand.vmem [shape: f32[1,192], index: 2, kind: input, shape index: {}]   ;;  %s2296_s4 = inlined_call_operand.vmem [shape: f32[1,192], index: 4, kind: input, shape index: {}]   ;;  %s2297_s5 = inlined_call_operand.vmem [shape: f32[8,2,64], index: 5, kind: output, shape index: {}]  }
   0x1   :  { %v37_v0 = vld [vmem:[%s2292_s1 + $0x78] sm:$0xff]  ;;  %v36_v2 = vld [vmem:[%s2292_s1 + $0x70] sm:$0xff]  ;;  %121 = vmatprep.mubr.f32.mxu0 %v1706_v3  ;;  %139 = vst.msk [vmem:[#allocation3] sm:$0x3] %vm138_vm0, %v1706_v3  ;;  %236 = vmatprep.mubr.f32.mxu1 %v1706_v3  ;;  %v35_v5 = vld [vmem:[%s2292_s1 + $0x68] sm:$0xff]  ;;  %vm325_vm2 = vcmask 261120  }
   0x2   :  { %v1746_v1 = vld [vmem:[%s2293_s3 + $0x78] sm:$0xff]  ;;  %73 = vmatprep.subr.mxu0 %v37_v0  ;;  %v1759_v4 = vld [vmem:[%s2293_s3 + $0x70] sm:$0xff]  ;;  %v1767_v6 = vld [vmem:[%s2293_s3 + $0x68] sm:$0xff]  ;;  %v41_v37 = vshrl.u32 %v40_v36, 7  ;;  %vm328_vm3 = vcmask 254976   ;;  %vm500_vm4 = vcmask 257026  }
   0x3   :  { %188 = vmatprep.subr.mxu1 %v1746_v1  ;;  %74 = vmatpush1.msra.mxu0 %v36_v2  ;;  %v34_v7 = vld [vmem:[%s2292_s1 + $0x60] sm:$0xff]  ;;  %v33_v9 = vld [vmem:[%s2292_s1 + $0x58] sm:$0xff]  ;;  %v32_v11 = vld [vmem:[%s2292_s1 + $0x50] sm:$0xff]  ;;  %vm497_vm5 = vcmask 519170   ;;  %vm672_vm6 = vcmask 259076   ;;  %vm669_vm7 = vcmask 521220  }
   0x4   :  { %189 = vmatpush1.msra.mxu1 %v1759_v4  ;;  %v1776_v8 = vld [vmem:[%s2293_s3 + $0x60] sm:$0xff]  ;;  %75 = vmatprep.subr.mxu0 %v35_v5  ;;  %v1785_v10 = vld [vmem:[%s2293_s3 + $0x58] sm:$0xff]  ;;  %v1793_v12 = vld [vmem:[%s2293_s3 + $0x50] sm:$0xff]  ;;  %v42_v38 = vsub.s32 0, %v41_v37  ;;  %v46_v40 = vsub.s32 1, %v41_v37  ;;  %vm839_vm8 = vcmask 261126  }
   0x5   :  { %190 = vmatprep.subr.mxu1 %v1767_v6  ;;  %76 = vmatpush1.msra.mxu0 %v34_v7  ;;  %v31_v13 = vld [vmem:[%s2292_s1 + $0x48] sm:$0xff]  ;;  %v30_v15 = vld [vmem:[%s2292_s1 + $0x40] sm:$0xff]  ;;  %v29_v17 = vld [vmem:[%s2292_s1 + $0x38] sm:$0xff]  ;;  %vm836_vm9 = vcmask 523270   ;;  %vm506_vm10 = vcmask 521476   ;;  %vm845_vm11 = vcmask 517376  }
   0x6   :  { %191 = vmatpush1.msra.mxu1 %v1776_v8  ;;  %v1802_v14 = vld [vmem:[%s2293_s3 + $0x48] sm:$0xff]  ;;  %77 = vmatprep.subr.mxu0 %v33_v9  ;;  %v1811_v16 = vld [vmem:[%s2293_s3 + $0x40] sm:$0xff]  ;;  %v1820_v18 = vld [vmem:[%s2293_s3 + $0x38] sm:$0xff]  ;;  %vm334_vm12 = vcmask 523526   ;;  %vm678_vm13 = vcmask 519426  }
   0x7   :  { %192 = vmatprep.subr.mxu1 %v1785_v10  ;;  %78 = vmatpush1.msra.mxu0 %v32_v11  ;;  %v28_v19 = vld [vmem:[%s2292_s1 + $0x30] sm:$0xff]  ;;  %v27_v21 = vld [vmem:[%s2292_s1 + $0x28] sm:$0xff]  ;;  %v26_v23 = vld [vmem:[%s2292_s1 + $0x20] sm:$0xff] }
   0x8   :  { %193 = vmatpush1.msra.mxu1 %v1793_v12  ;;  %79 = vmatprep.subr.mxu0 %v31_v13  ;;  %v1829_v20 = vld [vmem:[%s2293_s3 + $0x30] sm:$0xff]  ;;  %v1838_v22 = vld [vmem:[%s2293_s3 + $0x28] sm:$0xff]  ;;  %v1847_v24 = vld [vmem:[%s2293_s3 + $0x20] sm:$0xff] }
   0x9   :  { %194 = vmatprep.subr.mxu1 %v1802_v14  ;;  %80 = vmatpush1.msra.mxu0 %v30_v15  ;;  %v25_v25 = vld [vmem:[%s2292_s1 + $0x18] sm:$0xff]  ;;  %v24_v27 = vld [vmem:[%s2292_s1 + $0x10] sm:$0xff]  ;;  %v23_v29 = vld [vmem:[%s2292_s1 + $0x8] sm:$0xff] }
   0xa   :  { %195 = vmatpush1.msra.mxu1 %v1811_v16  ;;  %81 = vmatprep.subr.mxu0 %v29_v17  ;;  %v1856_v26 = vld [vmem:[%s2293_s3 + $0x18] sm:$0xff]  ;;  %v1865_v28 = vld [vmem:[%s2293_s3 + $0x10] sm:$0xff]  ;;  %v1874_v30 = vld [vmem:[%s2293_s3 + $0x8] sm:$0xff] }
   0xb   :  { %196 = vmatprep.subr.mxu1 %v1820_v18  ;;  %82 = vmatpush1.msra.mxu0 %v28_v19  ;;  %v22_v31 = vld [vmem:[%s2292_s1] sm:$0xff]  ;;  %v21_v35 = vld [vmem:[%s2294_s0 + $0x8] sm:$0xff] }
   0xc   :  { %197 = vmatpush1.msra.mxu1 %v1829_v20  ;;  %83 = vmatprep.subr.mxu0 %v27_v21  ;;  %v1883_v32 = vld [vmem:[%s2293_s3] sm:$0xff] }
   0xd   :  { %198 = vmatprep.subr.mxu1 %v1838_v22  ;;  %84 = vmatpush1.msra.mxu0 %v26_v23  ;;  %v20_v33 = vld [vmem:[%s2294_s0] sm:$0xff] }
   0xe   :  { %199 = vmatpush1.msra.mxu1 %v1847_v24  ;;  %85 = vmatprep.subr.mxu0 %v25_v25  ;;  %v1889_v34 = vld [vmem:[#allocation3] sm:$0x3] }
   0xf   :  { %200 = vmatprep.subr.mxu1 %v1856_v26  ;;  %86 = vmatpush1.msra.mxu0 %v24_v27  ;;  %v38_v39 = vld [vmem:[%s2295_s2] sm:$0x3]  ;;  %s1707_s2 = smov 64   ;;  %v310_v25 = vrot.slane %v1889_v34, 2 }
  0x10   :  { %201 = vmatpush1.msra.mxu1 %v1865_v28  ;;  %87 = vmatprep.subr.mxu0 %v23_v29  ;;  %v43_v41 = vrot.slane %v38_v39, %v42_v38  ;;  %v156_v42 = vld [vmem:[%s2296_s4] sm:$0x3]  ;;  %v47_v47 = vrot.slane %v38_v39, %v46_v40  ;;  %s1708_s4 = smov 96  }
  0x11   :  { %202 = vmatprep.subr.mxu1 %v1874_v30  ;;  %88 = vmatpush1.msra.mxu0 %v22_v31  ;;  %v1943_v43 = vrot.slane %v156_v42, %v46_v40  ;;  %v1946_v53 = vrot.slane %v156_v42, %v42_v38 }
  0x12   :  { %203 = vmatpush1.msra.mxu1 %v1883_v32  ;;  %1511 = vmatmul.mubr.msk.f32.vlgmr.msra.gmra.mxu0 %vm50_vm1, %v20_v33 }
  0x13   :  { %1513 = vmatmul.mubr.msk.f32.vlgmr.msra.gmra.mxu1 %vm50_vm1, %v1889_v34  ;;  %127 = vmatprep.mubr.f32.mxu0 %v1706_v3 }
  0x14   :  { %356 = vmatprep.subr.mxu0 %v1746_v1  ;;  %528 = vmatprep.subr.mxu1 %v1746_v1 }
  0x15   :  { %357 = vmatpush1.msra.mxu0 %v1759_v4  ;;  %529 = vmatpush1.msra.mxu1 %v1759_v4 }
  0x16   :  { %358 = vmatprep.subr.mxu0 %v1767_v6  ;;  %1512 = vmatmul.mubr.msk.f32.gmra.mxu0 %vm50_vm1, %v21_v35 }
  0x17   :  { %530 = vmatprep.subr.mxu1 %v1767_v6  ;;  %359 = vmatpush1.msra.mxu0 %v1776_v8 }
  0x18   :  { %404 = vmatprep.mubr.f32.mxu0 %v1706_v3  ;;  %360 = vmatprep.subr.mxu0 %v1785_v10 }
  0x19   :  { %531 = vmatpush1.msra.mxu1 %v1776_v8  ;;  %361 = vmatpush1.msra.mxu0 %v1793_v12 }
  0x1a   :  { %532 = vmatprep.subr.mxu1 %v1785_v10  ;;  %362 = vmatprep.subr.mxu0 %v1802_v14 }
  0x1b   :  { %533 = vmatpush1.msra.mxu1 %v1793_v12  ;;  %363 = vmatpush1.msra.mxu0 %v1811_v16 }
  0x1c   :  { %534 = vmatprep.subr.mxu1 %v1802_v14  ;;  %364 = vmatprep.subr.mxu0 %v1820_v18 }
  0x1d   :  { %535 = vmatpush1.msra.mxu1 %v1811_v16  ;;  %365 = vmatpush1.msra.mxu0 %v1829_v20 }
  0x1e   :  { %536 = vmatprep.subr.mxu1 %v1820_v18  ;;  %366 = vmatprep.subr.mxu0 %v1838_v22 }
  0x1f   :  { %537 = vmatpush1.msra.mxu1 %v1829_v20  ;;  %367 = vmatpush1.msra.mxu0 %v1847_v24 }
  0x20   :  { %538 = vmatprep.subr.mxu1 %v1838_v22  ;;  %368 = vmatprep.subr.mxu0 %v1856_v26 }
  0x21   :  { %539 = vmatpush1.msra.mxu1 %v1847_v24  ;;  %369 = vmatpush1.msra.mxu0 %v1865_v28 }
  0x22   :  { %540 = vmatprep.subr.mxu1 %v1856_v26  ;;  %370 = vmatprep.subr.mxu0 %v1874_v30 }
  0x23   :  { %541 = vmatpush1.msra.mxu1 %v1865_v28  ;;  %371 = vmatpush1.msra.mxu0 %v1883_v32 }
  0x24   :  { %542 = vmatprep.subr.mxu1 %v1874_v30  ;;  %576 = vmatprep.mubr.f32.mxu1 %v1706_v3 }
  0x25   :  { %543 = vmatpush1.msra.mxu1 %v1883_v32  ;;  %700 = vmatprep.subr.mxu0 %v1746_v1 }
  0x26   :  { %867 = vmatprep.subr.mxu1 %v1746_v1 }
  0xd2   :  { %v123_v44 = vpop.f32.mrf.mxu0 }
  0xd3   :  { %v238_v45 = vpop.f32.mrf.mxu1  ;;  %v124_v46 = vadd.f32 %v123_v44, %v43_v41 }
  0xd4   :  { %v125_v48 = vpop.f32.mrf.mxu0  ;;  %v239_v58 = vadd.f32 %v238_v45, %v1946_v53 }
  0xd5   :  { %v240_v49 = vpop.f32.mrf.mxu1  ;;  %134 = vst [vmem:[#allocation2] sm:$0xff] %v124_v46  ;;  %v126_v50 = vadd.f32 %v125_v48, %v47_v47 }
  0xd6   :  { %v241_v51 = vadd.f32 %v240_v49, %v1943_v43  ;;  %v129_v52 = vpop.f32.mrf.mxu0  ;;  %v275_v60 = vrot.slane %v239_v58, 2 }
  0xd7   :  { %135 = vst.msk [vmem:[#allocation2 + $0x8] sm:$0xff] %vm50_vm1, %v126_v50  ;;  %v130_v55 = vadd.f32 %v129_v52, %v43_v41 }
  0xd8   :  { %v285_v54 = vrot.slane %v241_v51, 2  ;;  %v131_v56 = vpop.f32.mrf.mxu0 }
  0xd9   :  { %136 = vst [vmem:[#allocation2 + $0x10] sm:$0xff] %v130_v55  ;;  %v132_v57 = vadd.f32 %v131_v56, %v47_v47 }
  0xda   :  { %294 = vrot.lane.b32.xlu0 %v285_v54, %s1707_s2 }
  0xdb   :  { %137 = vst.msk [vmem:[#allocation2 + $0x18] sm:$0xff] %vm50_vm1, %v132_v57 }
  0xdc   :  { %v243_v62 = vld [vmem:[#allocation2] sm:$0x3] }
  0xdd   :  { %v246_v63 = vadd.f32 %v243_v62, %v239_v58 }
  0xde   :  { %254 = vrot.lane.b32.xlu0 %v239_v58, %s1707_s2 }
  0xdf   :  { %v1514_v2 = vmul.f32 -1.442695, %v246_v63 }
  0xe0   :  { %v244_v59 = vld [vmem:[#allocation2 + $0x10] sm:$0xc0] }
  0xe1   :  { %v277_v61 = vadd.f32 %v275_v60, %v244_v59 }
  0xe2   :  { %v245_v27 = vld [vmem:[#allocation2 + $0x18] sm:$0xc0] }
  0xe3   :  { %v1515_v0 = vmul.f32 -1.442695, %v277_v61  ;;  %v287_v38 = vadd.f32 %v285_v54, %v245_v27 }
  0xe5   :  { %1563 = vpow2.f32 %v1515_v0  ;;  %v1516_v39 = vmul.f32 -1.442695, %v287_v38 }
  0xe6   :  { %1565 = vpow2.f32 %v1514_v2 }
  0xf2   :  { %v1564_v5 = vpop.eup %1563 }
  0xf3   :  { %v281_v7 = vadd.f32 1.0, %v1564_v5  ;;  %v1566_v9 = vpop.eup %1565 }
  0xf4   :  { %v250_v11 = vadd.f32 1.0, %v1566_v9  ;;  %v411_v9 = vld [vmem:[#allocation2] sm:$0xc] }
  0xf5   :  { %1567 = vrcp.f32 %v281_v7 }
  0xf6   :  { %1569 = vrcp.f32 %v250_v11 }
 0x102   :  { %v1568_v13 = vpop.eup %1567 }
 0x103   :  { %v1570_v19 = vpop.eup %1569 }
 0x104   :  { %v264_v50 = vsub.f32 1.0, %v1570_v19 }
 0x14c   :  { %v295_v15 = vpop.permute.xlu0 %294 }
 0x14d   :  { %v297_v17 = vmul.f32 %v1568_v13, %v295_v15  ;;  %v412_v13 = vld [vmem:[#allocation2 + $0x10] sm:$0x30] }
 0x14f   :  { %299 = vrot.lane.b32.xlu1 %v297_v17, %s1707_s2 }
 0x150   :  { %v255_v21 = vpop.permute.xlu0 %254 }
 0x151   :  { %v257_v23 = vmul.f32 %v1570_v19, %v255_v21 }
 0x153   :  { %259 = vrot.lane.b32.xlu1 %v257_v23, %s1707_s2 }
 0x157   :  { %311 = vrot.lane.b32.xlu1 %v310_v25, %s1708_s4 }
 0x15b   :  { %270 = vrot.lane.b32.xlu1 %v1889_v34, %s1709_s13 }
 0x1c1   :  { %v300_v29 = vpop.permute.xlu1 %299 }
 0x1c2   :  { %v302_v31 = vadd.f32 %v300_v29, %v245_v27 }
 0x1c4   :  { %1571 = vtanh.f32 %v302_v31 }
 0x1c5   :  { %v260_v33 = vpop.permute.xlu1 %259 }
 0x1c6   :  { %v262_v35 = vadd.f32 %v260_v33, %v243_v62 }
 0x1c8   :  { %1573 = vtanh.f32 %v262_v35 }
 0x1c9   :  { %1575 = vpow2.f32 %v1516_v39  ;;  %v312_v42 = vpop.permute.xlu1 %311 }
 0x1cd   :  { %v271_v48 = vpop.permute.xlu1 %270 }
 0x1ce   :  { %v273_v52 = vmul.f32 %v1570_v19, %v271_v48 }
 0x1d1   :  { %v1572_v36 = vpop.eup %1571 }
 0x1d2   :  { %306 = vrot.lane.b32.xlu0 %v1572_v36, %s1708_s4 }
 0x1d5   :  { %v1574_v37 = vpop.eup %1573 }
 0x1d6   :  { %266 = vrot.lane.b32.xlu0 %v1574_v37, %s1708_s4  ;;  %v1576_v40 = vpop.eup %1575 }
 0x1d7   :  { %v291_v41 = vadd.f32 1.0, %v1576_v40 }
 0x1d9   :  { %1577 = vrcp.f32 %v291_v41  ;;  %v413_v41 = vld [vmem:[#allocation2 + $0x18] sm:$0x30] }
 0x1e6   :  { %v1578_v34 = vpop.eup %1577 }
 0x1e7   :  { %v304_v44 = vsub.f32 1.0, %v1578_v34  ;;  %v314_v46 = vmul.f32 %v1578_v34, %v312_v42 }
 0x244   :  { %v307_v45 = vpop.permute.xlu0 %306 }
 0x245   :  { %v309_v47 = vmul.f32 %v307_v45, %v304_v44 }
 0x247   :  { %v1961_v49 = vadd.f32 %v314_v46, %v309_v47 }
 0x248   :  { %v267_v51 = vpop.permute.xlu0 %266 }
 0x249   :  { %v269_v55 = vmul.f32 %v267_v51, %v264_v50  ;;  %v321_v54 = vrot.slane %v1961_v49, 6 }
 0x24b   :  { %v274_v56 = vadd.f32 %v273_v52, %v269_v55  ;;  %322 = vrot.lane.b32.xlu1 %v321_v54, %s1709_s13 }
 0x24d   :  { %317 = vrot.lane.b32.xlu0 %v274_v56, %s1708_s4 }
 0x2bd   :  { %v323_v57 = vpop.permute.xlu1 %322 }
 0x2bf   :  { %v318_v58 = vpop.permute.xlu0 %317 }
 0x2c0   :  { %v326_v59 = vsel %vm325_vm2, %v318_v58, %v323_v57  ;;  %329 = vst.msk [vmem:[%s2297_s5] sm:$0x3] %vm328_vm3, %v318_v58 }
 0x2c1   :  { %327 = vst.msk [vmem:[#allocation3] sm:$0x3] %vm138_vm0, %v326_v59 }
 0x2c8   :  { %v336_v60 = vld [vmem:[#allocation3] sm:$0x3] }
 0x2c9   :  { %1518 = vmatmul.mubr.msk.f32.vlgmr.msra.gmra.mxu0 %vm50_vm1, %v336_v60  ;;  %v481_v38 = vrot.slane %v336_v60, 4  ;;  %v440_v39 = vrot.slane %v336_v60, 6 }
 0x2ca   :  { %701 = vmatpush1.msra.mxu0 %v1759_v4  ;;  %748 = vmatprep.mubr.f32.mxu0 %v1706_v3 }
 0x2cb   :  { %702 = vmatprep.subr.mxu0 %v1767_v6 }
 0x2cc   :  { %703 = vmatpush1.msra.mxu0 %v1776_v8 }
 0x2cd   :  { %704 = vmatprep.subr.mxu0 %v1785_v10 }
 0x2ce   :  { %705 = vmatpush1.msra.mxu0 %v1793_v12 }
 0x2cf   :  { %706 = vmatprep.subr.mxu0 %v1802_v14 }
 0x2d0   :  { %707 = vmatpush1.msra.mxu0 %v1811_v16 }
 0x2d1   :  { %708 = vmatprep.subr.mxu0 %v1820_v18 }
 0x2d2   :  { %709 = vmatpush1.msra.mxu0 %v1829_v20 }
 0x2d3   :  { %710 = vmatprep.subr.mxu0 %v1838_v22 }
 0x2d4   :  { %711 = vmatpush1.msra.mxu0 %v1847_v24 }
 0x2d5   :  { %712 = vmatprep.subr.mxu0 %v1856_v26 }
 0x2d6   :  { %713 = vmatpush1.msra.mxu0 %v1865_v28 }
 0x2d7   :  { %714 = vmatprep.subr.mxu0 %v1874_v30 }
 0x2d8   :  { %715 = vmatpush1.msra.mxu0 %v1883_v32 }
 0x2d9   :  { %1031 = vmatprep.subr.mxu0 %v1746_v1 }
 0x389   :  { %v406_v61 = vpop.f32.mrf.mxu0 }
 0x38a   :  { %v407_v62 = vadd.f32 %v406_v61, %v1946_v53 }
 0x38b   :  { %v408_v63 = vpop.f32.mrf.mxu0 }
 0x38c   :  { %v415_v0 = vrot.slane %v407_v62, 6  ;;  %v409_v2 = vadd.f32 %v408_v63, %v1943_v43  ;;  %v446_v7 = vrot.slane %v407_v62, 4 }
 0x38e   :  { %v456_v5 = vrot.slane %v409_v2, 4  ;;  %424 = vrot.lane.b32.xlu1 %v415_v0, %s1707_s2  ;;  %v417_v11 = vadd.f32 %v415_v0, %v411_v9  ;;  %v448_v15 = vadd.f32 %v446_v7, %v412_v13 }
 0x390   :  { %465 = vrot.lane.b32.xlu0 %v456_v5, %s1707_s2  ;;  %v1519_v17 = vmul.f32 -1.442695, %v417_v11  ;;  %v1520_v19 = vmul.f32 -1.442695, %v448_v15  ;;  %v458_v47 = vadd.f32 %v456_v5, %v413_v41 }
 0x392   :  { %1579 = vpow2.f32 %v1519_v17  ;;  %v1521_v48 = vmul.f32 -1.442695, %v458_v47 }
 0x393   :  { %1581 = vpow2.f32 %v1520_v19 }
 0x39f   :  { %v1580_v21 = vpop.eup %1579 }
 0x3a0   :  { %v1582_v23 = vpop.eup %1581  ;;  %v421_v25 = vadd.f32 1.0, %v1580_v21 }
 0x3a1   :  { %v452_v27 = vadd.f32 1.0, %v1582_v23 }
 0x3a2   :  { %1583 = vrcp.f32 %v421_v25 }
 0x3a3   :  { %1585 = vrcp.f32 %v452_v27 }
 0x3af   :  { %v1584_v29 = vpop.eup %1583 }
 0x3b0   :  { %v1586_v35 = vpop.eup %1585  ;;  %v434_v61 = vsub.f32 1.0, %v1584_v29 }
 0x400   :  { %v425_v31 = vpop.permute.xlu1 %424 }
 0x401   :  { %v427_v33 = vmul.f32 %v1584_v29, %v425_v31 }
 0x402   :  { %v466_v36 = vpop.permute.xlu0 %465 }
 0x403   :  { %v468_v37 = vmul.f32 %v1586_v35, %v466_v36  ;;  %429 = vrot.lane.b32.xlu1 %v427_v33, %s1707_s2  ;;  %v584_v33 = vld [vmem:[#allocation2 + $0x10] sm:$0xc] }
 0x405   :  { %470 = vrot.lane.b32.xlu0 %v468_v37, %s1707_s2 }
 0x407   :  { %482 = vrot.lane.b32.xlu1 %v481_v38, %s1708_s4 }
 0x40b   :  { %441 = vrot.lane.b32.xlu1 %v440_v39, %s1709_s13 }
 0x475   :  { %v430_v40 = vpop.permute.xlu1 %429 }
 0x476   :  { %v432_v44 = vadd.f32 %v430_v40, %v411_v9 }
 0x477   :  { %v471_v34 = vpop.permute.xlu0 %470 }
 0x478   :  { %v473_v42 = vadd.f32 %v471_v34, %v413_v41 }
 0x479   :  { %v483_v55 = vpop.permute.xlu1 %482 }
 0x47a   :  { %1587 = vtanh.f32 %v473_v42 }
 0x47b   :  { %1589 = vtanh.f32 %v432_v44 }
 0x47c   :  { %1591 = vpow2.f32 %v1521_v48 }
 0x47d   :  { %v442_v59 = vpop.permute.xlu1 %441 }
 0x47e   :  { %v444_v63 = vmul.f32 %v1584_v29, %v442_v59  ;;  %v583_v29 = vld [vmem:[#allocation2] sm:$0x30] }
 0x487   :  { %v1588_v45 = vpop.eup %1587 }
 0x488   :  { %477 = vrot.lane.b32.xlu0 %v1588_v45, %s1708_s4  ;;  %v1590_v46 = vpop.eup %1589 }
 0x489   :  { %v1592_v50 = vpop.eup %1591 }
 0x48a   :  { %v462_v51 = vadd.f32 1.0, %v1592_v50 }
 0x48c   :  { %436 = vrot.lane.b32.xlu0 %v1590_v46, %s1708_s4  ;;  %1593 = vrcp.f32 %v462_v51 }
 0x499   :  { %v1594_v52 = vpop.eup %1593 }
 0x49a   :  { %v475_v54 = vsub.f32 1.0, %v1594_v52  ;;  %v485_v57 = vmul.f32 %v1594_v52, %v483_v55  ;;  %v585_v52 = vld [vmem:[#allocation2 + $0x18] sm:$0xc] }
 0x4fa   :  { %v478_v56 = vpop.permute.xlu0 %477 }
 0x4fb   :  { %v480_v58 = vmul.f32 %v478_v56, %v475_v54 }
 0x4fd   :  { %v2000_v60 = vadd.f32 %v485_v57, %v480_v58 }
 0x4fe   :  { %v437_v62 = vpop.permute.xlu0 %436 }
 0x4ff   :  { %v439_v0 = vmul.f32 %v437_v62, %v434_v61  ;;  %v492_v2 = vrot.slane %v2000_v60, 2 }
 0x501   :  { %v445_v5 = vadd.f32 %v444_v63, %v439_v0  ;;  %493 = vrot.lane.b32.xlu1 %v492_v2, %s1709_s13 }
 0x503   :  { %488 = vrot.lane.b32.xlu0 %v445_v5, %s1708_s4 }
 0x573   :  { %v494_v7 = vpop.permute.xlu1 %493 }
 0x575   :  { %v489_v9 = vpop.permute.xlu0 %488 }
 0x576   :  { %v496_v11 = vsel %vm325_vm2, %v489_v9, %v494_v7  ;;  %1522 = vst.msk [vmem:[%s2297_s5] sm:$0xc] %vm500_vm4, %v489_v9 }
 0x577   :  { %498 = vst.msk [vmem:[#allocation3 - $0x2] sm:$0xc] %vm497_vm5, %v496_v11 }
 0x57e   :  { %v508_v13 = vld [vmem:[#allocation3] sm:$0x3] }
 0x57f   :  { %1524 = vmatmul.mubr.msk.f32.vlgmr.msra.gmra.mxu1 %vm50_vm1, %v508_v13  ;;  %v653_v48 = vrot.slane %v508_v13, 6  ;;  %v612_v50 = vrot.slane %v508_v13, 4 }
 0x580   :  { %868 = vmatpush1.msra.mxu1 %v1759_v4  ;;  %915 = vmatprep.mubr.f32.mxu1 %v1706_v3 }
 0x581   :  { %869 = vmatprep.subr.mxu1 %v1767_v6 }
 0x582   :  { %870 = vmatpush1.msra.mxu1 %v1776_v8 }
 0x583   :  { %871 = vmatprep.subr.mxu1 %v1785_v10 }
 0x584   :  { %872 = vmatpush1.msra.mxu1 %v1793_v12 }
 0x585   :  { %873 = vmatprep.subr.mxu1 %v1802_v14 }
 0x586   :  { %874 = vmatpush1.msra.mxu1 %v1811_v16 }
 0x587   :  { %875 = vmatprep.subr.mxu1 %v1820_v18 }
 0x588   :  { %876 = vmatpush1.msra.mxu1 %v1829_v20 }
 0x589   :  { %877 = vmatprep.subr.mxu1 %v1838_v22 }
 0x58a   :  { %878 = vmatpush1.msra.mxu1 %v1847_v24 }
 0x58b   :  { %879 = vmatprep.subr.mxu1 %v1856_v26 }
 0x58c   :  { %880 = vmatpush1.msra.mxu1 %v1865_v28 }
 0x58d   :  { %881 = vmatprep.subr.mxu1 %v1874_v30 }
 0x58e   :  { %882 = vmatpush1.msra.mxu1 %v1883_v32 }
 0x58f   :  { %1198 = vmatprep.subr.mxu1 %v1746_v1 }
 0x63f   :  { %v578_v15 = vpop.f32.mrf.mxu1 }
 0x640   :  { %v579_v17 = vadd.f32 %v578_v15, %v1946_v53 }
 0x641   :  { %v580_v19 = vpop.f32.mrf.mxu1 }
 0x642   :  { %v587_v21 = vrot.slane %v579_v17, 4  ;;  %v581_v23 = vadd.f32 %v580_v19, %v1943_v43  ;;  %v618_v27 = vrot.slane %v579_v17, 6 }
 0x644   :  { %v628_v25 = vrot.slane %v581_v23, 6  ;;  %596 = vrot.lane.b32.xlu1 %v587_v21, %s1707_s2  ;;  %v589_v31 = vadd.f32 %v587_v21, %v583_v29  ;;  %v620_v35 = vadd.f32 %v618_v27, %v584_v33 }
 0x646   :  { %637 = vrot.lane.b32.xlu0 %v628_v25, %s1707_s2  ;;  %v1525_v36 = vmul.f32 -1.442695, %v589_v31  ;;  %v1526_v37 = vmul.f32 -1.442695, %v620_v35  ;;  %v630_v59 = vadd.f32 %v628_v25, %v585_v52 }
 0x648   :  { %1595 = vpow2.f32 %v1525_v36  ;;  %v1527_v61 = vmul.f32 -1.442695, %v630_v59  ;;  %v757_v59 = vld [vmem:[#allocation2 + $0x18] sm:$0x3] }
 0x649   :  { %1597 = vpow2.f32 %v1526_v37 }
 0x655   :  { %v1596_v38 = vpop.eup %1595 }
 0x656   :  { %v1598_v39 = vpop.eup %1597  ;;  %v593_v40 = vadd.f32 1.0, %v1596_v38 }
 0x657   :  { %v624_v41 = vadd.f32 1.0, %v1598_v39 }
 0x658   :  { %1599 = vrcp.f32 %v593_v40 }
 0x659   :  { %1601 = vrcp.f32 %v624_v41  ;;  %v756_v41 = vld [vmem:[#allocation2 + $0x10] sm:$0x3] }
 0x665   :  { %v1600_v34 = vpop.eup %1599 }
 0x666   :  { %v1602_v45 = vpop.eup %1601  ;;  %v606_v17 = vsub.f32 1.0, %v1600_v34 }
 0x6b6   :  { %v597_v42 = vpop.permute.xlu1 %596 }
 0x6b7   :  { %v599_v44 = vmul.f32 %v1600_v34, %v597_v42 }
 0x6b8   :  { %v638_v46 = vpop.permute.xlu0 %637 }
 0x6b9   :  { %v640_v47 = vmul.f32 %v1602_v45, %v638_v46  ;;  %601 = vrot.lane.b32.xlu1 %v599_v44, %s1707_s2 }
 0x6bb   :  { %642 = vrot.lane.b32.xlu0 %v640_v47, %s1707_s2 }
 0x6bd   :  { %654 = vrot.lane.b32.xlu1 %v653_v48, %s1708_s4 }
 0x6c1   :  { %613 = vrot.lane.b32.xlu1 %v612_v50, %s1709_s13 }
 0x72b   :  { %v602_v51 = vpop.permute.xlu1 %601 }
 0x72c   :  { %v604_v56 = vadd.f32 %v602_v51, %v583_v29 }
 0x72d   :  { %v643_v55 = vpop.permute.xlu0 %642 }
 0x72e   :  { %v645_v54 = vadd.f32 %v643_v55, %v585_v52 }
 0x72f   :  { %v655_v2 = vpop.permute.xlu1 %654 }
 0x730   :  { %1603 = vtanh.f32 %v645_v54 }
 0x731   :  { %1605 = vtanh.f32 %v604_v56 }
 0x732   :  { %1607 = vpow2.f32 %v1527_v61 }
 0x733   :  { %v614_v13 = vpop.permute.xlu1 %613 }
 0x734   :  { %v616_v21 = vmul.f32 %v1600_v34, %v614_v13  ;;  %v755_v34 = vld [vmem:[#allocation2] sm:$0xc0] }
 0x73d   :  { %v1604_v57 = vpop.eup %1603 }
 0x73e   :  { %649 = vrot.lane.b32.xlu0 %v1604_v57, %s1708_s4  ;;  %v1606_v58 = vpop.eup %1605 }
 0x73f   :  { %v1608_v62 = vpop.eup %1607 }
 0x740   :  { %v634_v63 = vadd.f32 1.0, %v1608_v62 }
 0x742   :  { %608 = vrot.lane.b32.xlu0 %v1606_v58, %s1708_s4  ;;  %1609 = vrcp.f32 %v634_v63 }
 0x74f   :  { %v1610_v0 = vpop.eup %1609 }
 0x750   :  { %v647_v5 = vsub.f32 1.0, %v1610_v0  ;;  %v657_v9 = vmul.f32 %v1610_v0, %v655_v2 }
 0x7b0   :  { %v650_v7 = vpop.permute.xlu0 %649 }
 0x7b1   :  { %v652_v11 = vmul.f32 %v650_v7, %v647_v5 }
 0x7b3   :  { %v2039_v15 = vadd.f32 %v657_v9, %v652_v11 }
 0x7b4   :  { %v609_v19 = vpop.permute.xlu0 %608 }
 0x7b5   :  { %v611_v23 = vmul.f32 %v609_v19, %v606_v17  ;;  %v664_v25 = vrot.slane %v2039_v15, 6 }
 0x7b7   :  { %v617_v27 = vadd.f32 %v616_v21, %v611_v23  ;;  %665 = vrot.lane.b32.xlu1 %v664_v25, %s1709_s13 }
 0x7b9   :  { %660 = vrot.lane.b32.xlu0 %v617_v27, %s1708_s4 }
 0x829   :  { %v666_v29 = vpop.permute.xlu1 %665 }
 0x82b   :  { %v661_v31 = vpop.permute.xlu0 %660 }
 0x82c   :  { %v668_v33 = vsel %vm325_vm2, %v661_v31, %v666_v29  ;;  %1528 = vst.msk [vmem:[%s2297_s5] sm:$0x30] %vm672_vm6, %v661_v31 }
 0x82d   :  { %670 = vst.msk [vmem:[#allocation3 - $0x4] sm:$0x30] %vm669_vm7, %v668_v33 }
 0x834   :  { %v680_v35 = vld [vmem:[#allocation3] sm:$0x3] }
 0x835   :  { %1530 = vmatmul.mubr.msk.f32.vlgmr.msra.gmra.mxu0 %vm50_vm1, %v680_v35  ;;  %v784_v58 = vrot.slane %v680_v35, 2 }
 0x836   :  { %1032 = vmatpush1.msra.mxu0 %v1759_v4  ;;  %1079 = vmatprep.mubr.f32.mxu0 %v1706_v3 }
 0x837   :  { %1033 = vmatprep.subr.mxu0 %v1767_v6 }
 0x838   :  { %1034 = vmatpush1.msra.mxu0 %v1776_v8 }
 0x839   :  { %1035 = vmatprep.subr.mxu0 %v1785_v10 }
 0x83a   :  { %1036 = vmatpush1.msra.mxu0 %v1793_v12 }
 0x83b   :  { %1037 = vmatprep.subr.mxu0 %v1802_v14 }
 0x83c   :  { %1038 = vmatpush1.msra.mxu0 %v1811_v16 }
 0x83d   :  { %1039 = vmatprep.subr.mxu0 %v1820_v18 }
 0x83e   :  { %1040 = vmatpush1.msra.mxu0 %v1829_v20 }
 0x83f   :  { %1041 = vmatprep.subr.mxu0 %v1838_v22 }
 0x840   :  { %1042 = vmatpush1.msra.mxu0 %v1847_v24 }
 0x841   :  { %1043 = vmatprep.subr.mxu0 %v1856_v26 }
 0x842   :  { %1044 = vmatpush1.msra.mxu0 %v1865_v28 }
 0x843   :  { %1045 = vmatprep.subr.mxu0 %v1874_v30 }
 0x844   :  { %1046 = vmatpush1.msra.mxu0 %v1883_v32 }
 0x845   :  { %1365 = vmatprep.subr.mxu0 %v1746_v1 }
 0x8f5   :  { %v750_v36 = vpop.f32.mrf.mxu0 }
 0x8f6   :  { %v751_v37 = vadd.f32 %v750_v36, %v1946_v53 }
 0x8f7   :  { %v752_v38 = vpop.f32.mrf.mxu0 }
 0x8f8   :  { %v759_v39 = vrot.slane %v751_v37, 2  ;;  %v753_v40 = vadd.f32 %v752_v38, %v1943_v43  ;;  %v790_v42 = vadd.f32 %v756_v41, %v751_v37 }
 0x8fa   :  { %805 = vrot.lane.b32.xlu0 %v753_v40, %s1707_s2  ;;  %768 = vrot.lane.b32.xlu1 %v759_v39, %s1707_s2  ;;  %v761_v44 = vadd.f32 %v759_v39, %v755_v34  ;;  %v1532_v45 = vmul.f32 -1.442695, %v790_v42  ;;  %v797_v7 = vadd.f32 %v757_v59, %v753_v40 }
 0x8fc   :  { %v1531_v46 = vmul.f32 -1.442695, %v761_v44  ;;  %1611 = vpow2.f32 %v1532_v45  ;;  %v1533_v9 = vmul.f32 -1.442695, %v797_v7 }
 0x8fe   :  { %1613 = vpow2.f32 %v1531_v46 }
 0x909   :  { %v1612_v1 = vpop.eup %1611 }
 0x90a   :  { %v794_v48 = vadd.f32 1.0, %v1612_v1 }
 0x90b   :  { %v1614_v47 = vpop.eup %1613 }
 0x90c   :  { %v765_v50 = vadd.f32 1.0, %v1614_v47  ;;  %1615 = vrcp.f32 %v794_v48 }
 0x90e   :  { %1617 = vrcp.f32 %v765_v50 }
 0x919   :  { %v1616_v51 = vpop.eup %1615 }
 0x91b   :  { %v1618_v52 = vpop.eup %1617 }
 0x91c   :  { %v778_v33 = vsub.f32 1.0, %v1618_v52 }
 0x96c   :  { %v806_v55 = vpop.permute.xlu0 %805  ;;  %v769_v54 = vpop.permute.xlu1 %768 }
 0x96d   :  { %v808_v56 = vmul.f32 %v1616_v51, %v806_v55  ;;  %v771_v57 = vmul.f32 %v1618_v52, %v769_v54  ;;  %v924_v55 = vld [vmem:[#allocation2 + $0x8] sm:$0xc0] }
 0x96f   :  { %810 = vrot.lane.b32.xlu0 %v808_v56, %s1707_s2  ;;  %773 = vrot.lane.b32.xlu1 %v771_v57, %s1707_s2 }
 0x973   :  { %821 = vrot.lane.b32.xlu1 %v680_v35, %s1708_s4 }
 0x977   :  { %785 = vrot.lane.b32.xlu1 %v784_v58, %s1709_s13 }
 0x9e1   :  { %v811_v61 = vpop.permute.xlu0 %810  ;;  %v774_v62 = vpop.permute.xlu1 %773 }
 0x9e2   :  { %v813_v63 = vadd.f32 %v811_v61, %v757_v59  ;;  %v776_v0 = vadd.f32 %v774_v62, %v755_v34 }
 0x9e4   :  { %1619 = vtanh.f32 %v813_v63 }
 0x9e5   :  { %1621 = vtanh.f32 %v776_v0  ;;  %v822_v19 = vpop.permute.xlu1 %821 }
 0x9e6   :  { %1623 = vpow2.f32 %v1533_v9 }
 0x9e9   :  { %v786_v29 = vpop.permute.xlu1 %785 }
 0x9ea   :  { %v788_v36 = vmul.f32 %v1618_v52, %v786_v29 }
 0x9f1   :  { %v1620_v2 = vpop.eup %1619 }
 0x9f2   :  { %817 = vrot.lane.b32.xlu0 %v1620_v2, %s1708_s4  ;;  %v1622_v5 = vpop.eup %1621 }
 0x9f3   :  { %v1624_v11 = vpop.eup %1623 }
 0x9f4   :  { %v801_v13 = vadd.f32 1.0, %v1624_v11 }
 0x9f6   :  { %780 = vrot.lane.b32.xlu0 %v1622_v5, %s1708_s4  ;;  %1625 = vrcp.f32 %v801_v13 }
 0xa03   :  { %v1626_v17 = vpop.eup %1625 }
 0xa04   :  { %v815_v21 = vsub.f32 1.0, %v1626_v17  ;;  %v824_v25 = vmul.f32 %v1626_v17, %v822_v19 }
 0xa64   :  { %v818_v23 = vpop.permute.xlu0 %817 }
 0xa65   :  { %v820_v27 = vmul.f32 %v818_v23, %v815_v21 }
 0xa67   :  { %v2078_v31 = vadd.f32 %v824_v25, %v820_v27 }
 0xa68   :  { %v781_v35 = vpop.permute.xlu0 %780 }
 0xa69   :  { %v783_v37 = vmul.f32 %v781_v35, %v778_v33  ;;  %v831_v38 = vrot.slane %v2078_v31, 2 }
 0xa6b   :  { %v789_v39 = vadd.f32 %v788_v36, %v783_v37  ;;  %832 = vrot.lane.b32.xlu1 %v831_v38, %s1709_s13 }
 0xa6d   :  { %827 = vrot.lane.b32.xlu0 %v789_v39, %s1708_s4  ;;  %v1691_v39 = vld [vmem:[%s2293_s3 + $0x70] sm:$0xff] }
 0xadd   :  { %v833_v40 = vpop.permute.xlu1 %832 }
 0xadf   :  { %v828_v41 = vpop.permute.xlu0 %827 }
 0xae0   :  { %v835_v34 = vsel %vm325_vm2, %v828_v41, %v833_v40  ;;  %1534 = vst.msk [vmem:[%s2297_s5] sm:$0xc0] %vm839_vm8, %v828_v41  ;;  %v1692_v40 = vld [vmem:[%s2293_s3 + $0x68] sm:$0xff]  ;;  %v1693_v41 = vld [vmem:[%s2293_s3 + $0x60] sm:$0xff] }
 0xae1   :  { %837 = vst.msk [vmem:[#allocation3 - $0x6] sm:$0xc0] %vm836_vm9, %v835_v34  ;;  %v1694_v34 = vld [vmem:[%s2293_s3 + $0x58] sm:$0xff] }
 0xae8   :  { %v847_v42 = vld [vmem:[#allocation3] sm:$0x3] }
 0xae9   :  { %1536 = vmatmul.mubr.msk.f32.vlgmr.msra.gmra.mxu1 %vm50_vm1, %v847_v42  ;;  %v989_v51 = vrot.slane %v847_v42, 2 }
 0xaea   :  { %1199 = vmatpush1.msra.mxu1 %v1759_v4  ;;  %1246 = vmatprep.mubr.f32.mxu1 %v1706_v3 }
 0xaeb   :  { %1200 = vmatprep.subr.mxu1 %v1767_v6 }
 0xaec   :  { %1201 = vmatpush1.msra.mxu1 %v1776_v8 }
 0xaed   :  { %1202 = vmatprep.subr.mxu1 %v1785_v10 }
 0xaee   :  { %1203 = vmatpush1.msra.mxu1 %v1793_v12 }
 0xaef   :  { %1204 = vmatprep.subr.mxu1 %v1802_v14  ;;  %v922_v14 = vld [vmem:[#allocation2 + $0x10] sm:$0x3] }
 0xaf0   :  { %1205 = vmatpush1.msra.mxu1 %v1811_v16 }
 0xaf1   :  { %1206 = vmatprep.subr.mxu1 %v1820_v18 }
 0xaf2   :  { %1207 = vmatpush1.msra.mxu1 %v1829_v20  ;;  %v923_v20 = vld [vmem:[#allocation2] sm:$0xc0] }
 0xaf3   :  { %1208 = vmatprep.subr.mxu1 %v1838_v22 }
 0xaf4   :  { %1209 = vmatpush1.msra.mxu1 %v1847_v24 }
 0xaf5   :  { %1210 = vmatprep.subr.mxu1 %v1856_v26 }
 0xaf6   :  { %1211 = vmatpush1.msra.mxu1 %v1865_v28 }
 0xaf7   :  { %1212 = vmatprep.subr.mxu1 %v1874_v30 }
 0xaf8   :  { %1213 = vmatpush1.msra.mxu1 %v1883_v32 }
 0xba9   :  { %v917_v4 = vpop.f32.mrf.mxu1 }
 0xbaa   :  { %v918_v6 = vadd.f32 %v917_v4, %v1946_v53  ;;  %v1697_v4 = vld [vmem:[%s2293_s3 + $0x40] sm:$0xff] }
 0xbab   :  { %v919_v8 = vpop.f32.mrf.mxu1 }
 0xbac   :  { %v920_v10 = vadd.f32 %v919_v8, %v1943_v43  ;;  %933 = vrot.lane.b32.xlu1 %v918_v6, %s1707_s2  ;;  %v925_v16 = vadd.f32 %v922_v14, %v918_v6  ;;  %v954_v18 = vrot.slane %v918_v6, 2  ;;  %v1698_v6 = vld [vmem:[%s2293_s3 + $0x38] sm:$0xff]  ;;  %v1699_v8 = vld [vmem:[%s2293_s3 + $0x30] sm:$0xff] }
 0xbae   :  { %v964_v12 = vrot.slane %v920_v10, 2  ;;  %v1537_v22 = vmul.f32 -1.442695, %v925_v16  ;;  %v956_v24 = vadd.f32 %v954_v18, %v923_v20  ;;  %v1700_v10 = vld [vmem:[%s2293_s3 + $0x28] sm:$0xff]  ;;  %v1703_v16 = vld [vmem:[%s2293_s3 + $0x10] sm:$0xff]  ;;  %v1705_v20 = vld [vmem:[%s2293_s3] sm:$0xff] }
 0xbaf   :  { %v1704_v18 = vld [vmem:[%s2293_s3 + $0x8] sm:$0xff] }
 0xbb0   :  { %973 = vrot.lane.b32.xlu0 %v964_v12, %s1707_s2  ;;  %1627 = vpow2.f32 %v1537_v22  ;;  %v1538_v26 = vmul.f32 -1.442695, %v956_v24  ;;  %v966_v61 = vadd.f32 %v964_v12, %v924_v55  ;;  %v1701_v12 = vld [vmem:[%s2293_s3 + $0x20] sm:$0xff] }
 0xbb2   :  { %1629 = vpow2.f32 %v1538_v26  ;;  %v1539_v62 = vmul.f32 -1.442695, %v966_v61 }
 0xbbd   :  { %v1628_v28 = vpop.eup %1627 }
 0xbbe   :  { %v929_v30 = vadd.f32 1.0, %v1628_v28 }
 0xbbf   :  { %v1630_v32 = vpop.eup %1629 }
 0xbc0   :  { %1631 = vrcp.f32 %v929_v30  ;;  %v960_v44 = vadd.f32 1.0, %v1630_v32 }
 0xbc2   :  { %1633 = vrcp.f32 %v960_v44 }
 0xbcd   :  { %v1632_v45 = vpop.eup %1631 }
 0xbce   :  { %v943_v21 = vsub.f32 1.0, %v1632_v45 }
 0xbcf   :  { %v1634_v47 = vpop.eup %1633 }
 0xc1e   :  { %v934_v46 = vpop.permute.xlu1 %933 }
 0xc1f   :  { %v936_v1 = vmul.f32 %v1632_v45, %v934_v46 }
 0xc21   :  { %938 = vrot.lane.b32.xlu1 %v936_v1, %s1707_s2  ;;  %v1087_v1 = vld [vmem:[#allocation2] sm:$0x30] }
 0xc22   :  { %v974_v48 = vpop.permute.xlu0 %973 }
 0xc23   :  { %v976_v50 = vmul.f32 %v1634_v47, %v974_v48 }
 0xc25   :  { %978 = vrot.lane.b32.xlu0 %v976_v50, %s1707_s2  ;;  %990 = vrot.lane.b32.xlu1 %v989_v51, %s1708_s4 }
 0xc29   :  { %949 = vrot.lane.b32.xlu1 %v847_v42, %s1709_s13  ;;  %v1695_v42 = vld [vmem:[%s2293_s3 + $0x50] sm:$0xff] }
 0xc93   :  { %v939_v52 = vpop.permute.xlu1 %938 }
 0xc94   :  { %v941_v57 = vadd.f32 %v939_v52, %v922_v14  ;;  %v1702_v14 = vld [vmem:[%s2293_s3 + $0x18] sm:$0xff] }
 0xc97   :  { %v979_v54 = vpop.permute.xlu0 %978  ;;  %v991_v5 = vpop.permute.xlu1 %990 }
 0xc98   :  { %v981_v56 = vadd.f32 %v979_v54, %v924_v55 }
 0xc9a   :  { %1635 = vtanh.f32 %v981_v56 }
 0xc9b   :  { %1637 = vtanh.f32 %v941_v57  ;;  %v950_v17 = vpop.permute.xlu1 %949 }
 0xc9c   :  { %1639 = vpow2.f32 %v1539_v62  ;;  %v952_v25 = vmul.f32 %v1632_v45, %v950_v17  ;;  %v1086_v45 = vld [vmem:[#allocation2 + $0x10] sm:$0xc] }
 0xca7   :  { %v1636_v58 = vpop.eup %1635 }
 0xca8   :  { %985 = vrot.lane.b32.xlu0 %v1636_v58, %s1708_s4  ;;  %v1638_v59 = vpop.eup %1637 }
 0xca9   :  { %v1640_v63 = vpop.eup %1639 }
 0xcaa   :  { %v970_v0 = vadd.f32 1.0, %v1640_v63 }
 0xcac   :  { %945 = vrot.lane.b32.xlu0 %v1638_v59, %s1708_s4  ;;  %1641 = vrcp.f32 %v970_v0 }
 0xcb9   :  { %v1642_v2 = vpop.eup %1641 }
 0xcba   :  { %v983_v7 = vsub.f32 1.0, %v1642_v2  ;;  %v993_v11 = vmul.f32 %v1642_v2, %v991_v5  ;;  %v1088_v5 = vld [vmem:[#allocation2 + $0x8] sm:$0x30] }
 0xd1a   :  { %v986_v9 = vpop.permute.xlu0 %985 }
 0xd1b   :  { %v988_v13 = vmul.f32 %v986_v9, %v983_v7 }
 0xd1d   :  { %v2116_v19 = vadd.f32 %v993_v11, %v988_v13 }
 0xd1e   :  { %v946_v23 = vpop.permute.xlu0 %945 }
 0xd1f   :  { %v948_v27 = vmul.f32 %v946_v23, %v943_v21  ;;  %v1000_v29 = vrot.slane %v2116_v19, 6 }
 0xd21   :  { %v953_v33 = vadd.f32 %v952_v25, %v948_v27  ;;  %1001 = vrot.lane.b32.xlu1 %v1000_v29, %s1709_s13 }
 0xd23   :  { %996 = vrot.lane.b32.xlu0 %v953_v33, %s1708_s4 }
 0xd93   :  { %v1002_v35 = vpop.permute.xlu1 %1001 }
 0xd95   :  { %v2121_v36 = vpop.permute.xlu0 %996 }
 0xd96   :  { %v1004_v37 = vsel %vm325_vm2, %v2121_v36, %v1002_v35 }
 0xd97   :  { %1005 = vst.msk [vmem:[#allocation3] sm:$0x3] %vm138_vm0, %v1004_v37 }
 0xd9e   :  { %v2126_v38 = vld [vmem:[#allocation3] sm:$0x3] }
 0xd9f   :  { %1542 = vmatmul.mubr.msk.f32.vlgmr.msra.gmra.mxu0 %vm50_vm1, %v2126_v38  ;;  %v1156_v63 = vrot.slane %v2126_v38, 4  ;;  %v1115_v0 = vrot.slane %v2126_v38, 6 }
 0xda0   :  { %1366 = vmatpush1.msra.mxu0 %v1691_v39  ;;  %1413 = vmatprep.mubr.f32.mxu0 %v1706_v3  ;;  %v1696_v3 = vld [vmem:[%s2293_s3 + $0x48] sm:$0xff] }
 0xda1   :  { %1367 = vmatprep.subr.mxu0 %v1692_v40 }
 0xda2   :  { %1368 = vmatpush1.msra.mxu0 %v1693_v41 }
 0xda3   :  { %1369 = vmatprep.subr.mxu0 %v1694_v34 }
 0xda4   :  { %1370 = vmatpush1.msra.mxu0 %v1695_v42 }
 0xda5   :  { %1371 = vmatprep.subr.mxu0 %v1696_v3 }
 0xda6   :  { %1372 = vmatpush1.msra.mxu0 %v1697_v4 }
 0xda7   :  { %1373 = vmatprep.subr.mxu0 %v1698_v6 }
 0xda8   :  { %1374 = vmatpush1.msra.mxu0 %v1699_v8 }
 0xda9   :  { %1375 = vmatprep.subr.mxu0 %v1700_v10 }
 0xdaa   :  { %1376 = vmatpush1.msra.mxu0 %v1701_v12 }
 0xdab   :  { %1377 = vmatprep.subr.mxu0 %v1702_v14 }
 0xdac   :  { %1378 = vmatpush1.msra.mxu0 %v1703_v16 }
 0xdad   :  { %1379 = vmatprep.subr.mxu0 %v1704_v18 }
 0xdae   :  { %1380 = vmatpush1.msra.mxu0 %v1705_v20 }
 0xe5f   :  { %v1081_v22 = vpop.f32.mrf.mxu0 }
 0xe60   :  { %v1082_v24 = vadd.f32 %v1081_v22, %v1946_v53 }
 0xe61   :  { %v1083_v26 = vpop.f32.mrf.mxu0 }
 0xe62   :  { %v1090_v28 = vrot.slane %v1082_v24, 6  ;;  %v1084_v30 = vadd.f32 %v1083_v26, %v1943_v43  ;;  %v1121_v44 = vrot.slane %v1082_v24, 4 }
 0xe64   :  { %v1131_v32 = vrot.slane %v1084_v30, 4  ;;  %1099 = vrot.lane.b32.xlu1 %v1090_v28, %s1707_s2  ;;  %v1092_v46 = vadd.f32 %v1090_v28, %v1086_v45  ;;  %v1123_v47 = vadd.f32 %v1121_v44, %v1087_v1 }
 0xe66   :  { %1140 = vrot.lane.b32.xlu0 %v1131_v32, %s1707_s2  ;;  %v1543_v48 = vmul.f32 -1.442695, %v1092_v46  ;;  %v1544_v50 = vmul.f32 -1.442695, %v1123_v47  ;;  %v1133_v21 = vadd.f32 %v1131_v32, %v1088_v5  ;;  %v1253_v32 = vld [vmem:[#allocation2 + $0x10] sm:$0x30] }
 0xe68   :  { %1643 = vpow2.f32 %v1543_v48  ;;  %v1545_v23 = vmul.f32 -1.442695, %v1133_v21 }
 0xe69   :  { %1645 = vpow2.f32 %v1544_v50 }
 0xe75   :  { %v1644_v51 = vpop.eup %1643 }
 0xe76   :  { %v1646_v52 = vpop.eup %1645  ;;  %v1096_v55 = vadd.f32 1.0, %v1644_v51 }
 0xe77   :  { %v1127_v54 = vadd.f32 1.0, %v1646_v52 }
 0xe78   :  { %1647 = vrcp.f32 %v1096_v55 }
 0xe79   :  { %1649 = vrcp.f32 %v1127_v54 }
 0xe85   :  { %v1648_v56 = vpop.eup %1647 }
 0xe86   :  { %v1650_v59 = vpop.eup %1649  ;;  %v1109_v34 = vsub.f32 1.0, %v1648_v56 }
 0xed6   :  { %v1100_v57 = vpop.permute.xlu1 %1099 }
 0xed7   :  { %v1102_v58 = vmul.f32 %v1648_v56, %v1100_v57 }
 0xed8   :  { %v1141_v61 = vpop.permute.xlu0 %1140 }
 0xed9   :  { %v1143_v62 = vmul.f32 %v1650_v59, %v1141_v61  ;;  %1104 = vrot.lane.b32.xlu1 %v1102_v58, %s1707_s2 }
 0xedb   :  { %1145 = vrot.lane.b32.xlu0 %v1143_v62, %s1707_s2 }
 0xedd   :  { %1157 = vrot.lane.b32.xlu1 %v1156_v63, %s1708_s4 }
 0xee1   :  { %1116 = vrot.lane.b32.xlu1 %v1115_v0, %s1709_s13  ;;  %v1255_v0 = vld [vmem:[#allocation2 + $0x8] sm:$0xc] }
 0xf4b   :  { %v1105_v2 = vpop.permute.xlu1 %1104 }
 0xf4c   :  { %v1107_v11 = vadd.f32 %v1105_v2, %v1086_v45  ;;  %v1254_v45 = vld [vmem:[#allocation2] sm:$0xc] }
 0xf4d   :  { %v1146_v7 = vpop.permute.xlu0 %1145 }
 0xf4e   :  { %v1148_v9 = vadd.f32 %v1146_v7, %v1088_v5 }
 0xf4f   :  { %v1158_v33 = vpop.permute.xlu1 %1157 }
 0xf50   :  { %1651 = vtanh.f32 %v1148_v9 }
 0xf51   :  { %1653 = vtanh.f32 %v1107_v11 }
 0xf52   :  { %1655 = vpow2.f32 %v1545_v23 }
 0xf53   :  { %v1117_v40 = vpop.permute.xlu1 %1116 }
 0xf54   :  { %v1119_v3 = vmul.f32 %v1648_v56, %v1117_v40 }
 0xf5d   :  { %v1652_v13 = vpop.eup %1651 }
 0xf5e   :  { %1152 = vrot.lane.b32.xlu0 %v1652_v13, %s1708_s4  ;;  %v1654_v17 = vpop.eup %1653 }
 0xf5f   :  { %v1656_v25 = vpop.eup %1655 }
 0xf60   :  { %v1137_v27 = vadd.f32 1.0, %v1656_v25 }
 0xf62   :  { %1111 = vrot.lane.b32.xlu0 %v1654_v17, %s1708_s4  ;;  %1657 = vrcp.f32 %v1137_v27 }
 0xf6f   :  { %v1658_v29 = vpop.eup %1657 }
 0xf70   :  { %v1150_v35 = vsub.f32 1.0, %v1658_v29  ;;  %v1160_v38 = vmul.f32 %v1658_v29, %v1158_v33 }
 0xfd0   :  { %v1153_v37 = vpop.permute.xlu0 %1152 }
 0xfd1   :  { %v1155_v39 = vmul.f32 %v1153_v37, %v1150_v35 }
 0xfd3   :  { %v2188_v41 = vadd.f32 %v1160_v38, %v1155_v39 }
 0xfd4   :  { %v1112_v42 = vpop.permute.xlu0 %1111 }
 0xfd5   :  { %v1114_v4 = vmul.f32 %v1112_v42, %v1109_v34  ;;  %v1167_v6 = vrot.slane %v2188_v41, 2 }
 0xfd7   :  { %v1120_v8 = vadd.f32 %v1119_v3, %v1114_v4  ;;  %1168 = vrot.lane.b32.xlu1 %v1167_v6, %s1709_s13 }
 0xfd9   :  { %1163 = vrot.lane.b32.xlu0 %v1120_v8, %s1708_s4 }
0x1049   :  { %v1169_v10 = vpop.permute.xlu1 %1168 }
0x104b   :  { %v2193_v12 = vpop.permute.xlu0 %1163 }
0x104c   :  { %v1171_v14 = vsel %vm325_vm2, %v2193_v12, %v1169_v10 }
0x104d   :  { %1172 = vst.msk [vmem:[#allocation3 - $0x2] sm:$0xc] %vm497_vm5, %v1171_v14 }
0x1054   :  { %v1178_v16 = vld [vmem:[#allocation3] sm:$0x3] }
0x1055   :  { %1548 = vmatmul.mubr.msk.f32.vlgmr.msra.gmra.mxu1 %vm50_vm1, %v1178_v16  ;;  %v1323_v61 = vrot.slane %v1178_v16, 6  ;;  %v1282_v62 = vrot.slane %v1178_v16, 4 }
0x1115   :  { %v1248_v18 = vpop.f32.mrf.mxu1 }
0x1116   :  { %v1249_v20 = vadd.f32 %v1248_v18, %v1946_v53 }
0x1117   :  { %v1250_v22 = vpop.f32.mrf.mxu1 }
0x1118   :  { %v1257_v24 = vrot.slane %v1249_v20, 4  ;;  %v1251_v26 = vadd.f32 %v1250_v22, %v1943_v43  ;;  %v1288_v30 = vrot.slane %v1249_v20, 6 }
0x111a   :  { %v1298_v28 = vrot.slane %v1251_v26, 6  ;;  %1266 = vrot.lane.b32.xlu1 %v1257_v24, %s1707_s2  ;;  %v1259_v44 = vadd.f32 %v1257_v24, %v1253_v32  ;;  %v1290_v46 = vadd.f32 %v1288_v30, %v1254_v45  ;;  %v1420_v30 = vld [vmem:[#allocation2 + $0x10] sm:$0xc0] }
0x111c   :  { %1307 = vrot.lane.b32.xlu0 %v1298_v28, %s1707_s2  ;;  %v1549_v1 = vmul.f32 -1.442695, %v1259_v44  ;;  %v1550_v47 = vmul.f32 -1.442695, %v1290_v46  ;;  %v1300_v13 = vadd.f32 %v1298_v28, %v1255_v0  ;;  %v1421_v28 = vld [vmem:[#allocation2] sm:$0x3] }
0x111e   :  { %1659 = vpow2.f32 %v1549_v1  ;;  %v1551_v17 = vmul.f32 -1.442695, %v1300_v13 }
0x111f   :  { %1661 = vpow2.f32 %v1550_v47 }
0x112b   :  { %v1660_v48 = vpop.eup %1659 }
0x112c   :  { %v1662_v50 = vpop.eup %1661  ;;  %v1263_v51 = vadd.f32 1.0, %v1660_v48 }
0x112d   :  { %v1294_v52 = vadd.f32 1.0, %v1662_v50 }
0x112e   :  { %1663 = vrcp.f32 %v1263_v51 }
0x112f   :  { %1665 = vrcp.f32 %v1294_v52 }
0x113b   :  { %v1664_v55 = vpop.eup %1663 }
0x113c   :  { %v1666_v57 = vpop.eup %1665  ;;  %v1276_v40 = vsub.f32 1.0, %v1664_v55 }
0x118c   :  { %v1267_v54 = vpop.permute.xlu1 %1266 }
0x118d   :  { %v1269_v56 = vmul.f32 %v1664_v55, %v1267_v54 }
0x118e   :  { %v1308_v58 = vpop.permute.xlu0 %1307 }
0x118f   :  { %v1310_v59 = vmul.f32 %v1666_v57, %v1308_v58  ;;  %1271 = vrot.lane.b32.xlu1 %v1269_v56, %s1707_s2  ;;  %v1422_v57 = vld [vmem:[#allocation2 + $0x8] sm:$0x3] }
0x1191   :  { %1312 = vrot.lane.b32.xlu0 %v1310_v59, %s1707_s2 }
0x1193   :  { %1324 = vrot.lane.b32.xlu1 %v1323_v61, %s1708_s4 }
0x1197   :  { %1283 = vrot.lane.b32.xlu1 %v1282_v62, %s1709_s13 }
0x1201   :  { %v1272_v63 = vpop.permute.xlu1 %1271 }
0x1202   :  { %v1274_v7 = vadd.f32 %v1272_v63, %v1253_v32 }
0x1203   :  { %v1313_v2 = vpop.permute.xlu0 %1312 }
0x1204   :  { %v1315_v5 = vadd.f32 %v1313_v2, %v1255_v0 }
0x1205   :  { %v1325_v27 = vpop.permute.xlu1 %1324 }
0x1206   :  { %1667 = vtanh.f32 %v1315_v5 }
0x1207   :  { %1669 = vtanh.f32 %v1274_v7 }
0x1208   :  { %1671 = vpow2.f32 %v1551_v17 }
0x1209   :  { %v1284_v38 = vpop.permute.xlu1 %1283 }
0x120a   :  { %v1286_v42 = vmul.f32 %v1664_v55, %v1284_v38 }
0x1213   :  { %v1668_v9 = vpop.eup %1667 }
0x1214   :  { %1319 = vrot.lane.b32.xlu0 %v1668_v9, %s1708_s4  ;;  %v1670_v11 = vpop.eup %1669 }
0x1215   :  { %v1672_v21 = vpop.eup %1671 }
0x1216   :  { %v1304_v23 = vadd.f32 1.0, %v1672_v21 }
0x1218   :  { %1278 = vrot.lane.b32.xlu0 %v1670_v11, %s1708_s4  ;;  %1673 = vrcp.f32 %v1304_v23 }
0x1225   :  { %v1674_v25 = vpop.eup %1673 }
0x1226   :  { %v1317_v29 = vsub.f32 1.0, %v1674_v25  ;;  %v1327_v35 = vmul.f32 %v1674_v25, %v1325_v27 }
0x1286   :  { %v1320_v33 = vpop.permute.xlu0 %1319 }
0x1287   :  { %v1322_v37 = vmul.f32 %v1320_v33, %v1317_v29 }
0x1289   :  { %v2209_v39 = vadd.f32 %v1327_v35, %v1322_v37 }
0x128a   :  { %v1279_v34 = vpop.permute.xlu0 %1278 }
0x128b   :  { %v1281_v3 = vmul.f32 %v1279_v34, %v1276_v40  ;;  %v1334_v4 = vrot.slane %v2209_v39, 6 }
0x128d   :  { %v1287_v6 = vadd.f32 %v1286_v42, %v1281_v3  ;;  %1335 = vrot.lane.b32.xlu1 %v1334_v4, %s1709_s13 }
0x128f   :  { %1330 = vrot.lane.b32.xlu0 %v1287_v6, %s1708_s4 }
0x12ff   :  { %v1336_v8 = vpop.permute.xlu1 %1335 }
0x1301   :  { %v1331_v10 = vpop.permute.xlu0 %1330 }
0x1302   :  { %v1338_v14 = vsel %vm325_vm2, %v1331_v10, %v1336_v8 }
0x1303   :  { %1339 = vst.msk [vmem:[#allocation3 - $0x4] sm:$0x30] %vm669_vm7, %v1338_v14 }
0x130a   :  { %v1345_v16 = vld [vmem:[#allocation3] sm:$0x3] }
0x130b   :  { %1554 = vmatmul.mubr.msk.f32.vlgmr.msra.gmra.mxu0 %vm50_vm1, %v1345_v16  ;;  %v1449_v56 = vrot.slane %v1345_v16, 2 }
0x13cb   :  { %v1415_v18 = vpop.f32.mrf.mxu0 }
0x13cc   :  { %v1416_v20 = vadd.f32 %v1415_v18, %v1946_v53 }
0x13cd   :  { %v1417_v22 = vpop.f32.mrf.mxu0 }
0x13ce   :  { %v1424_v24 = vrot.slane %v1416_v20, 2  ;;  %v1418_v26 = vadd.f32 %v1417_v22, %v1943_v43  ;;  %v1455_v32 = vadd.f32 %v1421_v28, %v1416_v20 }
0x13d0   :  { %1470 = vrot.lane.b32.xlu0 %v1418_v26, %s1707_s2  ;;  %1433 = vrot.lane.b32.xlu1 %v1424_v24, %s1707_s2  ;;  %v1426_v44 = vadd.f32 %v1424_v24, %v1420_v30  ;;  %v1556_v45 = vmul.f32 -1.442695, %v1455_v32  ;;  %v1462_v58 = vadd.f32 %v1422_v57, %v1418_v26 }
0x13d2   :  { %v1555_v46 = vmul.f32 -1.442695, %v1426_v44  ;;  %1675 = vpow2.f32 %v1556_v45  ;;  %v1557_v59 = vmul.f32 -1.442695, %v1462_v58 }
0x13d4   :  { %1677 = vpow2.f32 %v1555_v46 }
0x13df   :  { %v1676_v1 = vpop.eup %1675 }
0x13e0   :  { %v1459_v48 = vadd.f32 1.0, %v1676_v1 }
0x13e1   :  { %v1678_v47 = vpop.eup %1677 }
0x13e2   :  { %v1430_v53 = vadd.f32 1.0, %v1678_v47  ;;  %1679 = vrcp.f32 %v1459_v48 }
0x13e4   :  { %1681 = vrcp.f32 %v1430_v53 }
0x13e5   :  { %1683 = vpow2.f32 %v1557_v59 }
0x13ef   :  { %v1680_v50 = vpop.eup %1679 }
0x13f1   :  { %v1682_v43 = vpop.eup %1681 }
0x13f2   :  { %v1684_v61 = vpop.eup %1683  ;;  %v1443_v29 = vsub.f32 1.0, %v1682_v43 }
0x13f3   :  { %v1466_v62 = vadd.f32 1.0, %v1684_v61 }
0x13f5   :  { %1685 = vrcp.f32 %v1466_v62 }
0x1402   :  { %v1686_v7 = vpop.eup %1685 }
0x1403   :  { %v1480_v23 = vsub.f32 1.0, %v1686_v7 }
0x1442   :  { %v1471_v51 = vpop.permute.xlu0 %1470  ;;  %v1434_v52 = vpop.permute.xlu1 %1433 }
0x1443   :  { %v1473_v55 = vmul.f32 %v1680_v50, %v1471_v51  ;;  %v1436_v54 = vmul.f32 %v1682_v43, %v1434_v52 }
0x1445   :  { %1475 = vrot.lane.b32.xlu0 %v1473_v55, %s1707_s2  ;;  %1438 = vrot.lane.b32.xlu1 %v1436_v54, %s1707_s2 }
0x1449   :  { %1486 = vrot.lane.b32.xlu1 %v1345_v16, %s1708_s4 }
0x144d   :  { %1450 = vrot.lane.b32.xlu1 %v1449_v56, %s1709_s13 }
0x1451   :  { %502 = vrot.lane.b32.xlu1 %v2000_v60, %s1709_s13 }
0x1455   :  { %841 = vrot.lane.b32.xlu1 %v2078_v31, %s1709_s13 }
0x1459   :  { %1174 = vrot.lane.b32.xlu1 %v2188_v41, %s1709_s13 }
0x14b7   :  { %v1476_v63 = vpop.permute.xlu0 %1475  ;;  %v1439_v0 = vpop.permute.xlu1 %1438 }
0x14b8   :  { %v1478_v2 = vadd.f32 %v1476_v63, %v1422_v57  ;;  %v1441_v5 = vadd.f32 %v1439_v0, %v1420_v30 }
0x14ba   :  { %1687 = vtanh.f32 %v1478_v2 }
0x14bb   :  { %v1487_v60 = vpop.permute.xlu1 %1486  ;;  %1689 = vtanh.f32 %v1441_v5 }
0x14bc   :  { %v1489_v9 = vmul.f32 %v1686_v7, %v1487_v60 }
0x14bf   :  { %v1451_v31 = vpop.permute.xlu1 %1450 }
0x14c0   :  { %v1453_v35 = vmul.f32 %v1682_v43, %v1451_v31 }
0x14c3   :  { %v503_v11 = vpop.permute.xlu1 %502 }
0x14c4   :  { %1523 = vst.msk [vmem:[%s2297_s5 + $0x8] sm:$0x30] %vm506_vm10, %v503_v11 }
0x14c5   :  { %1552 = vst.msk [vmem:[%s2297_s5 + $0x8] sm:$0x30] %vm672_vm6, %v1331_v10 }
0x14c7   :  { %v1688_v41 = vpop.eup %1687  ;;  %v842_v13 = vpop.permute.xlu1 %841 }
0x14c8   :  { %1535 = vst.msk [vmem:[%s2297_s5 + $0x8] sm:$0x3] %vm845_vm11, %v842_v13  ;;  %1482 = vrot.lane.b32.xlu0 %v1688_v41, %s1708_s4  ;;  %v1690_v17 = vpop.eup %1689 }
0x14c9   :  { %1540 = vst.msk [vmem:[%s2297_s5 + $0x8] sm:$0x3] %vm328_vm3, %v2121_v36 }
0x14cb   :  { %v1175_v21 = vpop.permute.xlu1 %1174 }
0x14cc   :  { %1547 = vst.msk [vmem:[%s2297_s5] sm:$0x30] %vm506_vm10, %v1175_v21  ;;  %1445 = vrot.lane.b32.xlu0 %v1690_v17, %s1708_s4 }
0x14d0   :  { %330 = vrot.lane.b32.xlu0 %v1961_v49, %s1709_s13 }
0x14d4   :  { %674 = vrot.lane.b32.xlu0 %v2039_v15, %s1709_s13 }
0x14d8   :  { %1007 = vrot.lane.b32.xlu0 %v2116_v19, %s1709_s13 }
0x153a   :  { %v1483_v25 = vpop.permute.xlu0 %1482 }
0x153b   :  { %v1485_v36 = vmul.f32 %v1483_v25, %v1480_v23 }
0x153d   :  { %v1490_v27 = vadd.f32 %v1489_v9, %v1485_v36 }
0x153e   :  { %v1446_v33 = vpop.permute.xlu0 %1445 }
0x153f   :  { %v1448_v37 = vmul.f32 %v1446_v33, %v1443_v29  ;;  %v1496_v38 = vrot.slane %v1490_v27, 2 }
0x1541   :  { %v1454_v40 = vadd.f32 %v1453_v35, %v1448_v37  ;;  %1497 = vrot.lane.b32.xlu1 %v1496_v38, %s1709_s13 }
0x1542   :  { %v331_v49 = vpop.permute.xlu0 %330 }
0x1543   :  { %1517 = vst.msk [vmem:[%s2297_s5 + $0x8] sm:$0xc0] %vm334_vm12, %v331_v49  ;;  %1492 = vrot.lane.b32.xlu0 %v1454_v40, %s1708_s4 }
0x1545   :  { %1503 = vrot.lane.b32.xlu1 %v1490_v27, %s1709_s13 }
0x1546   :  { %v675_v15 = vpop.permute.xlu0 %674 }
0x1547   :  { %1529 = vst.msk [vmem:[%s2297_s5 + $0x8] sm:$0xc] %vm678_vm13, %v675_v15  ;;  %1341 = vrot.lane.b32.xlu0 %v2209_v39, %s1709_s13 }
0x1548   :  { %1546 = vst.msk [vmem:[%s2297_s5 + $0x8] sm:$0xc] %vm500_vm4, %v2193_v12 }
0x154a   :  { %v1008_v19 = vpop.permute.xlu0 %1007 }
0x154b   :  { %1541 = vst.msk [vmem:[%s2297_s5] sm:$0xc0] %vm334_vm12, %v1008_v19 }
0x15b3   :  { %v1498_v34 = vpop.permute.xlu1 %1497 }
0x15b5   :  { %v1493_v42 = vpop.permute.xlu0 %1492 }
0x15b6   :  { %v1500_v3 = vsel %vm325_vm2, %v1493_v42, %v1498_v34  ;;  %1558 = vst.msk [vmem:[%s2297_s5 + $0x8] sm:$0xc0] %vm839_vm8, %v1493_v42 }
0x15b7   :  { %1501 = vst.msk [vmem:[#allocation3 - $0x6] sm:$0xc0] %vm836_vm9, %v1500_v3  ;;  %v1504_v39 = vpop.permute.xlu1 %1503 }
0x15b8   :  { %1506 = vst.msk [vmem:[%s2297_s5] sm:$0x3] %vm845_vm11, %v1504_v39 }
0x15b9   :  { %v1342_v12 = vpop.permute.xlu0 %1341 }
0x15ba   :  { %1553 = vst.msk [vmem:[%s2297_s5] sm:$0xc] %vm678_vm13, %v1342_v12 }

</bundles_post_ra>
